<compile_context>
chip_gen: v6e
topology: v6e:2x2x1
jax: 0.10.0
libtpu: 0.0.40
codegen_flags: <defaults>
</compile_context>

<pallas_src>
import functools
import math

import jax
import jax.numpy as jnp
from jax import lax
from jax.experimental import pallas as pl
from jax.experimental.pallas import tpu as pltpu


def _apply_lstm_gates(gates, c, hidden):
    """PyTorch nn.LSTM cell gate order (i, f, g, o); gates: [B, 4H] f32."""
    i = jax.nn.sigmoid(gates[:, 0 * hidden:1 * hidden])
    f = jax.nn.sigmoid(gates[:, 1 * hidden:2 * hidden])
    g = jnp.tanh(gates[:, 2 * hidden:3 * hidden])
    o = jax.nn.sigmoid(gates[:, 3 * hidden:4 * hidden])
    c_new = f * c + i * g
    h_new = o * jnp.tanh(c_new)
    return h_new, c_new


def rnntsp_kernel(cx_ref, cy_ref, gumbel_ref,
                  w_emb_ref, start_ref,
                  enc_wih_ref, enc_whh_ref, enc_b_ref,
                  dec_w_ref, dec_b_ref,
                  gl_wq_ref, gl_bq_ref,
                  pt_wq_ref, pt_bq_ref,
                  wk_ref, bk_ref,
                  gl_v_ref, pt_v_ref,
                  logp_ref, idx_ref,
                  emb_ref, keysg_ref, keysp_ref, gx_ref, hch_ref,
                  *, TB, L, E, H, CH, n_glimpses, C_glimpse, C_pointer):
    f32 = jnp.float32
    bf16 = jnp.bfloat16
    NEG = f32(-100000.0)

    # ---- GraphEmbedding: emb[l, b, :] = x*W_emb[0] + y*W_emb[1] (no bias) ----
    w_emb = w_emb_ref[...]                                   # [2, E] f32
    cx = cx_ref[...]                                         # [L, TB] f32
    cy = cy_ref[...]
    emb_ref[...] = (cx[:, :, None] * w_emb[0, :][None, None, :]
                    + cy[:, :, None] * w_emb[1, :][None, None, :])

    # ---- Encoder LSTM + key projections, chunked over timesteps ----
    enc_wih = enc_wih_ref[...]                               # [E, 4H] bf16
    enc_whh = enc_whh_ref[...]                               # [H, 4H] bf16
    enc_b = enc_b_ref[...]                                   # [1, 4H] f32
    wk = wk_ref[...]                                         # [H, 2H] bf16 (gl | pt)
    bk = bk_ref[...]                                         # [1, 2H] f32

    h = jnp.zeros((TB, H), f32)
    c = jnp.zeros((TB, H), f32)

    n_full = L // CH
    chunks = [(ci * CH, CH) for ci in range(n_full)]
    if L % CH:
        chunks.append((n_full * CH, L % CH))

    for (t0, cl) in chunks:                                  # static Python loop
        # hoisted input projection for this chunk: one [cl*TB, E] @ [E, 4H]
        emb_chunk = emb_ref[pl.ds(t0, cl)]                   # [cl, TB, E] f32
        gx = (jnp.dot(emb_chunk.reshape(cl * TB, E).astype(bf16), enc_wih,
                      preferred_element_type=f32) + enc_b)
        gx_ref[pl.ds(0, cl)] = gx.reshape(cl, TB, 4 * H)

        def enc_step(tl, carry):
            h, c = carry
            gates = gx_ref[tl] + jnp.dot(h.astype(bf16), enc_whh,
                                         preferred_element_type=f32)
            h, c = _apply_lstm_gates(gates, c, H)
            hch_ref[tl] = h.astype(bf16)
            return (h, c)

        h, c = lax.fori_loop(0, cl, enc_step, (h, c),
                             unroll=True if cl <= 8 else 2)

        # merged glimpse+pointer key projection: [cl*TB, H] @ [H, 2H] (N=256)
        hcat = hch_ref[pl.ds(0, cl)].reshape(cl * TB, H)     # bf16
        kcat = (jnp.dot(hcat, wk, preferred_element_type=f32) + bk)
        kcat = kcat.reshape(cl, TB, 2 * H)
        keysg_ref[pl.ds(t0, cl)] = kcat[:, :, 0:H].astype(bf16)
        keysp_ref[pl.ds(t0, cl)] = kcat[:, :, H:2 * H].astype(bf16)

    h_enc, c_enc = h, c                                      # decoder init state

    # ---- Decoder / pointer loop ----
    dec_w = dec_w_ref[...]                                   # [E+H, 4H] bf16 (wih | whh)
    gl_wq = gl_wq_ref[...]                                   # [H, H] bf16
    pt_wq = pt_wq_ref[...]
    gl_v = gl_v_ref[...]                                     # [1, H] bf16
    pt_v = pt_v_ref[...]

    # hoisted broadcasts (JAX does not CSE broadcast_in_dim inside loops)
    dec_b_b = jnp.broadcast_to(dec_b_ref[...], (TB, 4 * H))
    gl_bq_b = jnp.broadcast_to(gl_bq_ref[...], (TB, H))
    pt_bq_b = jnp.broadcast_to(pt_bq_ref[...], (TB, H))

    iota_lb = lax.broadcasted_iota(jnp.int32, (L, TB), 0)    # city index per row

    def attn_logits(query, keys_ref, wq, bq_b, v, clip):
        # q projection on the MXU (f32 acc); inner tanh on the EUP in bf16.
        # TODO(synk): on v5e (no bf16 VPU/EUP) keep this inner path in f32.
        q = jnp.dot(query.astype(bf16), wq, preferred_element_type=f32) + bq_b
        u = jnp.tanh(keys_ref[...] + q[None, :, :].astype(bf16))   # [L, TB, H] bf16
        raw = jnp.sum(v[None, :, :] * u, axis=-1, dtype=f32)        # f32 accumulate
        return f32(clip) * jnp.tanh(raw)                             # [L, TB] f32

    def dec_step(t, carry):
        h, c, x, mask = carry                                # mask [L, TB] (1.0 = visited)
        xin = jnp.concatenate([x, h], axis=-1).astype(bf16)  # [TB, E+H]
        gates = jnp.dot(xin, dec_w, preferred_element_type=f32) + dec_b_b
        h, c = _apply_lstm_gates(gates, c, H)
        query = h                                            # [TB, H]

        # glimpse attention (static unroll over n_glimpses)
        for _ in range(n_glimpses):
            lg = attn_logits(query, keysg_ref, gl_wq, gl_bq_b, gl_v, C_glimpse)
            lg = jnp.where(mask > 0, NEG, lg)
            m = jnp.max(lg, axis=0, keepdims=True)
            e = jnp.exp(lg - m)
            p = e / jnp.sum(e, axis=0, keepdims=True)
            # readout: query[b, :] = sum_l p[l, b] * keys_g[l, b, :]
            query = jnp.sum(p[:, :, None] * keysg_ref[...], axis=0)

        # pointer attention
        lg = attn_logits(query, keysp_ref, pt_wq, pt_bq_b, pt_v, C_pointer)
        lg = jnp.where(mask > 0, NEG, lg)                    # [L, TB] f32

        # Categorical(softmax(lg)).sample() via Gumbel-max (f32)
        z = lg + gumbel_ref[t]
        zmax = jnp.max(z, axis=0, keepdims=True)
        chosen = jnp.min(jnp.where(z == zmax, iota_lb, jnp.int32(L)), axis=0)
        onehot = (iota_lb == chosen[None, :]).astype(f32)    # [L, TB]

        # exact log_prob of the chosen city
        m = jnp.max(lg, axis=0, keepdims=True)
        lse = m[0, :] + jnp.log(jnp.sum(jnp.exp(lg - m), axis=0))
        logp = jnp.sum(onehot * lg, axis=0) - lse            # [TB]

        logp_ref[t, :] = logp
        idx_ref[t, :] = chosen

        mask_new = jnp.maximum(mask, onehot)
        # next decoder input = embedded[b, chosen[b], :]  (requires E == H)
        x_next = jnp.sum(onehot[:, :, None] * emb_ref[...], axis=0)   # [TB, E]
        return (h, c, x_next, mask_new)

    x0 = jnp.broadcast_to(start_ref[...], (TB, E)).astype(f32)
    mask0 = jnp.zeros((L, TB), f32)
    lax.fori_loop(0, L, dec_step, (h_enc, c_enc, x0, mask0))


def init_params(key, E, H):
    ks = jax.random.split(key, 18)

    def u(k, shape, scale):
        return jax.random.uniform(k, shape, jnp.float32, -scale, scale)

    se = 1.0 / math.sqrt(E)
    sh = 1.0 / math.sqrt(H)
    # NOTE: enc_b / dec_b represent b_ih + b_hh; when importing a PyTorch
    # checkpoint, sum the two nn.LSTM biases into these.
    return {
        'w_emb':  u(ks[0], (2, E), se),
        'start':  u(ks[1], (1, E), se),
        'enc_wih': u(ks[2], (E, 4 * H), sh),
        'enc_whh': u(ks[3], (H, 4 * H), sh),
        'enc_b':  u(ks[4], (1, 4 * H), sh),
        'dec_wih': u(ks[5], (E, 4 * H), sh),
        'dec_whh': u(ks[6], (H, 4 * H), sh),
        'dec_b':  u(ks[7], (1, 4 * H), sh),
        'gl_wq':  u(ks[8], (H, H), sh),
        'gl_bq':  u(ks[9], (1, H), sh),
        'gl_wk':  u(ks[10], (H, H), sh),
        'gl_bk':  u(ks[11], (1, H), sh),
        'gl_v':   u(ks[12], (1, H), sh),
        'pt_wq':  u(ks[13], (H, H), sh),
        'pt_bq':  u(ks[14], (1, H), sh),
        'pt_wk':  u(ks[15], (H, H), sh),
        'pt_bk':  u(ks[16], (1, H), sh),
        'pt_v':   u(ks[17], (1, H), sh),
    }


def rnntsp_forward(coords, params, *, n_glimpses, C_glimpse, C_pointer, seed=0):
    """coords: [B, L, 2] f32.  Returns (log_probs [B, L] f32, chosen_indices [B, L] i32)."""
    B, L, _ = coords.shape
    E = params['w_emb'].shape[1]
    H = params['gl_wq'].shape[0]
    assert E == H, "torch gather with hidden_size requires embedding_size == hidden_size"
    assert H % 128 == 0, "choose hidden/embedding size as a multiple of 128 (lane-dense)"

    # Generation-aware batch tiling: 64-wide tiles on v7x (64 MiB VMEM, 2 TCs),
    # 128 otherwise; tiny batches pad to a multiple of 8.  The padded batch is
    # folded into [nbt, ..., TB] so block trailing dims equal the array dims.
    kind = ""
    try:
        kind = jax.devices()[0].device_kind.lower()
    except Exception:
        pass
    is_v7 = "v7" in kind
    big_tb = 64 if is_v7 else 128
    if B <= big_tb:
        TB = max(8, -(-B // 8) * 8)
    else:
        TB = big_tb
    B_pad = -(-B // TB) * TB
    nbt = B_pad // TB
    CH = min(L, 16)                                          # encoder chunk length

    coords = coords.astype(jnp.float32)
    if B_pad != B:
        coords = jnp.concatenate(
            [coords, jnp.zeros((B_pad - B, L, 2), jnp.float32)], axis=0)

    def plane(k):                                            # [nbt, L, TB] lane-dense
        return coords[:, :, k].reshape(nbt, TB, L).transpose(0, 2, 1)

    cx, cy = plane(0), plane(1)

    # Gumbel noise for Categorical sampling, host-side so the kernel also runs
    # under the Pallas interpreter (pltpu.prng_* has no CPU lowering).
    # TODO(synk): on TPU hardware generate per-step noise in-kernel instead.
    gumbel = jax.random.gumbel(jax.random.PRNGKey(seed), (nbt, L, L, TB), jnp.float32)

    bf16, f32 = jnp.bfloat16, jnp.float32
    dec_w = jnp.concatenate([params['dec_wih'], params['dec_whh']], axis=0).astype(bf16)
    wk = jnp.concatenate([params['gl_wk'], params['pt_wk']], axis=1).astype(bf16)
    bk = jnp.concatenate([params['gl_bk'], params['pt_bk']], axis=1).astype(f32)
    weights = (
        params['w_emb'].astype(f32),
        params['start'].astype(f32),
        params['enc_wih'].astype(bf16), params['enc_whh'].astype(bf16),
        params['enc_b'].astype(f32),
        dec_w, params['dec_b'].astype(f32),
        params['gl_wq'].astype(bf16), params['gl_bq'].astype(f32),
        params['pt_wq'].astype(bf16), params['pt_bq'].astype(f32),
        wk, bk,
        params['gl_v'].astype(bf16), params['pt_v'].astype(bf16),
    )

    kernel = functools.partial(
        rnntsp_kernel, TB=TB, L=L, E=E, H=H, CH=CH, n_glimpses=n_glimpses,
        C_glimpse=float(C_glimpse), C_pointer=float(C_pointer))

    def full_spec(a):
        nd = a.ndim
        return pl.BlockSpec(a.shape, lambda i, nd=nd: (0,) * nd)

    in_specs = ([pl.BlockSpec((None, L, TB), lambda i: (i, 0, 0)),       # coords x
                 pl.BlockSpec((None, L, TB), lambda i: (i, 0, 0)),       # coords y
                 pl.BlockSpec((None, L, L, TB), lambda i: (i, 0, 0, 0))]  # gumbel
                + [full_spec(w) for w in weights])
    out_specs = (pl.BlockSpec((None, L, TB), lambda i: (i, 0, 0)),
                 pl.BlockSpec((None, L, TB), lambda i: (i, 0, 0)))

    scratch_shapes = [
        pltpu.VMEM((L, TB, E), jnp.float32),       # embedded coords
        pltpu.VMEM((L, TB, H), jnp.bfloat16),      # glimpse keys
        pltpu.VMEM((L, TB, H), jnp.bfloat16),      # pointer keys
        pltpu.VMEM((CH, TB, 4 * H), jnp.float32),  # chunk input-gate preactivations
        pltpu.VMEM((CH, TB, H), jnp.bfloat16),     # chunk encoder outputs
    ]

    # Advisory cost estimate so XLA schedules neighbours around this serial call.
    flops = 2 * B_pad * L * (E * 4 * H + H * 4 * H          # encoder matmuls
                             + (E + H) * 4 * H              # fused decoder matmul
                             + H * 2 * H                    # merged key projection
                             + (n_glimpses + 1) * H * H)    # per-step q projections
    transcendentals = B_pad * L * ((n_glimpses + 1) * L * (H + 2) + 8 * H)
    bytes_accessed = (sum(int(w.size) * w.dtype.itemsize for w in weights)
                      + int(cx.size + cy.size + gumbel.size) * 4
                      + 2 * L * B_pad * 4)

    logp_t, idx_t = pl.pallas_call(
        kernel,
        out_shape=(jax.ShapeDtypeStruct((nbt, L, TB), jnp.float32),
                   jax.ShapeDtypeStruct((nbt, L, TB), jnp.int32)),
        grid=(nbt,),
        in_specs=in_specs,
        out_specs=out_specs,
        scratch_shapes=scratch_shapes,
        compiler_params=pltpu.CompilerParams(
            dimension_semantics=("parallel",),
            vmem_limit_bytes=(38 if is_v7 else 48) * 1024 * 1024),
        cost_estimate=pl.CostEstimate(
            flops=int(flops),
            transcendentals=int(transcendentals),
            bytes_accessed=int(bytes_accessed)),
    )(cx, cy, gumbel, *weights)

    logp = logp_t.transpose(0, 2, 1).reshape(B_pad, L)[:B]
    idx = idx_t.transpose(0, 2, 1).reshape(B_pad, L)[:B]
    return logp, idx


if __name__ == "__main__":
    # Small but lane-dense shapes: hidden = embedding = 128 (the standard
    # pointer-network width), batch = 2 (padded to 8 inside the wrapper).
    B, L, E, H = 2, 8, 128, 128
    n_glimpses = 1
    tanh_exploration = 10.0

    key = jax.random.PRNGKey(0)
    kp, kc = jax.random.split(key, 2)

    params = init_params(kp, E, H)
    coords = jax.random.uniform(kc, (B, L, 2), jnp.float32)   # TSP city coordinates

    logp, idx = rnntsp_forward(coords, params,
                               n_glimpses=n_glimpses,
                               C_glimpse=10.0, C_pointer=tanh_exploration,
                               seed=0)
    jax.block_until_ready((logp, idx))

    # light sanity checks: valid tour (permutation) and finite log-probs
    import numpy as np
    idx_np = np.asarray(idx)
    logp_np = np.asarray(logp)
    assert logp_np.shape == (B, L) and idx_np.shape == (B, L)
    assert np.all(np.isfinite(logp_np)) and np.all(logp_np <= 1e-3)
    for b in range(B):
        assert sorted(idx_np[b].tolist()) == list(range(L)), idx_np[b]

    print("KERNEL_OK")
</pallas_src>

<mosaic_0001>
module attributes {stable_mosaic.version = 11 : i64} {
  func.func @rnntsp_kernel(%arg0: i32, %arg1: memref<1x8x8xf32, #tpu.memory_space<vmem>>, %arg2: memref<1x8x8xf32, #tpu.memory_space<vmem>>, %arg3: memref<1x8x8x8xf32, #tpu.memory_space<vmem>>, %arg4: memref<2x128xf32, #tpu.memory_space<vmem>>, %arg5: memref<1x128xf32, #tpu.memory_space<vmem>>, %arg6: memref<128x512xbf16, #tpu.memory_space<vmem>>, %arg7: memref<128x512xbf16, #tpu.memory_space<vmem>>, %arg8: memref<1x512xf32, #tpu.memory_space<vmem>>, %arg9: memref<256x512xbf16, #tpu.memory_space<vmem>>, %arg10: memref<1x512xf32, #tpu.memory_space<vmem>>, %arg11: memref<128x128xbf16, #tpu.memory_space<vmem>>, %arg12: memref<1x128xf32, #tpu.memory_space<vmem>>, %arg13: memref<128x128xbf16, #tpu.memory_space<vmem>>, %arg14: memref<1x128xf32, #tpu.memory_space<vmem>>, %arg15: memref<128x256xbf16, #tpu.memory_space<vmem>>, %arg16: memref<1x256xf32, #tpu.memory_space<vmem>>, %arg17: memref<1x128xbf16, #tpu.memory_space<vmem>>, %arg18: memref<1x128xbf16, #tpu.memory_space<vmem>>, %arg19: memref<1x8x8xf32, #tpu.memory_space<vmem>>, %arg20: memref<1x8x8xi32, #tpu.memory_space<vmem>>, %arg21: memref<8x8x128xf32, #tpu.memory_space<vmem>>, %arg22: memref<8x8x128xbf16, #tpu.memory_space<vmem>>, %arg23: memref<8x8x128xbf16, #tpu.memory_space<vmem>>, %arg24: memref<8x8x512xf32, #tpu.memory_space<vmem>>, %arg25: memref<8x8x128xbf16, #tpu.memory_space<vmem>>) attributes {dimension_semantics = [#tpu.dimension_semantics<parallel>], iteration_bounds = array<i64: 1>, scalar_prefetch = 0 : i64, scratch_operands = 5 : i64, tpu.core_type = #tpu.core_type<tc>, window_params = [{transform_indices = @transform_0, window_bounds = array<i64: 1, 8, 8>}, {transform_indices = @transform_1, window_bounds = array<i64: 1, 8, 8>}, {transform_indices = @transform_2, window_bounds = array<i64: 1, 8, 8, 8>}, {pipeline_mode = #tpu.pipeline_mode<synchronous>, transform_indices = @transform_3, window_bounds = array<i64: 2, 128>}, {pipeline_mode = #tpu.pipeline_mode<synchronous>, transform_indices = @transform_4, window_bounds = array<i64: 1, 128>}, {pipeline_mode = #tpu.pipeline_mode<synchronous>, transform_indices = @transform_5, window_bounds = array<i64: 128, 512>}, {pipeline_mode = #tpu.pipeline_mode<synchronous>, transform_indices = @transform_6, window_bounds = array<i64: 128, 512>}, {pipeline_mode = #tpu.pipeline_mode<synchronous>, transform_indices = @transform_7, window_bounds = array<i64: 1, 512>}, {pipeline_mode = #tpu.pipeline_mode<synchronous>, transform_indices = @transform_8, window_bounds = array<i64: 256, 512>}, {pipeline_mode = #tpu.pipeline_mode<synchronous>, transform_indices = @transform_9, window_bounds = array<i64: 1, 512>}, {pipeline_mode = #tpu.pipeline_mode<synchronous>, transform_indices = @transform_10, window_bounds = array<i64: 128, 128>}, {pipeline_mode = #tpu.pipeline_mode<synchronous>, transform_indices = @transform_11, window_bounds = array<i64: 1, 128>}, {pipeline_mode = #tpu.pipeline_mode<synchronous>, transform_indices = @transform_12, window_bounds = array<i64: 128, 128>}, {pipeline_mode = #tpu.pipeline_mode<synchronous>, transform_indices = @transform_13, window_bounds = array<i64: 1, 128>}, {pipeline_mode = #tpu.pipeline_mode<synchronous>, transform_indices = @transform_14, window_bounds = array<i64: 128, 256>}, {pipeline_mode = #tpu.pipeline_mode<synchronous>, transform_indices = @transform_15, window_bounds = array<i64: 1, 256>}, {pipeline_mode = #tpu.pipeline_mode<synchronous>, transform_indices = @transform_16, window_bounds = array<i64: 1, 128>}, {pipeline_mode = #tpu.pipeline_mode<synchronous>, transform_indices = @transform_17, window_bounds = array<i64: 1, 128>}, {transform_indices = @transform_18, window_bounds = array<i64: 1, 8, 8>}, {transform_indices = @transform_19, window_bounds = array<i64: 1, 8, 8>}]} {
    %c0 = arith.constant 0 : index
    %c0_0 = arith.constant 0 : index
    %0 = vector.load %arg4[%c0, %c0_0] : memref<2x128xf32, #tpu.memory_space<vmem>>, vector<2x128xf32>
    %c0_1 = arith.constant 0 : index
    %c0_2 = arith.constant 0 : index
    %c0_3 = arith.constant 0 : index
    %1 = vector.load %arg1[%c0_1, %c0_2, %c0_3] : memref<1x8x8xf32, #tpu.memory_space<vmem>>, vector<1x8x8xf32>
    %2 = vector.shape_cast %1 : vector<1x8x8xf32> to vector<8x8xf32>
    %c0_4 = arith.constant 0 : index
    %c0_5 = arith.constant 0 : index
    %c0_6 = arith.constant 0 : index
    %3 = vector.load %arg2[%c0_4, %c0_5, %c0_6] : memref<1x8x8xf32, #tpu.memory_space<vmem>>, vector<1x8x8xf32>
    %4 = vector.shape_cast %3 : vector<1x8x8xf32> to vector<8x8xf32>
    %5 = vector.shape_cast %2 : vector<8x8xf32> to vector<8x8x1xf32>
    %6 = vector.extract_strided_slice %0 {offsets = [0, 0], sizes = [1, 128], strides = [1, 1]} : vector<2x128xf32> to vector<1x128xf32>
    %7 = vector.shape_cast %6 : vector<1x128xf32> to vector<128xf32>
    %8 = vector.shape_cast %7 : vector<128xf32> to vector<1x1x128xf32>
    %9 = vector.broadcast %5 : vector<8x8x1xf32> to vector<8x8x128xf32>
    %10 = vector.broadcast %8 : vector<1x1x128xf32> to vector<8x8x128xf32>
    %11 = arith.mulf %9, %10 : vector<8x8x128xf32>
    %12 = vector.shape_cast %4 : vector<8x8xf32> to vector<8x8x1xf32>
    %13 = vector.extract_strided_slice %0 {offsets = [1, 0], sizes = [1, 128], strides = [1, 1]} : vector<2x128xf32> to vector<1x128xf32>
    %14 = vector.shape_cast %13 : vector<1x128xf32> to vector<128xf32>
    %15 = vector.shape_cast %14 : vector<128xf32> to vector<1x1x128xf32>
    %16 = vector.broadcast %12 : vector<8x8x1xf32> to vector<8x8x128xf32>
    %17 = vector.broadcast %15 : vector<1x1x128xf32> to vector<8x8x128xf32>
    %18 = arith.mulf %16, %17 : vector<8x8x128xf32>
    %19 = arith.addf %11, %18 : vector<8x8x128xf32>
    %c0_7 = arith.constant 0 : index
    %c0_8 = arith.constant 0 : index
    %c0_9 = arith.constant 0 : index
    %20 = vector.load %arg21[%c0_7, %c0_8, %c0_9] : memref<8x8x128xf32, #tpu.memory_space<vmem>>, vector<8x8x128xf32>
    tpu.vector_store %arg21[%c0_7, %c0_8, %c0_9], %19 {strides = array<i32>} : memref<8x8x128xf32, #tpu.memory_space<vmem>>, vector<8x8x128xf32>,
    %c0_10 = arith.constant 0 : index
    %c0_11 = arith.constant 0 : index
    %21 = vector.load %arg6[%c0_10, %c0_11] : memref<128x512xbf16, #tpu.memory_space<vmem>>, vector<128x512xbf16>
    %c0_12 = arith.constant 0 : index
    %c0_13 = arith.constant 0 : index
    %22 = vector.load %arg7[%c0_12, %c0_13] : memref<128x512xbf16, #tpu.memory_space<vmem>>, vector<128x512xbf16>
    %c0_14 = arith.constant 0 : index
    %c0_15 = arith.constant 0 : index
    %23 = vector.load %arg8[%c0_14, %c0_15] : memref<1x512xf32, #tpu.memory_space<vmem>>, vector<1x512xf32>
    %c0_16 = arith.constant 0 : index
    %c0_17 = arith.constant 0 : index
    %24 = vector.load %arg15[%c0_16, %c0_17] : memref<128x256xbf16, #tpu.memory_space<vmem>>, vector<128x256xbf16>
    %c0_18 = arith.constant 0 : index
    %c0_19 = arith.constant 0 : index
    %25 = vector.load %arg16[%c0_18, %c0_19] : memref<1x256xf32, #tpu.memory_space<vmem>>, vector<1x256xf32>
    %cst = arith.constant 0.000000e+00 : f32
    %26 = vector.broadcast %cst : f32 to vector<8x128xf32>
    %cst_20 = arith.constant 0.000000e+00 : f32
    %27 = vector.broadcast %cst_20 : f32 to vector<8x128xf32>
    %c0_21 = arith.constant 0 : index
    %c0_22 = arith.constant 0 : index
    %c0_23 = arith.constant 0 : index
    %28 = vector.load %arg21[%c0_21, %c0_22, %c0_23] : memref<8x8x128xf32, #tpu.memory_space<vmem>>, vector<8x8x128xf32>
    %29 = vector.shape_cast %28 : vector<8x8x128xf32> to vector<64x128xf32>
    %30 = arith.truncf %29 : vector<64x128xf32> to vector<64x128xbf16>
    %cst_24 = arith.constant dense<0.000000e+00> : vector<64x512xf32>
    %31 = tpu.matmul %30, %21, %cst_24 {dimension_numbers = #tpu.dot_dimension_numbers<[1], [0], [0], [1], [0, 0, 1, 1], [], []>} : vector<64x128xbf16>, vector<128x512xbf16>, vector<64x512xf32> -> vector<64x512xf32>
    %32 = vector.broadcast %23 : vector<1x512xf32> to vector<64x512xf32>
    %33 = arith.addf %31, %32 : vector<64x512xf32>
    %34 = vector.shape_cast %33 : vector<64x512xf32> to vector<8x8x512xf32>
    %c0_25 = arith.constant 0 : index
    %c0_26 = arith.constant 0 : index
    %c0_27 = arith.constant 0 : index
    %35 = vector.load %arg24[%c0_25, %c0_26, %c0_27] : memref<8x8x512xf32, #tpu.memory_space<vmem>>, vector<8x8x512xf32>
    tpu.vector_store %arg24[%c0_25, %c0_26, %c0_27], %34 {strides = array<i32>} : memref<8x8x512xf32, #tpu.memory_space<vmem>>, vector<8x8x512xf32>,
    %c0_i32 = arith.constant 0 : i32
    %36 = arith.index_cast %c0_i32 : i32 to index
    %c0_28 = arith.constant 0 : index
    %c0_29 = arith.constant 0 : index
    %37 = vector.load %arg24[%36, %c0_28, %c0_29] : memref<8x8x512xf32, #tpu.memory_space<vmem>>, vector<1x8x512xf32>
    %38 = vector.shape_cast %37 : vector<1x8x512xf32> to vector<8x512xf32>
    %39 = arith.truncf %26 : vector<8x128xf32> to vector<8x128xbf16>
    %cst_30 = arith.constant dense<0.000000e+00> : vector<8x512xf32>
    %40 = tpu.matmul %39, %22, %cst_30 {dimension_numbers = #tpu.dot_dimension_numbers<[1], [0], [0], [1], [0, 0, 1, 1], [], []>} : vector<8x128xbf16>, vector<128x512xbf16>, vector<8x512xf32> -> vector<8x512xf32>
    %41 = arith.addf %38, %40 : vector<8x512xf32>
    %42 = vector.extract_strided_slice %41 {offsets = [0, 0], sizes = [8, 128], strides = [1, 1]} : vector<8x512xf32> to vector<8x128xf32>
    %43 = arith.negf %42 : vector<8x128xf32>
    %44 = math.exp %43 : vector<8x128xf32>
    %cst_31 = arith.constant 1.000000e+00 : f32
    %45 = vector.broadcast %cst_31 : f32 to vector<8x128xf32>
    %46 = arith.addf %45, %44 : vector<8x128xf32>
    %47 = arith.divf %45, %46 : vector<8x128xf32>
    %48 = vector.extract_strided_slice %41 {offsets = [0, 128], sizes = [8, 128], strides = [1, 1]} : vector<8x512xf32> to vector<8x128xf32>
    %49 = arith.negf %48 : vector<8x128xf32>
    %50 = math.exp %49 : vector<8x128xf32>
    %cst_32 = arith.constant 1.000000e+00 : f32
    %51 = vector.broadcast %cst_32 : f32 to vector<8x128xf32>
    %52 = arith.addf %51, %50 : vector<8x128xf32>
    %53 = arith.divf %51, %52 : vector<8x128xf32>
    %54 = vector.extract_strided_slice %41 {offsets = [0, 256], sizes = [8, 128], strides = [1, 1]} : vector<8x512xf32> to vector<8x128xf32>
    %55 = math.tanh %54 : vector<8x128xf32>
    %56 = vector.extract_strided_slice %41 {offsets = [0, 384], sizes = [8, 128], strides = [1, 1]} : vector<8x512xf32> to vector<8x128xf32>
    %57 = arith.negf %56 : vector<8x128xf32>
    %58 = math.exp %57 : vector<8x128xf32>
    %cst_33 = arith.constant 1.000000e+00 : f32
    %59 = vector.broadcast %cst_33 : f32 to vector<8x128xf32>
    %60 = arith.addf %59, %58 : vector<8x128xf32>
    %61 = arith.divf %59, %60 : vector<8x128xf32>
    %62 = arith.mulf %53, %27 : vector<8x128xf32>
    %63 = arith.mulf %47, %55 : vector<8x128xf32>
    %64 = arith.addf %62, %63 : vector<8x128xf32>
    %65 = math.tanh %64 : vector<8x128xf32>
    %66 = arith.mulf %61, %65 : vector<8x128xf32>
    %67 = arith.truncf %66 : vector<8x128xf32> to vector<8x128xbf16>
    %68 = arith.index_cast %c0_i32 : i32 to index
    %c0_34 = arith.constant 0 : index
    %c0_35 = arith.constant 0 : index
    %69 = vector.load %arg25[%68, %c0_34, %c0_35] : memref<8x8x128xbf16, #tpu.memory_space<vmem>>, vector<1x8x128xbf16>
    %70 = vector.shape_cast %69 : vector<1x8x128xbf16> to vector<8x128xbf16>
    %71 = vector.shape_cast %67 : vector<8x128xbf16> to vector<1x8x128xbf16>
    tpu.vector_store %arg25[%68, %c0_34, %c0_35], %71 {strides = array<i32>} : memref<8x8x128xbf16, #tpu.memory_space<vmem>>, vector<1x8x128xbf16>,
    %c1_i32 = arith.constant 1 : i32
    %72 = arith.index_cast %c1_i32 : i32 to index
    %c0_36 = arith.constant 0 : index
    %c0_37 = arith.constant 0 : index
    %73 = vector.load %arg24[%72, %c0_36, %c0_37] : memref<8x8x512xf32, #tpu.memory_space<vmem>>, vector<1x8x512xf32>
    %74 = vector.shape_cast %73 : vector<1x8x512xf32> to vector<8x512xf32>
    %75 = arith.truncf %66 : vector<8x128xf32> to vector<8x128xbf16>
    %cst_38 = arith.constant dense<0.000000e+00> : vector<8x512xf32>
    %76 = tpu.matmul %75, %22, %cst_38 {dimension_numbers = #tpu.dot_dimension_numbers<[1], [0], [0], [1], [0, 0, 1, 1], [], []>} : vector<8x128xbf16>, vector<128x512xbf16>, vector<8x512xf32> -> vector<8x512xf32>
    %77 = arith.addf %74, %76 : vector<8x512xf32>
    %78 = vector.extract_strided_slice %77 {offsets = [0, 0], sizes = [8, 128], strides = [1, 1]} : vector<8x512xf32> to vector<8x128xf32>
    %79 = arith.negf %78 : vector<8x128xf32>
    %80 = math.exp %79 : vector<8x128xf32>
    %cst_39 = arith.constant 1.000000e+00 : f32
    %81 = vector.broadcast %cst_39 : f32 to vector<8x128xf32>
    %82 = arith.addf %81, %80 : vector<8x128xf32>
    %83 = arith.divf %81, %82 : vector<8x128xf32>
    %84 = vector.extract_strided_slice %77 {offsets = [0, 128], sizes = [8, 128], strides = [1, 1]} : vector<8x512xf32> to vector<8x128xf32>
    %85 = arith.negf %84 : vector<8x128xf32>
    %86 = math.exp %85 : vector<8x128xf32>
    %cst_40 = arith.constant 1.000000e+00 : f32
    %87 = vector.broadcast %cst_40 : f32 to vector<8x128xf32>
    %88 = arith.addf %87, %86 : vector<8x128xf32>
    %89 = arith.divf %87, %88 : vector<8x128xf32>
    %90 = vector.extract_strided_slice %77 {offsets = [0, 256], sizes = [8, 128], strides = [1, 1]} : vector<8x512xf32> to vector<8x128xf32>
    %91 = math.tanh %90 : vector<8x128xf32>
    %92 = vector.extract_strided_slice %77 {offsets = [0, 384], sizes = [8, 128], strides = [1, 1]} : vector<8x512xf32> to vector<8x128xf32>
    %93 = arith.negf %92 : vector<8x128xf32>
    %94 = math.exp %93 : vector<8x128xf32>
    %cst_41 = arith.constant 1.000000e+00 : f32
    %95 = vector.broadcast %cst_41 : f32 to vector<8x128xf32>
    %96 = arith.addf %95, %94 : vector<8x128xf32>
    %97 = arith.divf %95, %96 : vector<8x128xf32>
    %98 = arith.mulf %89, %64 : vector<8x128xf32>
    %99 = arith.mulf %83, %91 : vector<8x128xf32>
    %100 = arith.addf %98, %99 : vector<8x128xf32>
    %101 = math.tanh %100 : vector<8x128xf32>
    %102 = arith.mulf %97, %101 : vector<8x128xf32>
    %103 = arith.truncf %102 : vector<8x128xf32> to vector<8x128xbf16>
    %104 = arith.index_cast %c1_i32 : i32 to index
    %c0_42 = arith.constant 0 : index
    %c0_43 = arith.constant 0 : index
    %105 = vector.load %arg25[%104, %c0_42, %c0_43] : memref<8x8x128xbf16, #tpu.memory_space<vmem>>, vector<1x8x128xbf16>
    %106 = vector.shape_cast %105 : vector<1x8x128xbf16> to vector<8x128xbf16>
    %107 = vector.shape_cast %103 : vector<8x128xbf16> to vector<1x8x128xbf16>
    tpu.vector_store %arg25[%104, %c0_42, %c0_43], %107 {strides = array<i32>} : memref<8x8x128xbf16, #tpu.memory_space<vmem>>, vector<1x8x128xbf16>,
    %c2_i32 = arith.constant 2 : i32
    %108 = arith.index_cast %c2_i32 : i32 to index
    %c0_44 = arith.constant 0 : index
    %c0_45 = arith.constant 0 : index
    %109 = vector.load %arg24[%108, %c0_44, %c0_45] : memref<8x8x512xf32, #tpu.memory_space<vmem>>, vector<1x8x512xf32>
    %110 = vector.shape_cast %109 : vector<1x8x512xf32> to vector<8x512xf32>
    %111 = arith.truncf %102 : vector<8x128xf32> to vector<8x128xbf16>
    %cst_46 = arith.constant dense<0.000000e+00> : vector<8x512xf32>
    %112 = tpu.matmul %111, %22, %cst_46 {dimension_numbers = #tpu.dot_dimension_numbers<[1], [0], [0], [1], [0, 0, 1, 1], [], []>} : vector<8x128xbf16>, vector<128x512xbf16>, vector<8x512xf32> -> vector<8x512xf32>
    %113 = arith.addf %110, %112 : vector<8x512xf32>
    %114 = vector.extract_strided_slice %113 {offsets = [0, 0], sizes = [8, 128], strides = [1, 1]} : vector<8x512xf32> to vector<8x128xf32>
    %115 = arith.negf %114 : vector<8x128xf32>
    %116 = math.exp %115 : vector<8x128xf32>
    %cst_47 = arith.constant 1.000000e+00 : f32
    %117 = vector.broadcast %cst_47 : f32 to vector<8x128xf32>
    %118 = arith.addf %117, %116 : vector<8x128xf32>
    %119 = arith.divf %117, %118 : vector<8x128xf32>
    %120 = vector.extract_strided_slice %113 {offsets = [0, 128], sizes = [8, 128], strides = [1, 1]} : vector<8x512xf32> to vector<8x128xf32>
    %121 = arith.negf %120 : vector<8x128xf32>
    %122 = math.exp %121 : vector<8x128xf32>
    %cst_48 = arith.constant 1.000000e+00 : f32
    %123 = vector.broadcast %cst_48 : f32 to vector<8x128xf32>
    %124 = arith.addf %123, %122 : vector<8x128xf32>
    %125 = arith.divf %123, %124 : vector<8x128xf32>
    %126 = vector.extract_strided_slice %113 {offsets = [0, 256], sizes = [8, 128], strides = [1, 1]} : vector<8x512xf32> to vector<8x128xf32>
    %127 = math.tanh %126 : vector<8x128xf32>
    %128 = vector.extract_strided_slice %113 {offsets = [0, 384], sizes = [8, 128], strides = [1, 1]} : vector<8x512xf32> to vector<8x128xf32>
    %129 = arith.negf %128 : vector<8x128xf32>
    %130 = math.exp %129 : vector<8x128xf32>
    %cst_49 = arith.constant 1.000000e+00 : f32
    %131 = vector.broadcast %cst_49 : f32 to vector<8x128xf32>
    %132 = arith.addf %131, %130 : vector<8x128xf32>
    %133 = arith.divf %131, %132 : vector<8x128xf32>
    %134 = arith.mulf %125, %100 : vector<8x128xf32>
    %135 = arith.mulf %119, %127 : vector<8x128xf32>
    %136 = arith.addf %134, %135 : vector<8x128xf32>
    %137 = math.tanh %136 : vector<8x128xf32>
    %138 = arith.mulf %133, %137 : vector<8x128xf32>
    %139 = arith.truncf %138 : vector<8x128xf32> to vector<8x128xbf16>
    %140 = arith.index_cast %c2_i32 : i32 to index
    %c0_50 = arith.constant 0 : index
    %c0_51 = arith.constant 0 : index
    %141 = vector.load %arg25[%140, %c0_50, %c0_51] : memref<8x8x128xbf16, #tpu.memory_space<vmem>>, vector<1x8x128xbf16>
    %142 = vector.shape_cast %141 : vector<1x8x128xbf16> to vector<8x128xbf16>
    %143 = vector.shape_cast %139 : vector<8x128xbf16> to vector<1x8x128xbf16>
    tpu.vector_store %arg25[%140, %c0_50, %c0_51], %143 {strides = array<i32>} : memref<8x8x128xbf16, #tpu.memory_space<vmem>>, vector<1x8x128xbf16>,
    %c3_i32 = arith.constant 3 : i32
    %144 = arith.index_cast %c3_i32 : i32 to index
    %c0_52 = arith.constant 0 : index
    %c0_53 = arith.constant 0 : index
    %145 = vector.load %arg24[%144, %c0_52, %c0_53] : memref<8x8x512xf32, #tpu.memory_space<vmem>>, vector<1x8x512xf32>
    %146 = vector.shape_cast %145 : vector<1x8x512xf32> to vector<8x512xf32>
    %147 = arith.truncf %138 : vector<8x128xf32> to vector<8x128xbf16>
    %cst_54 = arith.constant dense<0.000000e+00> : vector<8x512xf32>
    %148 = tpu.matmul %147, %22, %cst_54 {dimension_numbers = #tpu.dot_dimension_numbers<[1], [0], [0], [1], [0, 0, 1, 1], [], []>} : vector<8x128xbf16>, vector<128x512xbf16>, vector<8x512xf32> -> vector<8x512xf32>
    %149 = arith.addf %146, %148 : vector<8x512xf32>
    %150 = vector.extract_strided_slice %149 {offsets = [0, 0], sizes = [8, 128], strides = [1, 1]} : vector<8x512xf32> to vector<8x128xf32>
    %151 = arith.negf %150 : vector<8x128xf32>
    %152 = math.exp %151 : vector<8x128xf32>
    %cst_55 = arith.constant 1.000000e+00 : f32
    %153 = vector.broadcast %cst_55 : f32 to vector<8x128xf32>
    %154 = arith.addf %153, %152 : vector<8x128xf32>
    %155 = arith.divf %153, %154 : vector<8x128xf32>
    %156 = vector.extract_strided_slice %149 {offsets = [0, 128], sizes = [8, 128], strides = [1, 1]} : vector<8x512xf32> to vector<8x128xf32>
    %157 = arith.negf %156 : vector<8x128xf32>
    %158 = math.exp %157 : vector<8x128xf32>
    %cst_56 = arith.constant 1.000000e+00 : f32
    %159 = vector.broadcast %cst_56 : f32 to vector<8x128xf32>
    %160 = arith.addf %159, %158 : vector<8x128xf32>
    %161 = arith.divf %159, %160 : vector<8x128xf32>
    %162 = vector.extract_strided_slice %149 {offsets = [0, 256], sizes = [8, 128], strides = [1, 1]} : vector<8x512xf32> to vector<8x128xf32>
    %163 = math.tanh %162 : vector<8x128xf32>
    %164 = vector.extract_strided_slice %149 {offsets = [0, 384], sizes = [8, 128], strides = [1, 1]} : vector<8x512xf32> to vector<8x128xf32>
    %165 = arith.negf %164 : vector<8x128xf32>
    %166 = math.exp %165 : vector<8x128xf32>
    %cst_57 = arith.constant 1.000000e+00 : f32
    %167 = vector.broadcast %cst_57 : f32 to vector<8x128xf32>
    %168 = arith.addf %167, %166 : vector<8x128xf32>
    %169 = arith.divf %167, %168 : vector<8x128xf32>
    %170 = arith.mulf %161, %136 : vector<8x128xf32>
    %171 = arith.mulf %155, %163 : vector<8x128xf32>
    %172 = arith.addf %170, %171 : vector<8x128xf32>
    %173 = math.tanh %172 : vector<8x128xf32>
    %174 = arith.mulf %169, %173 : vector<8x128xf32>
    %175 = arith.truncf %174 : vector<8x128xf32> to vector<8x128xbf16>
    %176 = arith.index_cast %c3_i32 : i32 to index
    %c0_58 = arith.constant 0 : index
    %c0_59 = arith.constant 0 : index
    %177 = vector.load %arg25[%176, %c0_58, %c0_59] : memref<8x8x128xbf16, #tpu.memory_space<vmem>>, vector<1x8x128xbf16>
    %178 = vector.shape_cast %177 : vector<1x8x128xbf16> to vector<8x128xbf16>
    %179 = vector.shape_cast %175 : vector<8x128xbf16> to vector<1x8x128xbf16>
    tpu.vector_store %arg25[%176, %c0_58, %c0_59], %179 {strides = array<i32>} : memref<8x8x128xbf16, #tpu.memory_space<vmem>>, vector<1x8x128xbf16>,
    %c4_i32 = arith.constant 4 : i32
    %180 = arith.index_cast %c4_i32 : i32 to index
    %c0_60 = arith.constant 0 : index
    %c0_61 = arith.constant 0 : index
    %181 = vector.load %arg24[%180, %c0_60, %c0_61] : memref<8x8x512xf32, #tpu.memory_space<vmem>>, vector<1x8x512xf32>
    %182 = vector.shape_cast %181 : vector<1x8x512xf32> to vector<8x512xf32>
    %183 = arith.truncf %174 : vector<8x128xf32> to vector<8x128xbf16>
    %cst_62 = arith.constant dense<0.000000e+00> : vector<8x512xf32>
    %184 = tpu.matmul %183, %22, %cst_62 {dimension_numbers = #tpu.dot_dimension_numbers<[1], [0], [0], [1], [0, 0, 1, 1], [], []>} : vector<8x128xbf16>, vector<128x512xbf16>, vector<8x512xf32> -> vector<8x512xf32>
    %185 = arith.addf %182, %184 : vector<8x512xf32>
    %186 = vector.extract_strided_slice %185 {offsets = [0, 0], sizes = [8, 128], strides = [1, 1]} : vector<8x512xf32> to vector<8x128xf32>
    %187 = arith.negf %186 : vector<8x128xf32>
    %188 = math.exp %187 : vector<8x128xf32>
    %cst_63 = arith.constant 1.000000e+00 : f32
    %189 = vector.broadcast %cst_63 : f32 to vector<8x128xf32>
    %190 = arith.addf %189, %188 : vector<8x128xf32>
    %191 = arith.divf %189, %190 : vector<8x128xf32>
    %192 = vector.extract_strided_slice %185 {offsets = [0, 128], sizes = [8, 128], strides = [1, 1]} : vector<8x512xf32> to vector<8x128xf32>
    %193 = arith.negf %192 : vector<8x128xf32>
    %194 = math.exp %193 : vector<8x128xf32>
    %cst_64 = arith.constant 1.000000e+00 : f32
    %195 = vector.broadcast %cst_64 : f32 to vector<8x128xf32>
    %196 = arith.addf %195, %194 : vector<8x128xf32>
    %197 = arith.divf %195, %196 : vector<8x128xf32>
    %198 = vector.extract_strided_slice %185 {offsets = [0, 256], sizes = [8, 128], strides = [1, 1]} : vector<8x512xf32> to vector<8x128xf32>
    %199 = math.tanh %198 : vector<8x128xf32>
    %200 = vector.extract_strided_slice %185 {offsets = [0, 384], sizes = [8, 128], strides = [1, 1]} : vector<8x512xf32> to vector<8x128xf32>
    %201 = arith.negf %200 : vector<8x128xf32>
    %202 = math.exp %201 : vector<8x128xf32>
    %cst_65 = arith.constant 1.000000e+00 : f32
    %203 = vector.broadcast %cst_65 : f32 to vector<8x128xf32>
    %204 = arith.addf %203, %202 : vector<8x128xf32>
    %205 = arith.divf %203, %204 : vector<8x128xf32>
    %206 = arith.mulf %197, %172 : vector<8x128xf32>
    %207 = arith.mulf %191, %199 : vector<8x128xf32>
    %208 = arith.addf %206, %207 : vector<8x128xf32>
    %209 = math.tanh %208 : vector<8x128xf32>
    %210 = arith.mulf %205, %209 : vector<8x128xf32>
    %211 = arith.truncf %210 : vector<8x128xf32> to vector<8x128xbf16>
    %212 = arith.index_cast %c4_i32 : i32 to index
    %c0_66 = arith.constant 0 : index
    %c0_67 = arith.constant 0 : index
    %213 = vector.load %arg25[%212, %c0_66, %c0_67] : memref<8x8x128xbf16, #tpu.memory_space<vmem>>, vector<1x8x128xbf16>
    %214 = vector.shape_cast %213 : vector<1x8x128xbf16> to vector<8x128xbf16>
    %215 = vector.shape_cast %211 : vector<8x128xbf16> to vector<1x8x128xbf16>
    tpu.vector_store %arg25[%212, %c0_66, %c0_67], %215 {strides = array<i32>} : memref<8x8x128xbf16, #tpu.memory_space<vmem>>, vector<1x8x128xbf16>,
    %c5_i32 = arith.constant 5 : i32
    %216 = arith.index_cast %c5_i32 : i32 to index
    %c0_68 = arith.constant 0 : index
    %c0_69 = arith.constant 0 : index
    %217 = vector.load %arg24[%216, %c0_68, %c0_69] : memref<8x8x512xf32, #tpu.memory_space<vmem>>, vector<1x8x512xf32>
    %218 = vector.shape_cast %217 : vector<1x8x512xf32> to vector<8x512xf32>
    %219 = arith.truncf %210 : vector<8x128xf32> to vector<8x128xbf16>
    %cst_70 = arith.constant dense<0.000000e+00> : vector<8x512xf32>
    %220 = tpu.matmul %219, %22, %cst_70 {dimension_numbers = #tpu.dot_dimension_numbers<[1], [0], [0], [1], [0, 0, 1, 1], [], []>} : vector<8x128xbf16>, vector<128x512xbf16>, vector<8x512xf32> -> vector<8x512xf32>
    %221 = arith.addf %218, %220 : vector<8x512xf32>
    %222 = vector.extract_strided_slice %221 {offsets = [0, 0], sizes = [8, 128], strides = [1, 1]} : vector<8x512xf32> to vector<8x128xf32>
    %223 = arith.negf %222 : vector<8x128xf32>
    %224 = math.exp %223 : vector<8x128xf32>
    %cst_71 = arith.constant 1.000000e+00 : f32
    %225 = vector.broadcast %cst_71 : f32 to vector<8x128xf32>
    %226 = arith.addf %225, %224 : vector<8x128xf32>
    %227 = arith.divf %225, %226 : vector<8x128xf32>
    %228 = vector.extract_strided_slice %221 {offsets = [0, 128], sizes = [8, 128], strides = [1, 1]} : vector<8x512xf32> to vector<8x128xf32>
    %229 = arith.negf %228 : vector<8x128xf32>
    %230 = math.exp %229 : vector<8x128xf32>
    %cst_72 = arith.constant 1.000000e+00 : f32
    %231 = vector.broadcast %cst_72 : f32 to vector<8x128xf32>
    %232 = arith.addf %231, %230 : vector<8x128xf32>
    %233 = arith.divf %231, %232 : vector<8x128xf32>
    %234 = vector.extract_strided_slice %221 {offsets = [0, 256], sizes = [8, 128], strides = [1, 1]} : vector<8x512xf32> to vector<8x128xf32>
    %235 = math.tanh %234 : vector<8x128xf32>
    %236 = vector.extract_strided_slice %221 {offsets = [0, 384], sizes = [8, 128], strides = [1, 1]} : vector<8x512xf32> to vector<8x128xf32>
    %237 = arith.negf %236 : vector<8x128xf32>
    %238 = math.exp %237 : vector<8x128xf32>
    %cst_73 = arith.constant 1.000000e+00 : f32
    %239 = vector.broadcast %cst_73 : f32 to vector<8x128xf32>
    %240 = arith.addf %239, %238 : vector<8x128xf32>
    %241 = arith.divf %239, %240 : vector<8x128xf32>
    %242 = arith.mulf %233, %208 : vector<8x128xf32>
    %243 = arith.mulf %227, %235 : vector<8x128xf32>
    %244 = arith.addf %242, %243 : vector<8x128xf32>
    %245 = math.tanh %244 : vector<8x128xf32>
    %246 = arith.mulf %241, %245 : vector<8x128xf32>
    %247 = arith.truncf %246 : vector<8x128xf32> to vector<8x128xbf16>
    %248 = arith.index_cast %c5_i32 : i32 to index
    %c0_74 = arith.constant 0 : index
    %c0_75 = arith.constant 0 : index
    %249 = vector.load %arg25[%248, %c0_74, %c0_75] : memref<8x8x128xbf16, #tpu.memory_space<vmem>>, vector<1x8x128xbf16>
    %250 = vector.shape_cast %249 : vector<1x8x128xbf16> to vector<8x128xbf16>
    %251 = vector.shape_cast %247 : vector<8x128xbf16> to vector<1x8x128xbf16>
    tpu.vector_store %arg25[%248, %c0_74, %c0_75], %251 {strides = array<i32>} : memref<8x8x128xbf16, #tpu.memory_space<vmem>>, vector<1x8x128xbf16>,
    %c6_i32 = arith.constant 6 : i32
    %252 = arith.index_cast %c6_i32 : i32 to index
    %c0_76 = arith.constant 0 : index
    %c0_77 = arith.constant 0 : index
    %253 = vector.load %arg24[%252, %c0_76, %c0_77] : memref<8x8x512xf32, #tpu.memory_space<vmem>>, vector<1x8x512xf32>
    %254 = vector.shape_cast %253 : vector<1x8x512xf32> to vector<8x512xf32>
    %255 = arith.truncf %246 : vector<8x128xf32> to vector<8x128xbf16>
    %cst_78 = arith.constant dense<0.000000e+00> : vector<8x512xf32>
    %256 = tpu.matmul %255, %22, %cst_78 {dimension_numbers = #tpu.dot_dimension_numbers<[1], [0], [0], [1], [0, 0, 1, 1], [], []>} : vector<8x128xbf16>, vector<128x512xbf16>, vector<8x512xf32> -> vector<8x512xf32>
    %257 = arith.addf %254, %256 : vector<8x512xf32>
    %258 = vector.extract_strided_slice %257 {offsets = [0, 0], sizes = [8, 128], strides = [1, 1]} : vector<8x512xf32> to vector<8x128xf32>
    %259 = arith.negf %258 : vector<8x128xf32>
    %260 = math.exp %259 : vector<8x128xf32>
    %cst_79 = arith.constant 1.000000e+00 : f32
    %261 = vector.broadcast %cst_79 : f32 to vector<8x128xf32>
    %262 = arith.addf %261, %260 : vector<8x128xf32>
    %263 = arith.divf %261, %262 : vector<8x128xf32>
    %264 = vector.extract_strided_slice %257 {offsets = [0, 128], sizes = [8, 128], strides = [1, 1]} : vector<8x512xf32> to vector<8x128xf32>
    %265 = arith.negf %264 : vector<8x128xf32>
    %266 = math.exp %265 : vector<8x128xf32>
    %cst_80 = arith.constant 1.000000e+00 : f32
    %267 = vector.broadcast %cst_80 : f32 to vector<8x128xf32>
    %268 = arith.addf %267, %266 : vector<8x128xf32>
    %269 = arith.divf %267, %268 : vector<8x128xf32>
    %270 = vector.extract_strided_slice %257 {offsets = [0, 256], sizes = [8, 128], strides = [1, 1]} : vector<8x512xf32> to vector<8x128xf32>
    %271 = math.tanh %270 : vector<8x128xf32>
    %272 = vector.extract_strided_slice %257 {offsets = [0, 384], sizes = [8, 128], strides = [1, 1]} : vector<8x512xf32> to vector<8x128xf32>
    %273 = arith.negf %272 : vector<8x128xf32>
    %274 = math.exp %273 : vector<8x128xf32>
    %cst_81 = arith.constant 1.000000e+00 : f32
    %275 = vector.broadcast %cst_81 : f32 to vector<8x128xf32>
    %276 = arith.addf %275, %274 : vector<8x128xf32>
    %277 = arith.divf %275, %276 : vector<8x128xf32>
    %278 = arith.mulf %269, %244 : vector<8x128xf32>
    %279 = arith.mulf %263, %271 : vector<8x128xf32>
    %280 = arith.addf %278, %279 : vector<8x128xf32>
    %281 = math.tanh %280 : vector<8x128xf32>
    %282 = arith.mulf %277, %281 : vector<8x128xf32>
    %283 = arith.truncf %282 : vector<8x128xf32> to vector<8x128xbf16>
    %284 = arith.index_cast %c6_i32 : i32 to index
    %c0_82 = arith.constant 0 : index
    %c0_83 = arith.constant 0 : index
    %285 = vector.load %arg25[%284, %c0_82, %c0_83] : memref<8x8x128xbf16, #tpu.memory_space<vmem>>, vector<1x8x128xbf16>
    %286 = vector.shape_cast %285 : vector<1x8x128xbf16> to vector<8x128xbf16>
    %287 = vector.shape_cast %283 : vector<8x128xbf16> to vector<1x8x128xbf16>
    tpu.vector_store %arg25[%284, %c0_82, %c0_83], %287 {strides = array<i32>} : memref<8x8x128xbf16, #tpu.memory_space<vmem>>, vector<1x8x128xbf16>,
    %c7_i32 = arith.constant 7 : i32
    %288 = arith.index_cast %c7_i32 : i32 to index
    %c0_84 = arith.constant 0 : index
    %c0_85 = arith.constant 0 : index
    %289 = vector.load %arg24[%288, %c0_84, %c0_85] : memref<8x8x512xf32, #tpu.memory_space<vmem>>, vector<1x8x512xf32>
    %290 = vector.shape_cast %289 : vector<1x8x512xf32> to vector<8x512xf32>
    %291 = arith.truncf %282 : vector<8x128xf32> to vector<8x128xbf16>
    %cst_86 = arith.constant dense<0.000000e+00> : vector<8x512xf32>
    %292 = tpu.matmul %291, %22, %cst_86 {dimension_numbers = #tpu.dot_dimension_numbers<[1], [0], [0], [1], [0, 0, 1, 1], [], []>} : vector<8x128xbf16>, vector<128x512xbf16>, vector<8x512xf32> -> vector<8x512xf32>
    %293 = arith.addf %290, %292 : vector<8x512xf32>
    %294 = vector.extract_strided_slice %293 {offsets = [0, 0], sizes = [8, 128], strides = [1, 1]} : vector<8x512xf32> to vector<8x128xf32>
    %295 = arith.negf %294 : vector<8x128xf32>
    %296 = math.exp %295 : vector<8x128xf32>
    %cst_87 = arith.constant 1.000000e+00 : f32
    %297 = vector.broadcast %cst_87 : f32 to vector<8x128xf32>
    %298 = arith.addf %297, %296 : vector<8x128xf32>
    %299 = arith.divf %297, %298 : vector<8x128xf32>
    %300 = vector.extract_strided_slice %293 {offsets = [0, 128], sizes = [8, 128], strides = [1, 1]} : vector<8x512xf32> to vector<8x128xf32>
    %301 = arith.negf %300 : vector<8x128xf32>
    %302 = math.exp %301 : vector<8x128xf32>
    %cst_88 = arith.constant 1.000000e+00 : f32
    %303 = vector.broadcast %cst_88 : f32 to vector<8x128xf32>
    %304 = arith.addf %303, %302 : vector<8x128xf32>
    %305 = arith.divf %303, %304 : vector<8x128xf32>
    %306 = vector.extract_strided_slice %293 {offsets = [0, 256], sizes = [8, 128], strides = [1, 1]} : vector<8x512xf32> to vector<8x128xf32>
    %307 = math.tanh %306 : vector<8x128xf32>
    %308 = vector.extract_strided_slice %293 {offsets = [0, 384], sizes = [8, 128], strides = [1, 1]} : vector<8x512xf32> to vector<8x128xf32>
    %309 = arith.negf %308 : vector<8x128xf32>
    %310 = math.exp %309 : vector<8x128xf32>
    %cst_89 = arith.constant 1.000000e+00 : f32
    %311 = vector.broadcast %cst_89 : f32 to vector<8x128xf32>
    %312 = arith.addf %311, %310 : vector<8x128xf32>
    %313 = arith.divf %311, %312 : vector<8x128xf32>
    %314 = arith.mulf %305, %280 : vector<8x128xf32>
    %315 = arith.mulf %299, %307 : vector<8x128xf32>
    %316 = arith.addf %314, %315 : vector<8x128xf32>
    %317 = math.tanh %316 : vector<8x128xf32>
    %318 = arith.mulf %313, %317 : vector<8x128xf32>
    %319 = arith.truncf %318 : vector<8x128xf32> to vector<8x128xbf16>
    %320 = arith.index_cast %c7_i32 : i32 to index
    %c0_90 = arith.constant 0 : index
    %c0_91 = arith.constant 0 : index
    %321 = vector.load %arg25[%320, %c0_90, %c0_91] : memref<8x8x128xbf16, #tpu.memory_space<vmem>>, vector<1x8x128xbf16>
    %322 = vector.shape_cast %321 : vector<1x8x128xbf16> to vector<8x128xbf16>
    %323 = vector.shape_cast %319 : vector<8x128xbf16> to vector<1x8x128xbf16>
    tpu.vector_store %arg25[%320, %c0_90, %c0_91], %323 {strides = array<i32>} : memref<8x8x128xbf16, #tpu.memory_space<vmem>>, vector<1x8x128xbf16>,
    %c8_i32 = arith.constant 8 : i32
    %c0_92 = arith.constant 0 : index
    %c0_93 = arith.constant 0 : index
    %c0_94 = arith.constant 0 : index
    %324 = vector.load %arg25[%c0_92, %c0_93, %c0_94] : memref<8x8x128xbf16, #tpu.memory_space<vmem>>, vector<8x8x128xbf16>
    %325 = vector.shape_cast %324 : vector<8x8x128xbf16> to vector<64x128xbf16>
    %cst_95 = arith.constant dense<0.000000e+00> : vector<64x256xf32>
    %326 = tpu.matmul %325, %24, %cst_95 {dimension_numbers = #tpu.dot_dimension_numbers<[1], [0], [0], [1], [0, 0, 1, 1], [], []>} : vector<64x128xbf16>, vector<128x256xbf16>, vector<64x256xf32> -> vector<64x256xf32>
    %327 = vector.broadcast %25 : vector<1x256xf32> to vector<64x256xf32>
    %328 = arith.addf %326, %327 : vector<64x256xf32>
    %329 = vector.shape_cast %328 : vector<64x256xf32> to vector<8x8x256xf32>
    %330 = vector.extract_strided_slice %329 {offsets = [0, 0, 0], sizes = [8, 8, 128], strides = [1, 1, 1]} : vector<8x8x256xf32> to vector<8x8x128xf32>
    %331 = arith.truncf %330 : vector<8x8x128xf32> to vector<8x8x128xbf16>
    %c0_96 = arith.constant 0 : index
    %c0_97 = arith.constant 0 : index
    %c0_98 = arith.constant 0 : index
    %332 = vector.load %arg22[%c0_96, %c0_97, %c0_98] : memref<8x8x128xbf16, #tpu.memory_space<vmem>>, vector<8x8x128xbf16>
    tpu.vector_store %arg22[%c0_96, %c0_97, %c0_98], %331 {strides = array<i32>} : memref<8x8x128xbf16, #tpu.memory_space<vmem>>, vector<8x8x128xbf16>,
    %333 = vector.extract_strided_slice %329 {offsets = [0, 0, 128], sizes = [8, 8, 128], strides = [1, 1, 1]} : vector<8x8x256xf32> to vector<8x8x128xf32>
    %334 = arith.truncf %333 : vector<8x8x128xf32> to vector<8x8x128xbf16>
    %c0_99 = arith.constant 0 : index
    %c0_100 = arith.constant 0 : index
    %c0_101 = arith.constant 0 : index
    %335 = vector.load %arg23[%c0_99, %c0_100, %c0_101] : memref<8x8x128xbf16, #tpu.memory_space<vmem>>, vector<8x8x128xbf16>
    tpu.vector_store %arg23[%c0_99, %c0_100, %c0_101], %334 {strides = array<i32>} : memref<8x8x128xbf16, #tpu.memory_space<vmem>>, vector<8x8x128xbf16>,
    %c0_102 = arith.constant 0 : index
    %c0_103 = arith.constant 0 : index
    %336 = vector.load %arg9[%c0_102, %c0_103] : memref<256x512xbf16, #tpu.memory_space<vmem>>, vector<256x512xbf16>
    %c0_104 = arith.constant 0 : index
    %c0_105 = arith.constant 0 : index
    %337 = vector.load %arg11[%c0_104, %c0_105] : memref<128x128xbf16, #tpu.memory_space<vmem>>, vector<128x128xbf16>
    %c0_106 = arith.constant 0 : index
    %c0_107 = arith.constant 0 : index
    %338 = vector.load %arg13[%c0_106, %c0_107] : memref<128x128xbf16, #tpu.memory_space<vmem>>, vector<128x128xbf16>
    %c0_108 = arith.constant 0 : index
    %c0_109 = arith.constant 0 : index
    %339 = vector.load %arg17[%c0_108, %c0_109] : memref<1x128xbf16, #tpu.memory_space<vmem>>, vector<1x128xbf16>
    %c0_110 = arith.constant 0 : index
    %c0_111 = arith.constant 0 : index
    %340 = vector.load %arg18[%c0_110, %c0_111] : memref<1x128xbf16, #tpu.memory_space<vmem>>, vector<1x128xbf16>
    %c0_112 = arith.constant 0 : index
    %c0_113 = arith.constant 0 : index
    %341 = vector.load %arg10[%c0_112, %c0_113] : memref<1x512xf32, #tpu.memory_space<vmem>>, vector<1x512xf32>
    %342 = vector.shape_cast %341 : vector<1x512xf32> to vector<1x512xf32>
    %343 = vector.broadcast %342 : vector<1x512xf32> to vector<8x512xf32>
    %c0_114 = arith.constant 0 : index
    %c0_115 = arith.constant 0 : index
    %344 = vector.load %arg12[%c0_114, %c0_115] : memref<1x128xf32, #tpu.memory_space<vmem>>, vector<1x128xf32>
    %345 = vector.shape_cast %344 : vector<1x128xf32> to vector<1x128xf32>
    %346 = vector.broadcast %345 : vector<1x128xf32> to vector<8x128xf32>
    %c0_116 = arith.constant 0 : index
    %c0_117 = arith.constant 0 : index
    %347 = vector.load %arg14[%c0_116, %c0_117] : memref<1x128xf32, #tpu.memory_space<vmem>>, vector<1x128xf32>
    %348 = vector.shape_cast %347 : vector<1x128xf32> to vector<1x128xf32>
    %349 = vector.broadcast %348 : vector<1x128xf32> to vector<8x128xf32>
    %350 = tpu.iota {dimensions = array<i32: 0>} : vector<8x8xi32>
    %c0_118 = arith.constant 0 : index
    %c0_119 = arith.constant 0 : index
    %351 = vector.load %arg5[%c0_118, %c0_119] : memref<1x128xf32, #tpu.memory_space<vmem>>, vector<1x128xf32>
    %352 = vector.shape_cast %351 : vector<1x128xf32> to vector<1x128xf32>
    %353 = vector.broadcast %352 : vector<1x128xf32> to vector<8x128xf32>
    %cst_120 = arith.constant 0.000000e+00 : f32
    %354 = vector.broadcast %cst_120 : f32 to vector<8x8xf32>
    %cst_121 = arith.constant -1.000000e+05 : f32
    %c0_i32_122 = arith.constant 0 : i32
    %c8_i32_123 = arith.constant 8 : i32
    %355 = arith.addi %c0_i32_122, %c8_i32_123 : i32
    %c1_i32_124 = arith.constant 1 : i32
    %356:4 = scf.for %arg26 = %c0_i32_122 to %355 step %c1_i32_124 iter_args(%arg27 = %318, %arg28 = %316, %arg29 = %353, %arg30 = %354) -> (vector<8x128xf32>, vector<8x128xf32>, vector<8x128xf32>, vector<8x8xf32>)  : i32 {
      %357 = tpu.concatenate %arg29, %arg27 in 1 : vector<8x128xf32>, vector<8x128xf32> -> vector<8x256xf32>
      %358 = arith.truncf %357 : vector<8x256xf32> to vector<8x256xbf16>
      %cst_126 = arith.constant dense<0.000000e+00> : vector<8x512xf32>
      %359 = tpu.matmul %358, %336, %cst_126 {dimension_numbers = #tpu.dot_dimension_numbers<[1], [0], [0], [1], [0, 0, 1, 1], [], []>} : vector<8x256xbf16>, vector<256x512xbf16>, vector<8x512xf32> -> vector<8x512xf32>
      %360 = arith.addf %359, %343 : vector<8x512xf32>
      %361 = vector.extract_strided_slice %360 {offsets = [0, 0], sizes = [8, 128], strides = [1, 1]} : vector<8x512xf32> to vector<8x128xf32>
      %362 = arith.negf %361 : vector<8x128xf32>
      %363 = math.exp %362 : vector<8x128xf32>
      %cst_127 = arith.constant 1.000000e+00 : f32
      %364 = vector.broadcast %cst_127 : f32 to vector<8x128xf32>
      %365 = arith.addf %364, %363 : vector<8x128xf32>
      %366 = arith.divf %364, %365 : vector<8x128xf32>
      %367 = vector.extract_strided_slice %360 {offsets = [0, 128], sizes = [8, 128], strides = [1, 1]} : vector<8x512xf32> to vector<8x128xf32>
      %368 = arith.negf %367 : vector<8x128xf32>
      %369 = math.exp %368 : vector<8x128xf32>
      %cst_128 = arith.constant 1.000000e+00 : f32
      %370 = vector.broadcast %cst_128 : f32 to vector<8x128xf32>
      %371 = arith.addf %370, %369 : vector<8x128xf32>
      %372 = arith.divf %370, %371 : vector<8x128xf32>
      %373 = vector.extract_strided_slice %360 {offsets = [0, 256], sizes = [8, 128], strides = [1, 1]} : vector<8x512xf32> to vector<8x128xf32>
      %374 = math.tanh %373 : vector<8x128xf32>
      %375 = vector.extract_strided_slice %360 {offsets = [0, 384], sizes = [8, 128], strides = [1, 1]} : vector<8x512xf32> to vector<8x128xf32>
      %376 = arith.negf %375 : vector<8x128xf32>
      %377 = math.exp %376 : vector<8x128xf32>
      %cst_129 = arith.constant 1.000000e+00 : f32
      %378 = vector.broadcast %cst_129 : f32 to vector<8x128xf32>
      %379 = arith.addf %378, %377 : vector<8x128xf32>
      %380 = arith.divf %378, %379 : vector<8x128xf32>
      %381 = arith.mulf %372, %arg28 : vector<8x128xf32>
      %382 = arith.mulf %366, %374 : vector<8x128xf32>
      %383 = arith.addf %381, %382 : vector<8x128xf32>
      %384 = math.tanh %383 : vector<8x128xf32>
      %385 = arith.mulf %380, %384 : vector<8x128xf32>
      %386 = arith.truncf %385 : vector<8x128xf32> to vector<8x128xbf16>
      %cst_130 = arith.constant dense<0.000000e+00> : vector<8x128xf32>
      %387 = tpu.matmul %386, %337, %cst_130 {dimension_numbers = #tpu.dot_dimension_numbers<[1], [0], [0], [1], [0, 0, 1, 1], [], []>} : vector<8x128xbf16>, vector<128x128xbf16>, vector<8x128xf32> -> vector<8x128xf32>
      %388 = arith.addf %387, %346 : vector<8x128xf32>
      %c0_131 = arith.constant 0 : index
      %c0_132 = arith.constant 0 : index
      %c0_133 = arith.constant 0 : index
      %389 = vector.load %arg22[%c0_131, %c0_132, %c0_133] : memref<8x8x128xbf16, #tpu.memory_space<vmem>>, vector<8x8x128xbf16>
      %390 = vector.shape_cast %388 : vector<8x128xf32> to vector<1x8x128xf32>
      %391 = arith.truncf %390 : vector<1x8x128xf32> to vector<1x8x128xbf16>
      %392 = vector.broadcast %391 : vector<1x8x128xbf16> to vector<8x8x128xbf16>
      %393 = arith.addf %389, %392 : vector<8x8x128xbf16>
      %394 = math.tanh %393 : vector<8x8x128xbf16>
      %395 = vector.shape_cast %339 : vector<1x128xbf16> to vector<1x1x128xbf16>
      %396 = vector.broadcast %395 : vector<1x1x128xbf16> to vector<8x8x128xbf16>
      %397 = arith.mulf %396, %394 : vector<8x8x128xbf16>
      %398 = arith.extf %397 : vector<8x8x128xbf16> to vector<8x8x128xf32>
      %cst_134 = arith.constant dense<0.000000e+00> : vector<8x8xf32>
      %399 = vector.multi_reduction <add>, %398, %cst_134 [2] : vector<8x8x128xf32> to vector<8x8xf32>
      %400 = math.tanh %399 : vector<8x8xf32>
      %cst_135 = arith.constant 1.000000e+01 : f32
      %401 = vector.broadcast %cst_135 : f32 to vector<8x8xf32>
      %402 = arith.mulf %401, %400 : vector<8x8xf32>
      %cst_136 = arith.constant 0.000000e+00 : f32
      %403 = vector.broadcast %cst_136 : f32 to vector<8x8xf32>
      %404 = arith.cmpf ogt, %arg30, %403 : vector<8x8xf32>
      %405 = vector.broadcast %cst_121 : f32 to vector<8x8xf32>
      %406 = arith.select %404, %405, %402 : vector<8x8xi1>, vector<8x8xf32>
      %cst_137 = arith.constant dense<0xFF800000> : vector<8xf32>
      %407 = vector.multi_reduction <maximumf>, %406, %cst_137 [0] : vector<8x8xf32> to vector<8xf32>
      %408 = vector.shape_cast %407 : vector<8xf32> to vector<1x8xf32>
      %409 = vector.broadcast %408 : vector<1x8xf32> to vector<8x8xf32>
      %410 = arith.subf %406, %409 : vector<8x8xf32>
      %411 = math.exp %410 : vector<8x8xf32>
      %cst_138 = arith.constant dense<0.000000e+00> : vector<8xf32>
      %412 = vector.multi_reduction <add>, %411, %cst_138 [0] : vector<8x8xf32> to vector<8xf32>
      %413 = vector.shape_cast %412 : vector<8xf32> to vector<1x8xf32>
      %414 = vector.broadcast %413 : vector<1x8xf32> to vector<8x8xf32>
      %415 = arith.divf %411, %414 : vector<8x8xf32>
      %416 = vector.shape_cast %415 : vector<8x8xf32> to vector<8x8x1xf32>
      %c0_139 = arith.constant 0 : index
      %c0_140 = arith.constant 0 : index
      %c0_141 = arith.constant 0 : index
      %417 = vector.load %arg22[%c0_139, %c0_140, %c0_141] : memref<8x8x128xbf16, #tpu.memory_space<vmem>>, vector<8x8x128xbf16>
      %418 = arith.extf %417 : vector<8x8x128xbf16> to vector<8x8x128xf32>
      %419 = vector.broadcast %416 : vector<8x8x1xf32> to vector<8x8x128xf32>
      %420 = arith.mulf %419, %418 : vector<8x8x128xf32>
      %cst_142 = arith.constant dense<0.000000e+00> : vector<8x128xf32>
      %421 = vector.multi_reduction <add>, %420, %cst_142 [0] : vector<8x8x128xf32> to vector<8x128xf32>
      %422 = arith.truncf %421 : vector<8x128xf32> to vector<8x128xbf16>
      %cst_143 = arith.constant dense<0.000000e+00> : vector<8x128xf32>
      %423 = tpu.matmul %422, %338, %cst_143 {dimension_numbers = #tpu.dot_dimension_numbers<[1], [0], [0], [1], [0, 0, 1, 1], [], []>} : vector<8x128xbf16>, vector<128x128xbf16>, vector<8x128xf32> -> vector<8x128xf32>
      %424 = arith.addf %423, %349 : vector<8x128xf32>
      %c0_144 = arith.constant 0 : index
      %c0_145 = arith.constant 0 : index
      %c0_146 = arith.constant 0 : index
      %425 = vector.load %arg23[%c0_144, %c0_145, %c0_146] : memref<8x8x128xbf16, #tpu.memory_space<vmem>>, vector<8x8x128xbf16>
      %426 = vector.shape_cast %424 : vector<8x128xf32> to vector<1x8x128xf32>
      %427 = arith.truncf %426 : vector<1x8x128xf32> to vector<1x8x128xbf16>
      %428 = vector.broadcast %427 : vector<1x8x128xbf16> to vector<8x8x128xbf16>
      %429 = arith.addf %425, %428 : vector<8x8x128xbf16>
      %430 = math.tanh %429 : vector<8x8x128xbf16>
      %431 = vector.shape_cast %340 : vector<1x128xbf16> to vector<1x1x128xbf16>
      %432 = vector.broadcast %431 : vector<1x1x128xbf16> to vector<8x8x128xbf16>
      %433 = arith.mulf %432, %430 : vector<8x8x128xbf16>
      %434 = arith.extf %433 : vector<8x8x128xbf16> to vector<8x8x128xf32>
      %cst_147 = arith.constant dense<0.000000e+00> : vector<8x8xf32>
      %435 = vector.multi_reduction <add>, %434, %cst_147 [2] : vector<8x8x128xf32> to vector<8x8xf32>
      %436 = math.tanh %435 : vector<8x8xf32>
      %cst_148 = arith.constant 1.000000e+01 : f32
      %437 = vector.broadcast %cst_148 : f32 to vector<8x8xf32>
      %438 = arith.mulf %437, %436 : vector<8x8xf32>
      %cst_149 = arith.constant 0.000000e+00 : f32
      %439 = vector.broadcast %cst_149 : f32 to vector<8x8xf32>
      %440 = arith.cmpf ogt, %arg30, %439 : vector<8x8xf32>
      %441 = vector.broadcast %cst_121 : f32 to vector<8x8xf32>
      %442 = arith.select %440, %441, %438 : vector<8x8xi1>, vector<8x8xf32>
      %c0_150 = arith.constant 0 : index
      %443 = arith.index_cast %arg26 : i32 to index
      %c0_151 = arith.constant 0 : index
      %c0_152 = arith.constant 0 : index
      %444 = vector.load %arg3[%c0_150, %443, %c0_151, %c0_152] : memref<1x8x8x8xf32, #tpu.memory_space<vmem>>, vector<1x1x8x8xf32>
      %445 = vector.shape_cast %444 : vector<1x1x8x8xf32> to vector<8x8xf32>
      %446 = arith.addf %442, %445 : vector<8x8xf32>
      %cst_153 = arith.constant dense<0xFF800000> : vector<8xf32>
      %447 = vector.multi_reduction <maximumf>, %446, %cst_153 [0] : vector<8x8xf32> to vector<8xf32>
      %448 = vector.shape_cast %447 : vector<8xf32> to vector<1x8xf32>
      %449 = vector.broadcast %448 : vector<1x8xf32> to vector<8x8xf32>
      %450 = arith.cmpf oeq, %446, %449 : vector<8x8xf32>
      %c8_i32_154 = arith.constant 8 : i32
      %451 = vector.broadcast %c8_i32_154 : i32 to vector<8x8xi32>
      %452 = arith.select %450, %350, %451 : vector<8x8xi1>, vector<8x8xi32>
      %cst_155 = arith.constant dense<2147483647> : vector<8xi32>
      %453 = vector.multi_reduction <minsi>, %452, %cst_155 [0] : vector<8x8xi32> to vector<8xi32>
      %454 = vector.shape_cast %453 : vector<8xi32> to vector<1x8xi32>
      %455 = vector.broadcast %454 : vector<1x8xi32> to vector<8x8xi32>
      %456 = arith.cmpi eq, %350, %455 : vector<8x8xi32>
      %457 = arith.extui %456 : vector<8x8xi1> to vector<8x8xi32>
      %458 = arith.sitofp %457 : vector<8x8xi32> to vector<8x8xf32>
      %cst_156 = arith.constant dense<0xFF800000> : vector<8xf32>
      %459 = vector.multi_reduction <maximumf>, %442, %cst_156 [0] : vector<8x8xf32> to vector<8xf32>
      %460 = vector.shape_cast %459 : vector<8xf32> to vector<1x8xf32>
      %461 = vector.shape_cast %460 : vector<1x8xf32> to vector<8xf32>
      %462 = vector.broadcast %460 : vector<1x8xf32> to vector<8x8xf32>
      %463 = arith.subf %442, %462 : vector<8x8xf32>
      %464 = math.exp %463 : vector<8x8xf32>
      %cst_157 = arith.constant dense<0.000000e+00> : vector<8xf32>
      %465 = vector.multi_reduction <add>, %464, %cst_157 [0] : vector<8x8xf32> to vector<8xf32>
      %466 = math.log %465 : vector<8xf32>
      %467 = arith.addf %461, %466 : vector<8xf32>
      %468 = arith.mulf %458, %442 : vector<8x8xf32>
      %cst_158 = arith.constant dense<0.000000e+00> : vector<8xf32>
      %469 = vector.multi_reduction <add>, %468, %cst_158 [0] : vector<8x8xf32> to vector<8xf32>
      %470 = arith.subf %469, %467 : vector<8xf32>
      %c0_159 = arith.constant 0 : index
      %471 = arith.index_cast %arg26 : i32 to index
      %c0_160 = arith.constant 0 : index
      %472 = vector.load %arg19[%c0_159, %471, %c0_160] : memref<1x8x8xf32, #tpu.memory_space<vmem>>, vector<1x1x8xf32>
      %473 = vector.shape_cast %472 : vector<1x1x8xf32> to vector<8xf32>
      %474 = vector.shape_cast %470 : vector<8xf32> to vector<1x1x8xf32>
      tpu.vector_store %arg19[%c0_159, %471, %c0_160], %474 {strides = array<i32>} : memref<1x8x8xf32, #tpu.memory_space<vmem>>, vector<1x1x8xf32>,
      %c0_161 = arith.constant 0 : index
      %475 = arith.index_cast %arg26 : i32 to index
      %c0_162 = arith.constant 0 : index
      %476 = vector.load %arg20[%c0_161, %475, %c0_162] : memref<1x8x8xi32, #tpu.memory_space<vmem>>, vector<1x1x8xi32>
      %477 = vector.shape_cast %476 : vector<1x1x8xi32> to vector<8xi32>
      %478 = vector.shape_cast %453 : vector<8xi32> to vector<1x1x8xi32>
      tpu.vector_store %arg20[%c0_161, %475, %c0_162], %478 {strides = array<i32>} : memref<1x8x8xi32, #tpu.memory_space<vmem>>, vector<1x1x8xi32>,
      %479 = arith.maximumf %arg30, %458 : vector<8x8xf32>
      %480 = vector.shape_cast %458 : vector<8x8xf32> to vector<8x8x1xf32>
      %c0_163 = arith.constant 0 : index
      %c0_164 = arith.constant 0 : index
      %c0_165 = arith.constant 0 : index
      %481 = vector.load %arg21[%c0_163, %c0_164, %c0_165] : memref<8x8x128xf32, #tpu.memory_space<vmem>>, vector<8x8x128xf32>
      %482 = vector.broadcast %480 : vector<8x8x1xf32> to vector<8x8x128xf32>
      %483 = arith.mulf %482, %481 : vector<8x8x128xf32>
      %cst_166 = arith.constant dense<0.000000e+00> : vector<8x128xf32>
      %484 = vector.multi_reduction <add>, %483, %cst_166 [0] : vector<8x8x128xf32> to vector<8x128xf32>
      scf.yield %385, %383, %484, %479 : vector<8x128xf32>, vector<8x128xf32>, vector<8x128xf32>, vector<8x8xf32>
    }
    %c8_i32_125 = arith.constant 8 : i32
    return
  }
  func.func @transform_0(%arg0: i32) -> (i32, i32, i32) {
    %c0_i32 = arith.constant 0 : i32
    %c0_i32_0 = arith.constant 0 : i32
    %c0_i32_1 = arith.constant 0 : i32
    return %arg0, %c0_i32, %c0_i32_0 : i32, i32, i32
  }
  func.func @transform_1(%arg0: i32) -> (i32, i32, i32) {
    %c0_i32 = arith.constant 0 : i32
    %c0_i32_0 = arith.constant 0 : i32
    %c0_i32_1 = arith.constant 0 : i32
    return %arg0, %c0_i32, %c0_i32_0 : i32, i32, i32
  }
  func.func @transform_2(%arg0: i32) -> (i32, i32, i32, i32) {
    %c0_i32 = arith.constant 0 : i32
    %c0_i32_0 = arith.constant 0 : i32
    %c0_i32_1 = arith.constant 0 : i32
    %c0_i32_2 = arith.constant 0 : i32
    return %arg0, %c0_i32, %c0_i32_0, %c0_i32_1 : i32, i32, i32, i32
  }
  func.func @transform_3(%arg0: i32) -> (i32, i32) {
    %c0_i32 = arith.constant 0 : i32
    %c0_i32_0 = arith.constant 0 : i32
    %c0_i32_1 = arith.constant 0 : i32
    return %c0_i32, %c0_i32_0 : i32, i32
  }
  func.func @transform_4(%arg0: i32) -> (i32, i32) {
    %c0_i32 = arith.constant 0 : i32
    %c0_i32_0 = arith.constant 0 : i32
    %c0_i32_1 = arith.constant 0 : i32
    return %c0_i32, %c0_i32_0 : i32, i32
  }
  func.func @transform_5(%arg0: i32) -> (i32, i32) {
    %c0_i32 = arith.constant 0 : i32
    %c0_i32_0 = arith.constant 0 : i32
    %c0_i32_1 = arith.constant 0 : i32
    return %c0_i32, %c0_i32_0 : i32, i32
  }
  func.func @transform_6(%arg0: i32) -> (i32, i32) {
    %c0_i32 = arith.constant 0 : i32
    %c0_i32_0 = arith.constant 0 : i32
    %c0_i32_1 = arith.constant 0 : i32
    return %c0_i32, %c0_i32_0 : i32, i32
  }
  func.func @transform_7(%arg0: i32) -> (i32, i32) {
    %c0_i32 = arith.constant 0 : i32
    %c0_i32_0 = arith.constant 0 : i32
    %c0_i32_1 = arith.constant 0 : i32
    return %c0_i32, %c0_i32_0 : i32, i32
  }
  func.func @transform_8(%arg0: i32) -> (i32, i32) {
    %c0_i32 = arith.constant 0 : i32
    %c0_i32_0 = arith.constant 0 : i32
    %c0_i32_1 = arith.constant 0 : i32
    return %c0_i32, %c0_i32_0 : i32, i32
  }
  func.func @transform_9(%arg0: i32) -> (i32, i32) {
    %c0_i32 = arith.constant 0 : i32
    %c0_i32_0 = arith.constant 0 : i32
    %c0_i32_1 = arith.constant 0 : i32
    return %c0_i32, %c0_i32_0 : i32, i32
  }
  func.func @transform_10(%arg0: i32) -> (i32, i32) {
    %c0_i32 = arith.constant 0 : i32
    %c0_i32_0 = arith.constant 0 : i32
    %c0_i32_1 = arith.constant 0 : i32
    return %c0_i32, %c0_i32_0 : i32, i32
  }
  func.func @transform_11(%arg0: i32) -> (i32, i32) {
    %c0_i32 = arith.constant 0 : i32
    %c0_i32_0 = arith.constant 0 : i32
    %c0_i32_1 = arith.constant 0 : i32
    return %c0_i32, %c0_i32_0 : i32, i32
  }
  func.func @transform_12(%arg0: i32) -> (i32, i32) {
    %c0_i32 = arith.constant 0 : i32
    %c0_i32_0 = arith.constant 0 : i32
    %c0_i32_1 = arith.constant 0 : i32
    return %c0_i32, %c0_i32_0 : i32, i32
  }
  func.func @transform_13(%arg0: i32) -> (i32, i32) {
    %c0_i32 = arith.constant 0 : i32
    %c0_i32_0 = arith.constant 0 : i32
    %c0_i32_1 = arith.constant 0 : i32
    return %c0_i32, %c0_i32_0 : i32, i32
  }
  func.func @transform_14(%arg0: i32) -> (i32, i32) {
    %c0_i32 = arith.constant 0 : i32
    %c0_i32_0 = arith.constant 0 : i32
    %c0_i32_1 = arith.constant 0 : i32
    return %c0_i32, %c0_i32_0 : i32, i32
  }
  func.func @transform_15(%arg0: i32) -> (i32, i32) {
    %c0_i32 = arith.constant 0 : i32
    %c0_i32_0 = arith.constant 0 : i32
    %c0_i32_1 = arith.constant 0 : i32
    return %c0_i32, %c0_i32_0 : i32, i32
  }
  func.func @transform_16(%arg0: i32) -> (i32, i32) {
    %c0_i32 = arith.constant 0 : i32
    %c0_i32_0 = arith.constant 0 : i32
    %c0_i32_1 = arith.constant 0 : i32
    return %c0_i32, %c0_i32_0 : i32, i32
  }
  func.func @transform_17(%arg0: i32) -> (i32, i32) {
    %c0_i32 = arith.constant 0 : i32
    %c0_i32_0 = arith.constant 0 : i32
    %c0_i32_1 = arith.constant 0 : i32
    return %c0_i32, %c0_i32_0 : i32, i32
  }
  func.func @transform_18(%arg0: i32) -> (i32, i32, i32) {
    %c0_i32 = arith.constant 0 : i32
    %c0_i32_0 = arith.constant 0 : i32
    %c0_i32_1 = arith.constant 0 : i32
    return %arg0, %c0_i32, %c0_i32_0 : i32, i32, i32
  }
  func.func @transform_19(%arg0: i32) -> (i32, i32, i32) {
    %c0_i32 = arith.constant 0 : i32
    %c0_i32_0 = arith.constant 0 : i32
    %c0_i32_1 = arith.constant 0 : i32
    return %arg0, %c0_i32, %c0_i32_0 : i32, i32, i32
  }
}

</mosaic_0001>

<bundles_post_ra>
// kernel: tpu_custom_call.1
= control target key start
LH: loop header
LB: loop body
LE: loop exit
PB: predicated region body
PF: predicated region fallthrough
CT: control target
= control target key end

     0   :  { %s5869_s0 = inlined_call_operand.hbm [shape: f32[1,8,8], index: 0, kind: input, shape index: {}]   ;;  %s5870_s1 = inlined_call_operand.hbm [shape: f32[1,8,8], index: 1, kind: input, shape index: {}]   ;;  %s5871_s2 = inlined_call_operand.hbm [shape: f32[1,8,8,8], index: 2, kind: input, shape index: {}]   ;;  %s5872_s3 = inlined_call_operand.hbm [shape: f32[2,128], index: 3, kind: input, shape index: {}]   ;;  %s5873_s4 = inlined_call_operand.hbm [shape: f32[1,128], index: 4, kind: input, shape index: {}]   ;;  %s5874_s5 = inlined_call_operand.hbm [shape: bf16[128,512], index: 5, kind: input, shape index: {}]   ;;  %s5875_s6 = inlined_call_operand.hbm [shape: bf16[128,512], index: 6, kind: input, shape index: {}]   ;;  %s5876_s7 = inlined_call_operand.vmem [shape: f32[1,512], index: 7, kind: input, shape index: {}]   ;;  %s5877_s8 = inlined_call_operand.hbm [shape: bf16[256,512], index: 8, kind: input, shape index: {}]   ;;  %s5878_s9 = inlined_call_operand.vmem [shape: f32[1,512], index: 9, kind: input, shape index: {}]   ;;  %s5879_s10 = inlined_call_operand.hbm [shape: bf16[128,128], index: 10, kind: input, shape index: {}]   ;;  %s5880_s11 = inlined_call_operand.vmem [shape: f32[1,128], index: 11, kind: input, shape index: {}]   ;;  %s5881_s12 = inlined_call_operand.hbm [shape: bf16[128,128], index: 12, kind: input, shape index: {}]   ;;  %s5882_s13 = inlined_call_operand.vmem [shape: f32[1,128], index: 13, kind: input, shape index: {}]   ;;  %s5883_s14 = inlined_call_operand.hbm [shape: bf16[128,256], index: 14, kind: input, shape index: {}]   ;;  %s5884_s15 = inlined_call_operand.vmem [shape: f32[1,256], index: 15, kind: input, shape index: {}]   ;;  %s5885_s16 = inlined_call_operand.vmem [shape: bf16[1,128], index: 16, kind: input, shape index: {}]   ;;  %s5886_s17 = inlined_call_operand.vmem [shape: bf16[1,128], index: 17, kind: input, shape index: {}]   ;;  %s5887_s18 = inlined_call_operand.hbm [shape: f32[1,8,8], index: 18, kind: output, shape index: {0}]   ;;  %s5888_s19 = inlined_call_operand.hbm [shape: s32[1,8,8], index: 19, kind: output, shape index: {1}]  }
   0x1   :  { %6019 = sst [smem:[#allocation165_spill]] %s5869_s0 }
   0x2   :  { %6020 = sst [smem:[#allocation166_spill]] %s5870_s1 }
   0x3   :  { %6021 = sst [smem:[#allocation167_spill]] %s5871_s2 }
   0x4   :  { %6022 = sst [smem:[#allocation168_spill]] %s5872_s3 }
   0x5   :  { %25 = vsyncpa [#allocation8], 0 }
   0x6   :  { %26 = vsyncpa [#allocation11], 0 }
   0x7   :  { %27 = vsyncpa [#allocation14], 0 }
   0x8   :  { %28 = vsyncpa [#allocation17], 0 }
   0x9   :  { %29 = vsyncpa [#allocation20], 0 }
   0xa   :  { %30 = vsyncpa [#allocation23], 0 }
   0xb   :  { %31 = vsyncpa [#allocation9], 0 }
   0xc   :  { %32 = vsyncpa [#allocation27], 0  ;;  %s4514_s0 = smov [#allocation10]   ;;  %s4515_s20 = smov [#allocation13]  }
   0xd   :  { %s49_s30 = sshll.u32 %s4514_s0, 4  ;;  %s71_s21 = sshll.u32 %s4515_s20, 4  ;;  %s50_s30 = int_to_ptr.vmem [resolvable:$true] %s49_s30  ;;  %s72_s21 = int_to_ptr.vmem [resolvable:$true] %s71_s21 }
   0xe   :  { %s4206_s1 = scalar_lea.vmem %s50_s30, 128  ;;  %p4211_p1 = scmp.lt.s32.totalorder %s50_s30, %s50_s30 }
   0xf   :  { %p4207_p0 = scmp.ne.s32.totalorder %s50_s30, %s4206_s1  ;;  %p4212_p2 = scmp.lt.s32.totalorder %s4206_s1, %s4206_s1 }
  0x11   :  { %p4213_p3 = por %p4212_p2, %p4211_p1 }
  0x13   :  { %p4214_p4 = pnand %p4213_p3, %p4207_p0 }
  0x15   :  { %4217 = shalt.err (!%p4214_p4)
}
  0x16   :  { %s6023_s23 = sld [smem:[#allocation166_spill]]  ;;  %s4226_s24 = scalar_lea.vmem %s72_s21, 32 }
  0x17   :  { %p4227_p5 = scmp.ne.s32.totalorder %s72_s21, %s4226_s24  ;;  %p4231_p6 = scmp.lt.s32.totalorder %s72_s21, %s72_s21 }
  0x18   :  { %p4232_p7 = scmp.lt.s32.totalorder %s4226_s24, %s4226_s24 }
  0x1a   :  { %p4233_p8 = por %p4232_p7, %p4231_p6 }
  0x1c   :  { %52 = dma.hbm_to_vmem [thread:$0]  %s6023_s23, 128, %s50_s30, [#allocation11]  }
  0x1d   :  { %p4234_p9 = pnand %p4233_p8, %p4227_p5 }
  0x1f   :  { %4237 = shalt.err (!%p4234_p9)
}
  0x20   :  { %s6024_s26 = sld [smem:[#allocation168_spill]]  ;;  %s4516_s27 = smov [#allocation16]  }
  0x21   :  { %s90_s28 = sshll.u32 %s4516_s27, 4  ;;  %s91_s28 = int_to_ptr.vmem [resolvable:$true] %s90_s28 }
  0x22   :  { %s4246_s29 = scalar_lea.vmem %s91_s28, 4096  ;;  %p4251_p11 = scmp.lt.s32.totalorder %s91_s28, %s91_s28 }
  0x23   :  { %p4247_p10 = scmp.ne.s32.totalorder %s91_s28, %s4246_s29  ;;  %p4252_p12 = scmp.lt.s32.totalorder %s4246_s29, %s4246_s29 }
  0x25   :  { %p4253_p13 = por %p4252_p12, %p4251_p11 }
  0x26   :  { %74 = dma.hbm_to_vmem [thread:$0]  %s6024_s26, 32, %s72_s21, [#allocation14]  }
  0x27   :  { %p4254_p0 = pnand %p4253_p13, %p4247_p10 }
  0x29   :  { %4257 = shalt.err (!%p4254_p0)
}
  0x2a   :  { %s4517_s0 = smov 256   ;;  %s4518_s30 = smov 16  }
  0x2b   :  { %96 = dma.hbm_to_vmem [thread:$0]  %s5874_s5, 4096, %s91_s28, [#allocation17], %s4517_s0, %s4517_s0, %s4518_s30  }
  0x2c   :  { %s4519_s21 = smov [#allocation19]  }
  0x2d   :  { %s116_s22 = sshll.u32 %s4519_s21, 4  ;;  %s117_s22 = int_to_ptr.vmem [resolvable:$true] %s116_s22 }
  0x2e   :  { %s4266_s2 = scalar_lea.vmem %s117_s22, 8192  ;;  %p4271_p2 = scmp.lt.s32.totalorder %s117_s22, %s117_s22 }
  0x2f   :  { %p4267_p1 = scmp.ne.s32.totalorder %s117_s22, %s4266_s2  ;;  %p4272_p3 = scmp.lt.s32.totalorder %s4266_s2, %s4266_s2 }
  0x31   :  { %p4273_p4 = por %p4272_p3, %p4271_p2 }
  0x33   :  { %p4274_p5 = pnand %p4273_p4, %p4267_p1 }
  0x35   :  { %4277 = shalt.err (!%p4274_p5)
}
  0x36   :  { %122 = dma.hbm_to_vmem [thread:$0]  %s5877_s8, 8192, %s117_s22, [#allocation20], %s4517_s0, %s4517_s0, %s4518_s30  }
  0x37   :  { %s4520_s25 = smov [#allocation22]   ;;  %s4521_s5 = smov [#allocation7]  }
  0x38   :  { %s144_s3 = sshll.u32 %s4520_s25, 4  ;;  %s39_s26 = sshll.u32 %s4521_s5, 4  ;;  %s145_s3 = int_to_ptr.vmem [resolvable:$true] %s144_s3  ;;  %s40_s26 = int_to_ptr.vmem [resolvable:$true] %s39_s26 }
  0x39   :  { %s4286_s27 = scalar_lea.vmem %s145_s3, 1024  ;;  %p4291_p7 = scmp.lt.s32.totalorder %s145_s3, %s145_s3 }
  0x3a   :  { %p4287_p6 = scmp.ne.s32.totalorder %s145_s3, %s4286_s27  ;;  %p4292_p8 = scmp.lt.s32.totalorder %s4286_s27, %s4286_s27 }
  0x3c   :  { %p4293_p9 = por %p4292_p8, %p4291_p7 }
  0x3e   :  { %p4294_p10 = pnand %p4293_p9, %p4287_p6 }
  0x40   :  { %4297 = shalt.err (!%p4294_p10)
}
  0x41   :  { %s4522_s28 = smov 64   ;;  %s4523_s29 = smov 4  }
  0x42   :  { %150 = dma.hbm_to_vmem [thread:$0]  %s5881_s12, 1024, %s145_s3, [#allocation23], %s4522_s28, %s4522_s28, %s4523_s29  }
  0x43   :  { %s4306_s1 = scalar_lea.vmem %s40_s26, 128  ;;  %p4311_p12 = scmp.lt.s32.totalorder %s40_s26, %s40_s26 }
  0x44   :  { %p4307_p11 = scmp.ne.s32.totalorder %s40_s26, %s4306_s1  ;;  %p4312_p13 = scmp.lt.s32.totalorder %s4306_s1, %s4306_s1 }
  0x46   :  { %p4313_p0 = por %p4312_p13, %p4311_p12 }
  0x48   :  { %p4314_p1 = pnand %p4313_p0, %p4307_p11 }
  0x4a   :  { %4317 = shalt.err (!%p4314_p1)
}
  0x4b   :  { %s6025_s2 = sld [smem:[#allocation165_spill]]  ;;  %s4524_s23 = smov [#allocation12]  }
  0x4c   :  { %s58_s24 = sshll.u32 %s4524_s23, 4  ;;  %s59_s24 = int_to_ptr.vmem [resolvable:$true] %s58_s24 }
  0x4d   :  { %s4326_s25 = scalar_lea.vmem %s59_s24, 1024  ;;  %p4331_p3 = scmp.lt.s32.totalorder %s59_s24, %s59_s24 }
  0x4e   :  { %p4327_p2 = scmp.ne.s32.totalorder %s59_s24, %s4326_s25  ;;  %p4332_p4 = scmp.lt.s32.totalorder %s4326_s25, %s4326_s25 }
  0x50   :  { %p4333_p5 = por %p4332_p4, %p4331_p3 }
  0x51   :  { %42 = dma.hbm_to_vmem [thread:$0]  %s6025_s2, 128, %s40_s26, [#allocation8]  }
  0x52   :  { %p4334_p6 = pnand %p4333_p5, %p4327_p2 }
  0x54   :  { %4337 = shalt.err (!%p4334_p6)
}
  0x55   :  { %s4525_s12 = smov 128   ;;  %s4526_s3 = smov 8  }
  0x56   :  { %s6026_s20 = sld [smem:[#allocation167_spill]]  ;;  %s4527_s26 = smov [#allocation15]  }
  0x57   :  { %s81_s8 = sshll.u32 %s4527_s26, 4  ;;  %s4528_s1 = smov [#allocation18]   ;;  %s82_s8 = int_to_ptr.vmem [resolvable:$true] %s81_s8 }
  0x58   :  { %s102_s21 = sshll.u32 %s4528_s1, 4  ;;  %s4346_s22 = scalar_lea.vmem %s82_s8, 16  ;;  %s103_s21 = int_to_ptr.vmem [resolvable:$true] %s102_s21 }
  0x59   :  { %p4347_p7 = scmp.ne.s32.totalorder %s82_s8, %s4346_s22  ;;  %s4350_s2 = scalar_lea.vmem %s82_s8, 32 }
  0x5a   :  { %p4351_p8 = scmp.lt.s32.totalorder %s82_s8, %s82_s8  ;;  %p4352_p9 = scmp.lt.s32.totalorder %s4350_s2, %s4346_s22 }
  0x5c   :  { %64 = dma.hbm_to_vmem [thread:$0]  %s6026_s20, 1024, %s59_s24, [#allocation11], %s4525_s12, %s4525_s12, %s4526_s3  }
  0x5d   :  { %p4353_p10 = por %p4352_p9, %p4351_p8 }
  0x5f   :  { %p4354_p11 = pnand %p4353_p10, %p4347_p7 }
  0x61   :  { %4357 = shalt.err (!%p4354_p11)
}
  0x62   :  { %84 = dma.hbm_to_vmem [thread:$0]  %s5873_s4, 16, %s82_s8, [#allocation14]  }
  0x63   :  { %s4366_s5 = scalar_lea.vmem %s103_s21, 4096  ;;  %p4371_p13 = scmp.lt.s32.totalorder %s103_s21, %s103_s21 }
  0x64   :  { %p4367_p12 = scmp.ne.s32.totalorder %s103_s21, %s4366_s5  ;;  %p4372_p0 = scmp.lt.s32.totalorder %s4366_s5, %s4366_s5 }
  0x66   :  { %p4373_p1 = por %p4372_p0, %p4371_p13 }
  0x68   :  { %p4374_p2 = pnand %p4373_p1, %p4367_p12 }
  0x6a   :  { %4377 = shalt.err (!%p4374_p2)
}
  0x6b   :  { %108 = dma.hbm_to_vmem [thread:$0]  %s5875_s6, 4096, %s103_s21, [#allocation17], %s4517_s0, %s4517_s0, %s4518_s30  }
  0x6c   :  { %s4529_s20 = smov [#allocation21]   ;;  %s4530_s1 = smov [#allocation24]  }
  0x6d   :  { %s130_s26 = sshll.u32 %s4529_s20, 4  ;;  %s158_s4 = sshll.u32 %s4530_s1, 4  ;;  %s131_s26 = int_to_ptr.vmem [resolvable:$true] %s130_s26  ;;  %s159_s4 = int_to_ptr.vmem [resolvable:$true] %s158_s4 }
  0x6e   :  { %s4386_s8 = scalar_lea.vmem %s131_s26, 1024  ;;  %p4391_p4 = scmp.lt.s32.totalorder %s131_s26, %s131_s26 }
  0x6f   :  { %p4387_p3 = scmp.ne.s32.totalorder %s131_s26, %s4386_s8  ;;  %p4392_p5 = scmp.lt.s32.totalorder %s4386_s8, %s4386_s8 }
  0x71   :  { %p4393_p6 = por %p4392_p5, %p4391_p4 }
  0x73   :  { %p4394_p7 = pnand %p4393_p6, %p4387_p3 }
  0x75   :  { %4397 = shalt.err (!%p4394_p7)
}
  0x76   :  { %136 = dma.hbm_to_vmem [thread:$0]  %s5879_s10, 1024, %s131_s26, [#allocation20], %s4522_s28, %s4522_s28, %s4523_s29  }
  0x77   :  { %s4406_s6 = scalar_lea.vmem %s159_s4, 2048  ;;  %p4411_p9 = scmp.lt.s32.totalorder %s159_s4, %s159_s4 }
  0x78   :  { %p4407_p8 = scmp.ne.s32.totalorder %s159_s4, %s4406_s6  ;;  %p4412_p10 = scmp.lt.s32.totalorder %s4406_s6, %s4406_s6 }
  0x7a   :  { %p4413_p11 = por %p4412_p10, %p4411_p9 }
  0x7c   :  { %p4414_p12 = pnand %p4413_p11, %p4407_p8 }
  0x7e   :  { %4417 = shalt.err (!%p4414_p12)
}
  0x7f   :  { %164 = dma.hbm_to_vmem [thread:$0]  %s5883_s14, 2048, %s159_s4, [#allocation23], %s4525_s12, %s4525_s12, %s4526_s3  }
  0x80   :  { %4478 = dma.done.wait [#allocation8], 128  }
  0x81   :  { %4479 = vsyncadd [#allocation8], 4294967168 }
  0x82   :  { %4480 = dma.done.wait [#allocation11], 1152  }
  0x83   :  { %4481 = vsyncadd [#allocation11], 4294966144 }
  0x84   :  { %4482 = dma.done.wait [#allocation14], 48  }
  0x85   :  { %4483 = vsyncadd [#allocation14], 4294967248 }
  0x86   :  { %4484 = dma.done.wait [#allocation17], 8192  }
  0x87   :  { %4485 = vsyncadd [#allocation17], 4294959104 }
  0x88   :  { %4486 = dma.done.wait [#allocation20], 9216  }
  0x89   :  { %4487 = vsyncadd [#allocation20], 4294958080 }
  0x8a   :  { %4488 = dma.done.wait [#allocation23], 3072  }
  0x8b   :  { %4489 = vsyncadd [#allocation23], 4294964224  ;;  %v4690_v0 = vld [vmem:[#allocation19] sm:$0xff]  ;;  %v4692_v1 = vld [vmem:[#allocation19 + $0x8] sm:$0xff]  ;;  %v5889_v39 = vlaneseq }
  0x8c   :  { %6027 = vst [vmem:[#allocation36_spill] sm:$0xff] %v4690_v0  ;;  %6028 = vst [vmem:[#allocation37_spill] sm:$0xff] %v4692_v1  ;;  %v4694_v2 = vld [vmem:[#allocation19 + $0x10] sm:$0xff]  ;;  %v4696_v3 = vld [vmem:[#allocation19 + $0x18] sm:$0xff] }
  0x8d   :  { %6029 = vst [vmem:[#allocation38_spill] sm:$0xff] %v4694_v2  ;;  %6030 = vst [vmem:[#allocation39_spill] sm:$0xff] %v4696_v3  ;;  %v4698_v4 = vld [vmem:[#allocation19 + $0x20] sm:$0xff]  ;;  %v4700_v5 = vld [vmem:[#allocation19 + $0x28] sm:$0xff]  ;;  %v4793_v52 = vshrl.u32 %v5889_v39, 7 }
  0x8e   :  { %6031 = vst [vmem:[#allocation40_spill] sm:$0xff] %v4698_v4  ;;  %6032 = vst [vmem:[#allocation41_spill] sm:$0xff] %v4700_v5  ;;  %v4702_v6 = vld [vmem:[#allocation19 + $0x30] sm:$0xff]  ;;  %v4704_v7 = vld [vmem:[#allocation19 + $0x38] sm:$0xff] }
  0x8f   :  { %6033 = vst [vmem:[#allocation42_spill] sm:$0xff] %v4702_v6  ;;  %6034 = vst [vmem:[#allocation43_spill] sm:$0xff] %v4704_v7  ;;  %v4706_v8 = vld [vmem:[#allocation19 + $0x40] sm:$0xff]  ;;  %v4708_v9 = vld [vmem:[#allocation19 + $0x48] sm:$0xff] }
  0x90   :  { %6035 = vst [vmem:[#allocation44_spill] sm:$0xff] %v4706_v8  ;;  %6036 = vst [vmem:[#allocation45_spill] sm:$0xff] %v4708_v9  ;;  %v4710_v10 = vld [vmem:[#allocation19 + $0x50] sm:$0xff]  ;;  %v4712_v11 = vld [vmem:[#allocation19 + $0x58] sm:$0xff] }
  0x91   :  { %6037 = vst [vmem:[#allocation46_spill] sm:$0xff] %v4710_v10  ;;  %6038 = vst [vmem:[#allocation47_spill] sm:$0xff] %v4712_v11  ;;  %v4714_v12 = vld [vmem:[#allocation19 + $0x60] sm:$0xff]  ;;  %v4716_v13 = vld [vmem:[#allocation19 + $0x68] sm:$0xff] }
  0x92   :  { %6039 = vst [vmem:[#allocation48_spill] sm:$0xff] %v4714_v12  ;;  %6040 = vst [vmem:[#allocation49_spill] sm:$0xff] %v4716_v13  ;;  %v4718_v14 = vld [vmem:[#allocation19 + $0x70] sm:$0xff]  ;;  %v4720_v15 = vld [vmem:[#allocation19 + $0x78] sm:$0xff] }
  0x93   :  { %6041 = vst [vmem:[#allocation50_spill] sm:$0xff] %v4718_v14  ;;  %6042 = vst [vmem:[#allocation51_spill] sm:$0xff] %v4720_v15  ;;  %v4722_v16 = vld [vmem:[#allocation19 + $0x80] sm:$0xff]  ;;  %v4724_v17 = vld [vmem:[#allocation19 + $0x88] sm:$0xff] }
  0x94   :  { %6043 = vst [vmem:[#allocation52_spill] sm:$0xff] %v4722_v16  ;;  %6044 = vst [vmem:[#allocation53_spill] sm:$0xff] %v4724_v17  ;;  %v4726_v18 = vld [vmem:[#allocation19 + $0x90] sm:$0xff]  ;;  %v4728_v19 = vld [vmem:[#allocation19 + $0x98] sm:$0xff] }
  0x95   :  { %6045 = vst [vmem:[#allocation54_spill] sm:$0xff] %v4726_v18  ;;  %6046 = vst [vmem:[#allocation55_spill] sm:$0xff] %v4728_v19  ;;  %v4730_v20 = vld [vmem:[#allocation19 + $0xa0] sm:$0xff]  ;;  %v4732_v21 = vld [vmem:[#allocation19 + $0xa8] sm:$0xff] }
  0x96   :  { %6047 = vst [vmem:[#allocation56_spill] sm:$0xff] %v4730_v20  ;;  %6048 = vst [vmem:[#allocation57_spill] sm:$0xff] %v4732_v21  ;;  %v4734_v22 = vld [vmem:[#allocation19 + $0xb0] sm:$0xff]  ;;  %v4736_v23 = vld [vmem:[#allocation19 + $0xb8] sm:$0xff] }
  0x97   :  { %6049 = vst [vmem:[#allocation58_spill] sm:$0xff] %v4734_v22  ;;  %6050 = vst [vmem:[#allocation59_spill] sm:$0xff] %v4736_v23  ;;  %v4738_v24 = vld [vmem:[#allocation19 + $0xc0] sm:$0xff]  ;;  %v4740_v25 = vld [vmem:[#allocation19 + $0xc8] sm:$0xff] }
  0x98   :  { %6051 = vst [vmem:[#allocation60_spill] sm:$0xff] %v4738_v24  ;;  %6052 = vst [vmem:[#allocation61_spill] sm:$0xff] %v4740_v25  ;;  %v4742_v26 = vld [vmem:[#allocation19 + $0xd0] sm:$0xff]  ;;  %v4744_v27 = vld [vmem:[#allocation19 + $0xd8] sm:$0xff] }
  0x99   :  { %6053 = vst [vmem:[#allocation62_spill] sm:$0xff] %v4742_v26  ;;  %6054 = vst [vmem:[#allocation63_spill] sm:$0xff] %v4744_v27  ;;  %v4746_v28 = vld [vmem:[#allocation19 + $0xe0] sm:$0xff]  ;;  %v4748_v29 = vld [vmem:[#allocation19 + $0xe8] sm:$0xff] }
  0x9a   :  { %6055 = vst [vmem:[#allocation64_spill] sm:$0xff] %v4746_v28  ;;  %6056 = vst [vmem:[#allocation65_spill] sm:$0xff] %v4748_v29  ;;  %v4750_v30 = vld [vmem:[#allocation19 + $0xf0] sm:$0xff]  ;;  %v4752_v31 = vld [vmem:[#allocation19 + $0xf8] sm:$0xff] }
  0x9b   :  { %6057 = vst [vmem:[#allocation66_spill] sm:$0xff] %v4750_v30  ;;  %6058 = vst [vmem:[#allocation67_spill] sm:$0xff] %v4752_v31  ;;  %v4754_v32 = vld [vmem:[#allocation19 + $0x100] sm:$0xff]  ;;  %v4756_v33 = vld [vmem:[#allocation19 + $0x108] sm:$0xff] }
  0x9c   :  { %6059 = vst [vmem:[#allocation68_spill] sm:$0xff] %v4754_v32  ;;  %6060 = vst [vmem:[#allocation69_spill] sm:$0xff] %v4756_v33  ;;  %v4758_v34 = vld [vmem:[#allocation19 + $0x110] sm:$0xff]  ;;  %v4760_v35 = vld [vmem:[#allocation19 + $0x118] sm:$0xff]  ;;  %v4820_v33 = vsub.s32 0, %v4793_v52 }
  0x9d   :  { %6061 = vst [vmem:[#allocation70_spill] sm:$0xff] %v4758_v34  ;;  %6062 = vst [vmem:[#allocation71_spill] sm:$0xff] %v4760_v35  ;;  %v4762_v36 = vld [vmem:[#allocation19 + $0x120] sm:$0xff]  ;;  %v4764_v37 = vld [vmem:[#allocation19 + $0x128] sm:$0xff] }
  0x9e   :  { %6063 = vst [vmem:[#allocation72_spill] sm:$0xff] %v4762_v36  ;;  %6064 = vst [vmem:[#allocation73_spill] sm:$0xff] %v4764_v37  ;;  %v4766_v38 = vld [vmem:[#allocation19 + $0x130] sm:$0xff]  ;;  %v4768_v40 = vld [vmem:[#allocation19 + $0x138] sm:$0xff]  ;;  %v4829_v37 = vsub.s32 1, %v4793_v52 }
  0x9f   :  { %6065 = vst [vmem:[#allocation74_spill] sm:$0xff] %v4766_v38  ;;  %6066 = vst [vmem:[#allocation75_spill] sm:$0xff] %v4768_v40  ;;  %v4770_v41 = vld [vmem:[#allocation19 + $0x140] sm:$0xff]  ;;  %v4772_v42 = vld [vmem:[#allocation19 + $0x148] sm:$0xff] }
  0xa0   :  { %6067 = vst [vmem:[#allocation76_spill] sm:$0xff] %v4770_v41  ;;  %6068 = vst [vmem:[#allocation77_spill] sm:$0xff] %v4772_v42  ;;  %v4774_v43 = vld [vmem:[#allocation19 + $0x150] sm:$0xff]  ;;  %v4776_v44 = vld [vmem:[#allocation19 + $0x158] sm:$0xff] }
  0xa1   :  { %6069 = vst [vmem:[#allocation78_spill] sm:$0xff] %v4774_v43  ;;  %6070 = vst [vmem:[#allocation79_spill] sm:$0xff] %v4776_v44  ;;  %v4778_v45 = vld [vmem:[#allocation19 + $0x160] sm:$0xff]  ;;  %v4780_v46 = vld [vmem:[#allocation19 + $0x168] sm:$0xff] }
  0xa2   :  { %6071 = vst [vmem:[#allocation80_spill] sm:$0xff] %v4778_v45  ;;  %6072 = vst [vmem:[#allocation81_spill] sm:$0xff] %v4780_v46  ;;  %v4782_v47 = vld [vmem:[#allocation19 + $0x170] sm:$0xff]  ;;  %v4784_v48 = vld [vmem:[#allocation19 + $0x178] sm:$0xff] }
  0xa3   :  { %6073 = vst [vmem:[#allocation82_spill] sm:$0xff] %v4782_v47  ;;  %6074 = vst [vmem:[#allocation83_spill] sm:$0xff] %v4784_v48  ;;  %v4786_v49 = vld [vmem:[#allocation19 + $0x180] sm:$0xff]  ;;  %v4788_v50 = vld [vmem:[#allocation19 + $0x188] sm:$0xff] }
  0xa4   :  { %6075 = vst [vmem:[#allocation84_spill] sm:$0xff] %v4786_v49  ;;  %6076 = vst [vmem:[#allocation85_spill] sm:$0xff] %v4788_v50  ;;  %v4790_v51 = vld [vmem:[#allocation19 + $0x190] sm:$0xff]  ;;  %v4795_v53 = vld [vmem:[#allocation19 + $0x198] sm:$0xff] }
  0xa5   :  { %6077 = vst [vmem:[#allocation86_spill] sm:$0xff] %v4790_v51  ;;  %6078 = vst [vmem:[#allocation87_spill] sm:$0xff] %v4793_v52  ;;  %v4797_v54 = vld [vmem:[#allocation19 + $0x1a0] sm:$0xff]  ;;  %v4799_v55 = vld [vmem:[#allocation19 + $0x1a8] sm:$0xff] }
  0xa6   :  { %6079 = vst [vmem:[#allocation88_spill] sm:$0xff] %v4795_v53  ;;  %6080 = vst [vmem:[#allocation89_spill] sm:$0xff] %v4797_v54  ;;  %v4801_v56 = vld [vmem:[#allocation19 + $0x1b0] sm:$0xff]  ;;  %v4803_v57 = vld [vmem:[#allocation19 + $0x1b8] sm:$0xff] }
  0xa7   :  { %6081 = vst [vmem:[#allocation90_spill] sm:$0xff] %v4799_v55  ;;  %6082 = vst [vmem:[#allocation91_spill] sm:$0xff] %v4801_v56  ;;  %v4805_v58 = vld [vmem:[#allocation19 + $0x1c0] sm:$0xff]  ;;  %v4807_v59 = vld [vmem:[#allocation19 + $0x1c8] sm:$0xff] }
  0xa8   :  { %6083 = vst [vmem:[#allocation92_spill] sm:$0xff] %v4803_v57  ;;  %6084 = vst [vmem:[#allocation93_spill] sm:$0xff] %v4805_v58  ;;  %v4809_v60 = vld [vmem:[#allocation19 + $0x1d0] sm:$0xff]  ;;  %v4811_v61 = vld [vmem:[#allocation19 + $0x1d8] sm:$0xff] }
  0xa9   :  { %6085 = vst [vmem:[#allocation94_spill] sm:$0xff] %v4807_v59  ;;  %6086 = vst [vmem:[#allocation95_spill] sm:$0xff] %v4809_v60  ;;  %v4813_v62 = vld [vmem:[#allocation19 + $0x1e0] sm:$0xff]  ;;  %v4815_v63 = vld [vmem:[#allocation19 + $0x1e8] sm:$0xff] }
  0xaa   :  { %6087 = vst [vmem:[#allocation96_spill] sm:$0xff] %v4811_v61  ;;  %6088 = vst [vmem:[#allocation97_spill] sm:$0xff] %v4813_v62  ;;  %v4817_v39 = vld [vmem:[#allocation19 + $0x1f0] sm:$0xff]  ;;  %v4822_v35 = vld [vmem:[#allocation19 + $0x1f8] sm:$0xff] }
  0xab   :  { %6089 = vst [vmem:[#allocation98_spill] sm:$0xff] %v4815_v63  ;;  %6090 = vst [vmem:[#allocation99_spill] sm:$0xff] %v4817_v39  ;;  %v4824_v32 = vld [vmem:[#allocation21] sm:$0xf]  ;;  %v4826_v34 = vld [vmem:[#allocation21 + $0x4] sm:$0xf] }
  0xac   :  { %6091 = vst [vmem:[#allocation100_spill] sm:$0xff] %v4820_v33  ;;  %6092 = vst [vmem:[#allocation101_spill] sm:$0xff] %v4822_v35  ;;  %v4831_v40 = vld [vmem:[#allocation21 + $0x8] sm:$0xf]  ;;  %v4833_v36 = vld [vmem:[#allocation21 + $0xc] sm:$0xf] }
  0xad   :  { %6093 = vst [vmem:[#allocation102_spill] sm:$0xff] %v4824_v32  ;;  %6094 = vst [vmem:[#allocation103_spill] sm:$0xff] %v4826_v34  ;;  %v4835_v38 = vld [vmem:[#allocation21 + $0x10] sm:$0xf]  ;;  %v4837_v42 = vld [vmem:[#allocation21 + $0x14] sm:$0xf] }
  0xae   :  { %6095 = vst [vmem:[#allocation104_spill] sm:$0xff] %v4829_v37  ;;  %6096 = vst [vmem:[#allocation105_spill] sm:$0xff] %v4831_v40  ;;  %v4839_v44 = vld [vmem:[#allocation21 + $0x18] sm:$0xf]  ;;  %v4841_v41 = vld [vmem:[#allocation21 + $0x1c] sm:$0xf] }
  0xaf   :  { %6097 = vst [vmem:[#allocation106_spill] sm:$0xff] %v4833_v36  ;;  %6098 = vst [vmem:[#allocation107_spill] sm:$0xff] %v4835_v38  ;;  %v4843_v43 = vld [vmem:[#allocation21 + $0x20] sm:$0xf]  ;;  %v4845_v32 = vld [vmem:[#allocation21 + $0x24] sm:$0xf] }
  0xb0   :  { %6099 = vst [vmem:[#allocation108_spill] sm:$0xff] %v4837_v42  ;;  %6100 = vst [vmem:[#allocation109_spill] sm:$0xff] %v4839_v44  ;;  %v4847_v34 = vld [vmem:[#allocation21 + $0x28] sm:$0xf]  ;;  %v4849_v46 = vld [vmem:[#allocation21 + $0x2c] sm:$0xf] }
  0xb1   :  { %6101 = vst [vmem:[#allocation110_spill] sm:$0xff] %v4841_v41  ;;  %6102 = vst [vmem:[#allocation111_spill] sm:$0xff] %v4843_v43  ;;  %v4851_v48 = vld [vmem:[#allocation21 + $0x30] sm:$0xf]  ;;  %v4853_v40 = vld [vmem:[#allocation21 + $0x34] sm:$0xf] }
  0xb2   :  { %6103 = vst [vmem:[#allocation112_spill] sm:$0xff] %v4845_v32  ;;  %6104 = vst [vmem:[#allocation113_spill] sm:$0xff] %v4847_v34  ;;  %v4855_v36 = vld [vmem:[#allocation21 + $0x38] sm:$0xf]  ;;  %v4857_v38 = vld [vmem:[#allocation21 + $0x3c] sm:$0xf] }
  0xb3   :  { %6105 = vst [vmem:[#allocation114_spill] sm:$0xff] %v4849_v46  ;;  %6106 = vst [vmem:[#allocation115_spill] sm:$0xff] %v4851_v48  ;;  %v4859_v42 = vld [vmem:[#allocation22] sm:$0xf]  ;;  %v4861_v44 = vld [vmem:[#allocation22 + $0x4] sm:$0xf] }
  0xb4   :  { %6107 = vst [vmem:[#allocation116_spill] sm:$0xff] %v4853_v40  ;;  %6108 = vst [vmem:[#allocation117_spill] sm:$0xff] %v4855_v36  ;;  %v4863_v41 = vld [vmem:[#allocation22 + $0x8] sm:$0xf]  ;;  %v4865_v43 = vld [vmem:[#allocation22 + $0xc] sm:$0xf] }
  0xb5   :  { %6109 = vst [vmem:[#allocation118_spill] sm:$0xff] %v4857_v38  ;;  %6110 = vst [vmem:[#allocation119_spill] sm:$0xff] %v4859_v42  ;;  %v4867_v32 = vld [vmem:[#allocation22 + $0x10] sm:$0xf]  ;;  %v4869_v34 = vld [vmem:[#allocation22 + $0x14] sm:$0xf] }
  0xb6   :  { %6111 = vst [vmem:[#allocation120_spill] sm:$0xff] %v4861_v44  ;;  %6112 = vst [vmem:[#allocation121_spill] sm:$0xff] %v4863_v41  ;;  %v4871_v46 = vld [vmem:[#allocation22 + $0x18] sm:$0xf]  ;;  %v4873_v48 = vld [vmem:[#allocation22 + $0x1c] sm:$0xf] }
  0xb7   :  { %6113 = vst [vmem:[#allocation122_spill] sm:$0xff] %v4865_v43  ;;  %6114 = vst [vmem:[#allocation123_spill] sm:$0xff] %v4867_v32  ;;  %v4875_v40 = vld [vmem:[#allocation22 + $0x20] sm:$0xf]  ;;  %v4877_v36 = vld [vmem:[#allocation22 + $0x24] sm:$0xf] }
  0xb8   :  { %6115 = vst [vmem:[#allocation124_spill] sm:$0xff] %v4869_v34  ;;  %6116 = vst [vmem:[#allocation125_spill] sm:$0xff] %v4871_v46  ;;  %v4879_v38 = vld [vmem:[#allocation22 + $0x28] sm:$0xf]  ;;  %v4881_v42 = vld [vmem:[#allocation22 + $0x2c] sm:$0xf] }
  0xb9   :  { %6117 = vst [vmem:[#allocation126_spill] sm:$0xff] %v4873_v48  ;;  %6118 = vst [vmem:[#allocation127_spill] sm:$0xff] %v4875_v40  ;;  %v4883_v44 = vld [vmem:[#allocation22 + $0x30] sm:$0xf]  ;;  %v4885_v41 = vld [vmem:[#allocation22 + $0x34] sm:$0xf] }
  0xba   :  { %6119 = vst [vmem:[#allocation128_spill] sm:$0xff] %v4877_v36  ;;  %6120 = vst [vmem:[#allocation129_spill] sm:$0xff] %v4879_v38  ;;  %v4887_v43 = vld [vmem:[#allocation22 + $0x38] sm:$0xf]  ;;  %v4889_v32 = vld [vmem:[#allocation22 + $0x3c] sm:$0xf] }
  0xbb   :  { %6121 = vst [vmem:[#allocation130_spill] sm:$0xff] %v4881_v42  ;;  %6122 = vst [vmem:[#allocation131_spill] sm:$0xff] %v4883_v44  ;;  %v4894_v34 = vld [vmem:[%s5885_s16] sm:$0x1]  ;;  %v4911_v36 = vld [vmem:[#allocation15] ss:$0 sm:$0xff]  }
  0xbc   :  { %6123 = vst [vmem:[#allocation132_spill] sm:$0xff] %v4885_v41  ;;  %6124 = vst [vmem:[#allocation133_spill] sm:$0xff] %v4887_v43  ;;  %v4899_v46 = vld [vmem:[%s5886_s17] sm:$0x1]  ;;  %v4913_v38 = vld [vmem:[#allocation10] sm:$0xff]  ;;  %v5909_v41 = vmov 0  }
  0xbd   :  { %6125 = vst [vmem:[#allocation134_spill] sm:$0xff] %v4889_v32  ;;  %6126 = vst [vmem:[#allocation135_spill] sm:$0xff] %v4894_v34  ;;  %v4904_v48 = vld [vmem:[%s5880_s11] ss:$0 sm:$0xff]  ;;  %v279_v42 = vrot.slane %v4913_v38, %v4820_v33  ;;  %667 = vmatprep.mubr.bf16.mxu1 %v5909_v41  ;;  %v4928_v43 = vsub.s32 3, %v4793_v52  ;;  %v4931_v32 = vsub.s32 2, %v4793_v52  ;;  %1009 = vmatprep.mubr.bf16.mxu0 %v5909_v41 }
  0xbe   :  { %6127 = vst [vmem:[#allocation136_spill] sm:$0xff] %v4899_v46  ;;  %6128 = vst [vmem:[#allocation137_spill] sm:$0xff] %v4904_v48  ;;  %v4909_v40 = vld [vmem:[%s5882_s13] ss:$0 sm:$0xff]  ;;  %v3826_v34 = vld [vmem:[#allocation16 + $0xe4] ss:$16 sps:$4 sm:$0xff]   ;;  %v286_v48 = vrot.slane %v4913_v38, %v4829_v37 }
  0xbf   :  { %6129 = vst [vmem:[#allocation138_spill] sm:$0xff] %v4909_v40  ;;  %6130 = vst [vmem:[#allocation139_spill] sm:$0xff] %v4911_v36  ;;  %v4917_v44 = vld [vmem:[#allocation7] sm:$0xff]  ;;  %281 = vbcast.lane.b32.xlu1 %v279_v42, 256  ;;  %v4946_v41 = vld [vmem:[#allocation18 + $0xe4] ss:$16 sps:$4 sm:$0xff]   ;;  %635 = vmatprep.subr.bf16.mxu1 %v3826_v34 }
  0xc0   :  { %v4922_v46 = vld [vmem:[%s5878_s9] sm:$0xf]  ;;  %v211_v40 = vrot.slane %v4917_v44, %v4820_v33  ;;  %6132 = vst [vmem:[#allocation141_spill] sm:$0xff] %v4928_v43  ;;  %6133 = vst [vmem:[#allocation142_spill] sm:$0xff] %v4931_v32  ;;  %v3828_v50 = vld [vmem:[#allocation16 + $0xe0] ss:$16 sps:$4 sm:$0xff]   ;;  %v218_v53 = vrot.slane %v4917_v44, %v4829_v37  ;;  %977 = vmatprep.subr.bf16.mxu0 %v4946_v41  ;;  %v225_v42 = vrot.slane %v4917_v44, %v4931_v32 }
  0xc1   :  { %6131 = vst [vmem:[#allocation140_spill] sm:$0xff] %v4922_v46  ;;  %v3831_v51 = vld [vmem:[#allocation16 + $0xc4] ss:$16 sps:$4 sm:$0xff]   ;;  %v4948_v55 = vld [vmem:[#allocation18 + $0xe0] ss:$16 sps:$4 sm:$0xff]   ;;  %636 = vmatpush1.bf16.msra.mxu1 %v3828_v50  ;;  %v300_v46 = vrot.slane %v4913_v38, %v4928_v43  ;;  %v4997_v63 = vsub.s32 6, %v4793_v52 }
  0xc2   :  { %213 = vbcast.lane.b32.xlu0 %v211_v40, 256  ;;  %v3834_v45 = vld [vmem:[#allocation16 + $0xc0] ss:$16 sps:$4 sm:$0xff]   ;;  %v4950_v47 = vld [vmem:[#allocation18 + $0xc4] ss:$16 sps:$4 sm:$0xff]   ;;  %v232_v40 = vrot.slane %v4917_v44, %v4928_v43  ;;  %637 = vmatprep.subr.bf16.mxu1 %v3831_v51  ;;  %v293_v51 = vrot.slane %v4913_v38, %v4931_v32 }
  0xc3   :  { %288 = vbcast.lane.b32.xlu1 %v286_v48, 256  ;;  %v3837_v49 = vld [vmem:[#allocation16 + $0xa4] ss:$16 sps:$4 sm:$0xff]   ;;  %978 = vmatpush1.bf16.msra.mxu0 %v4948_v55  ;;  %v4958_v34 = vld [vmem:[#allocation18 + $0xc0] ss:$16 sps:$4 sm:$0xff]   ;;  %6137 = vst [vmem:[#allocation146_spill] sm:$0xff] %v4997_v63 }
  0xc4   :  { %979 = vmatprep.subr.bf16.mxu0 %v4950_v47  ;;  %v3840_v50 = vld [vmem:[#allocation16 + $0xa0] ss:$16 sps:$4 sm:$0xff]   ;;  %v4961_v48 = vld [vmem:[#allocation18 + $0xa4] ss:$16 sps:$4 sm:$0xff]   ;;  %v3873_v7 = vld [vmem:[#allocation16 + $0xe8] ss:$16 sps:$4 sm:$0xff]  }
  0xc5   :  { %638 = vmatpush1.bf16.msra.mxu1 %v3834_v45  ;;  %v3843_v57 = vld [vmem:[#allocation16 + $0x84] ss:$16 sps:$4 sm:$0xff]   ;;  %v4971_v45 = vsub.s32 4, %v4793_v52  ;;  %v4974_v54 = vld [vmem:[#allocation18 + $0xa0] ss:$16 sps:$4 sm:$0xff]  }
  0xc6   :  { %220 = vbcast.lane.b32.xlu0 %v218_v53, 256  ;;  %v4966_v53 = vsub.s32 5, %v4793_v52  ;;  %639 = vmatprep.subr.bf16.mxu1 %v3837_v49  ;;  %v4977_v56 = vld [vmem:[#allocation18 + $0x84] ss:$16 sps:$4 sm:$0xff]   ;;  %v4984_v61 = vld [vmem:[#allocation18 + $0x80] ss:$16 sps:$4 sm:$0xff]  }
  0xc7   :  { %234 = vbcast.lane.b32.xlu1 %v232_v40, 256  ;;  %6135 = vst [vmem:[#allocation144_spill] sm:$0xff] %v4971_v45  ;;  %980 = vmatpush1.bf16.msra.mxu0 %v4958_v34  ;;  %v3846_v40 = vld [vmem:[#allocation16 + $0x80] ss:$16 sps:$4 sm:$0xff]   ;;  %v239_v59 = vrot.slane %v4917_v44, %v4971_v45  ;;  %v307_v60 = vrot.slane %v4913_v38, %v4971_v45  ;;  %v3879_v4 = vld [vmem:[#allocation16 + $0xcc] ss:$16 sps:$4 sm:$0xff]  }
  0xc8   :  { %6134 = vst [vmem:[#allocation143_spill] sm:$0xff] %v4966_v53  ;;  %981 = vmatprep.subr.bf16.mxu0 %v4961_v48  ;;  %v246_v49 = vrot.slane %v4917_v44, %v4966_v53  ;;  %v3852_v58 = vld [vmem:[#allocation16 + $0x60] ss:$16 sps:$4 sm:$0xff]   ;;  %v253_v45 = vrot.slane %v4917_v44, %v4997_v63 }
  0xc9   :  { %640 = vmatpush1.bf16.msra.mxu1 %v3840_v50  ;;  %v4987_v50 = vld [vmem:[#allocation18 + $0x64] ss:$16 sps:$4 sm:$0xff]   ;;  %v3864_v35 = vld [vmem:[#allocation16 + $0x20] ss:$16 sps:$4 sm:$0xff]  }
  0xca   :  { %227 = vbcast.lane.b32.xlu0 %v225_v42, 256  ;;  %641 = vmatprep.subr.bf16.mxu1 %v3843_v57  ;;  %v3849_v42 = vld [vmem:[#allocation16 + $0x64] ss:$16 sps:$4 sm:$0xff]   ;;  %v4992_v57 = vsub.s32 7, %v4793_v52  ;;  %v5010_v52 = vld [vmem:[#allocation18 + $0x40] ss:$16 sps:$4 sm:$0xff]  }
  0xcb   :  { %302 = vbcast.lane.b32.xlu1 %v300_v46, 256  ;;  %982 = vmatpush1.bf16.msra.mxu0 %v4974_v54  ;;  %v314_v46 = vrot.slane %v4913_v38, %v4966_v53  ;;  %v5003_v53 = vld [vmem:[#allocation18 + $0x44] ss:$16 sps:$4 sm:$0xff]   ;;  %v3870_v62 = vld [vmem:[#allocation16] ss:$16 sps:$4 sm:$0xff]  }
  0xcc   :  { %983 = vmatprep.subr.bf16.mxu0 %v4977_v56  ;;  %6136 = vst [vmem:[#allocation145_spill] sm:$0xff] %v4992_v57 }
  0xcd   :  { %642 = vmatpush1.bf16.msra.mxu1 %v3846_v40  ;;  %v5000_v40 = vld [vmem:[#allocation18 + $0x60] ss:$16 sps:$4 sm:$0xff]  }
  0xce   :  { %295 = vbcast.lane.b32.xlu0 %v293_v51, 256  ;;  %643 = vmatprep.subr.bf16.mxu1 %v3849_v42  ;;  %v3855_v51 = vld [vmem:[#allocation16 + $0x44] ss:$16 sps:$4 sm:$0xff]  }
  0xcf   :  { %248 = vbcast.lane.b32.xlu1 %v246_v49, 256  ;;  %984 = vmatpush1.bf16.msra.mxu0 %v4984_v61  ;;  %v3858_v49 = vld [vmem:[#allocation16 + $0x40] ss:$16 sps:$4 sm:$0xff]   ;;  %v3861_v42 = vld [vmem:[#allocation16 + $0x24] ss:$16 sps:$4 sm:$0xff]  }
  0xd0   :  { %985 = vmatprep.subr.bf16.mxu0 %v4987_v50 }
  0xd1   :  { %644 = vmatpush1.bf16.msra.mxu1 %v3852_v58  ;;  %v5013_v58 = vld [vmem:[#allocation18 + $0x24] ss:$16 sps:$4 sm:$0xff]  }
  0xd2   :  { %241 = vbcast.lane.b32.xlu0 %v239_v59, 256  ;;  %v260_v59 = vrot.slane %v4917_v44, %v4992_v57  ;;  %645 = vmatprep.subr.bf16.mxu1 %v3855_v51  ;;  %v3867_v51 = vld [vmem:[#allocation16 + $0x4] ss:$16 sps:$4 sm:$0xff]   ;;  %v321_v44 = vrot.slane %v4913_v38, %v4997_v63 }
  0xd3   :  { %316 = vbcast.lane.b32.xlu1 %v314_v46, 256  ;;  %986 = vmatpush1.bf16.msra.mxu0 %v5000_v40  ;;  %v328_v46 = vrot.slane %v4913_v38, %v4992_v57  ;;  %v205_v38 = vld [vmem:[#allocation13] sm:$0x3] }
  0xd4   :  { %987 = vmatprep.subr.bf16.mxu0 %v5003_v53 }
  0xd5   :  { %646 = vmatpush1.bf16.msra.mxu1 %v3858_v49  ;;  %v5023_v49 = vld [vmem:[#allocation18 + $0x4] ss:$16 sps:$4 sm:$0xff]  }
  0xd6   :  { %309 = vbcast.lane.b32.xlu0 %v307_v60, 256  ;;  %647 = vmatprep.subr.bf16.mxu1 %v3861_v42  ;;  %v5019_v60 = vld [vmem:[#allocation18 + $0x20] ss:$16 sps:$4 sm:$0xff]   ;;  %v5053_v42 = vrot.slane %v205_v38, %v4820_v33 }
  0xd7   :  { %262 = vbcast.lane.b32.xlu1 %v260_v59, 256  ;;  %988 = vmatpush1.bf16.msra.mxu0 %v5010_v52  ;;  %v3875_v59 = vld [vmem:[#allocation16 + $0xec] ss:$16 sps:$4 sm:$0xff]  }
  0xd8   :  { %989 = vmatprep.subr.bf16.mxu0 %v5013_v58 }
  0xd9   :  { %648 = vmatpush1.bf16.msra.mxu1 %v3864_v35  ;;  %v6138_v35 = vmov 0  }
  0xda   :  { %255 = vbcast.lane.b32.xlu0 %v253_v45, 256  ;;  %649 = vmatprep.subr.bf16.mxu1 %v3867_v51  ;;  %v5026_v45 = vld [vmem:[#allocation18] ss:$16 sps:$4 sm:$0xff]  }
  0xdb   :  { %330 = vbcast.lane.b32.xlu1 %v328_v46, 256  ;;  %990 = vmatpush1.bf16.msra.mxu0 %v5019_v60 }
  0xdc   :  { %991 = vmatprep.subr.bf16.mxu0 %v5023_v49 }
  0xdd   :  { %650 = vmatpush1.bf16.msra.mxu1 %v3870_v62  ;;  %v5050_v62 = vrot.slane %v205_v38, %v4829_v37 }
  0xde   :  { %323 = vbcast.lane.b32.xlu0 %v321_v44, 256  ;;  %708 = vmatprep.subr.bf16.mxu1 %v3875_v59 }
  0xdf   :  { %992 = vmatpush1.bf16.msra.mxu0 %v5026_v45 }
  0xe0   :  { %1094 = vmatprep.subr.bf16.mxu0 %v4946_v41 }
  0xe2   :  { %1010 = vmatmul.mubr.bf16.vlgmr.msra.gmra.mxu0 %v6138_v35 }
  0xe3   :  { %1095 = vmatpush1.bf16.msra.mxu0 %v4948_v55  ;;  %1126 = vmatprep.mubr.bf16.mxu0 %v6138_v35 }
  0xe4   :  { %1096 = vmatprep.subr.bf16.mxu0 %v4950_v47 }
  0xe7   :  { %1097 = vmatpush1.bf16.msra.mxu0 %v4958_v34 }
  0xe8   :  { %1098 = vmatprep.subr.bf16.mxu0 %v4961_v48 }
  0xeb   :  { %1099 = vmatpush1.bf16.msra.mxu0 %v4974_v54 }
  0xec   :  { %1100 = vmatprep.subr.bf16.mxu0 %v4977_v56 }
  0xef   :  { %1101 = vmatpush1.bf16.msra.mxu0 %v4984_v61 }
  0xf0   :  { %1102 = vmatprep.subr.bf16.mxu0 %v4987_v50 }
  0xf3   :  { %1103 = vmatpush1.bf16.msra.mxu0 %v5000_v40 }
  0xf4   :  { %1104 = vmatprep.subr.bf16.mxu0 %v5003_v53 }
  0xf7   :  { %1105 = vmatpush1.bf16.msra.mxu0 %v5010_v52 }
  0xf8   :  { %1106 = vmatprep.subr.bf16.mxu0 %v5013_v58 }
  0xfb   :  { %1107 = vmatpush1.bf16.msra.mxu0 %v5019_v60 }
  0xfc   :  { %1108 = vmatprep.subr.bf16.mxu0 %v5023_v49 }
  0xff   :  { %1109 = vmatpush1.bf16.msra.mxu0 %v5026_v45 }
 0x100   :  { %1212 = vmatprep.subr.bf16.mxu0 %v4946_v41 }
 0x131   :  { %v282_v46 = vpop.permute.xlu1 %281 }
 0x132   :  { %v336_v51 = vmul.f32 %v5050_v62, %v282_v46 }
 0x134   :  { %v214_v44 = vpop.permute.xlu0 %213 }
 0x135   :  { %v268_v59 = vmul.f32 %v5053_v42, %v214_v44  ;;  %v289_v63 = vpop.permute.xlu1 %288 }
 0x136   :  { %v337_v39 = vmul.f32 %v5050_v62, %v289_v63 }
 0x137   :  { %v344_v57 = vadd.f32 %v336_v51, %v268_v59  ;;  %v3877_v59 = vld [vmem:[#allocation16 + $0xc8] ss:$16 sps:$4 sm:$0xff]  }
 0x138   :  { %v221_v1 = vpop.permute.xlu0 %220 }
 0x139   :  { %352 = vst [vmem:[#allocation2 + $0x30] sm:$0xff] %v344_v57  ;;  %v269_v3 = vmul.f32 %v5053_v42, %v221_v1  ;;  %v235_v2 = vpop.permute.xlu1 %234 }
 0x13a   :  { %v271_v51 = vmul.f32 %v5053_v42, %v235_v2  ;;  %v3880_v2 = vld [vmem:[#allocation16 + $0xa8] ss:$16 sps:$4 sm:$0xff]  }
 0x13b   :  { %v345_v0 = vadd.f32 %v337_v39, %v269_v3 }
 0x13c   :  { %v228_v5 = vpop.permute.xlu0 %227 }
 0x13d   :  { %353 = vst [vmem:[#allocation2] sm:$0xff] %v345_v0  ;;  %v5059_v38 = vpack.c.bf16 %v345_v0, %v344_v57  ;;  %v303_v46 = vpop.permute.xlu1 %302  ;;  %v270_v1 = vmul.f32 %v5053_v42, %v228_v5  ;;  %v3882_v0 = vld [vmem:[#allocation16 + $0xac] ss:$16 sps:$4 sm:$0xff]  }
 0x13e   :  { %v339_v44 = vmul.f32 %v5050_v62, %v303_v46 }
 0x13f   :  { %668 = vmatmul.mubr.bf16.vlgmr.msra.gmra.mxu1 %v5059_v38 }
 0x140   :  { %v296_v63 = vpop.permute.xlu0 %295  ;;  %709 = vmatpush1.bf16.msra.mxu1 %v3873_v7  ;;  %677 = vmatprep.mubr.bf16.mxu1 %v6138_v35  ;;  %v347_v39 = vadd.f32 %v339_v44, %v271_v51  ;;  %v3885_v7 = vld [vmem:[#allocation16 + $0x8c] ss:$16 sps:$4 sm:$0xff]   ;;  %v3883_v51 = vld [vmem:[#allocation16 + $0x88] ss:$16 sps:$4 sm:$0xff]  }
 0x141   :  { %v338_v3 = vmul.f32 %v5050_v62, %v296_v63  ;;  %710 = vmatprep.subr.bf16.mxu1 %v3879_v4  ;;  %v249_v6 = vpop.permute.xlu1 %248 }
 0x142   :  { %355 = vst [vmem:[#allocation2 + $0x10] sm:$0xff] %v347_v39  ;;  %v273_v5 = vmul.f32 %v5053_v42, %v249_v6  ;;  %v3886_v6 = vld [vmem:[#allocation16 + $0x68] ss:$16 sps:$4 sm:$0xff]  }
 0x143   :  { %v346_v57 = vadd.f32 %v338_v3, %v270_v1  ;;  %v3888_v1 = vld [vmem:[#allocation16 + $0x6c] ss:$16 sps:$4 sm:$0xff]  }
 0x144   :  { %v242_v9 = vpop.permute.xlu0 %241  ;;  %711 = vmatpush1.bf16.msra.mxu1 %v3877_v59 }
 0x145   :  { %354 = vst [vmem:[#allocation2 + $0x18] sm:$0xff] %v346_v57  ;;  %712 = vmatprep.subr.bf16.mxu1 %v3882_v0  ;;  %v5067_v46 = vpack.c.bf16 %v347_v39, %v346_v57  ;;  %v317_v11 = vpop.permute.xlu1 %316  ;;  %v272_v44 = vmul.f32 %v5053_v42, %v242_v9 }
 0x146   :  { %v341_v4 = vmul.f32 %v5050_v62, %v317_v11 }
 0x147   :  { %678 = vmatmul.mubr.bf16.gmra.mxu1 %v5067_v46 }
 0x148   :  { %v310_v63 = vpop.permute.xlu0 %309  ;;  %713 = vmatpush1.bf16.msra.mxu1 %v3880_v2  ;;  %687 = vmatprep.mubr.bf16.mxu1 %v6138_v35  ;;  %v349_v3 = vadd.f32 %v341_v4, %v273_v5  ;;  %v3891_v2 = vld [vmem:[#allocation16 + $0x4c] ss:$16 sps:$4 sm:$0xff]  }
 0x149   :  { %v340_v59 = vmul.f32 %v5050_v62, %v310_v63  ;;  %714 = vmatprep.subr.bf16.mxu1 %v3885_v7  ;;  %v263_v39 = vpop.permute.xlu1 %262  ;;  %v3889_v7 = vld [vmem:[#allocation16 + $0x48] ss:$16 sps:$4 sm:$0xff]  }
 0x14a   :  { %357 = vst [vmem:[#allocation2 + $0x20] sm:$0xff] %v349_v3  ;;  %v275_v10 = vmul.f32 %v5053_v42, %v263_v39  ;;  %v5090_v39 = vld [vmem:[#allocation18 + $0xc8] ss:$16 sps:$4 sm:$0xff]  }
 0x14b   :  { %v348_v0 = vadd.f32 %v340_v59, %v272_v44 }
 0x14c   :  { %v256_v57 = vpop.permute.xlu0 %255  ;;  %715 = vmatpush1.bf16.msra.mxu1 %v3883_v51  ;;  %v3894_v51 = vld [vmem:[#allocation16 + $0x2c] ss:$16 sps:$4 sm:$0xff]  }
 0x14d   :  { %356 = vst [vmem:[#allocation2 + $0x8] sm:$0xff] %v348_v0  ;;  %716 = vmatprep.subr.bf16.mxu1 %v3888_v1  ;;  %v452_v11 = vpack.c.bf16 %v349_v3, %v348_v0  ;;  %v331_v8 = vpop.permute.xlu1 %330  ;;  %v274_v5 = vmul.f32 %v5053_v42, %v256_v57  ;;  %v3892_v1 = vld [vmem:[#allocation16 + $0x28] ss:$16 sps:$4 sm:$0xff]   ;;  %v5081_v42 = vld [vmem:[#allocation18 + $0xec] ss:$16 sps:$4 sm:$0xff]  }
 0x14e   :  { %v343_v9 = vmul.f32 %v5050_v62, %v331_v8  ;;  %v3897_v8 = vld [vmem:[#allocation16 + $0xc] ss:$16 sps:$4 sm:$0xff]   ;;  %v3895_v0 = vld [vmem:[#allocation16 + $0x8] ss:$16 sps:$4 sm:$0xff]  }
 0x14f   :  { %688 = vmatmul.mubr.bf16.gmra.mxu1 %v452_v11  ;;  %v5094_v57 = vld [vmem:[#allocation18 + $0xac] ss:$16 sps:$4 sm:$0xff]  }
 0x150   :  { %v324_v63 = vpop.permute.xlu0 %323  ;;  %717 = vmatpush1.bf16.msra.mxu1 %v3886_v6  ;;  %697 = vmatprep.mubr.bf16.mxu1 %v6138_v35  ;;  %v351_v44 = vadd.f32 %v343_v9, %v275_v10  ;;  %v5086_v10 = vld [vmem:[#allocation18 + $0xcc] ss:$16 sps:$4 sm:$0xff]   ;;  %v5097_v6 = vld [vmem:[#allocation18 + $0xa8] ss:$16 sps:$4 sm:$0xff]  }
 0x151   :  { %v342_v4 = vmul.f32 %v5050_v62, %v324_v63  ;;  %718 = vmatprep.subr.bf16.mxu1 %v3891_v2  ;;  %v5083_v62 = vld [vmem:[#allocation18 + $0xe8] ss:$16 sps:$4 sm:$0xff]   ;;  %v5100_v2 = vld [vmem:[#allocation18 + $0x8c] ss:$16 sps:$4 sm:$0xff]  }
 0x152   :  { %359 = vst [vmem:[#allocation2 + $0x38] sm:$0xff] %v351_v44  ;;  %v5108_v9 = vld [vmem:[#allocation18 + $0x6c] ss:$16 sps:$4 sm:$0xff]   ;;  %v5111_v63 = vld [vmem:[#allocation18 + $0x68] ss:$16 sps:$4 sm:$0xff]  }
 0x153   :  { %v350_v59 = vadd.f32 %v342_v4, %v274_v5  ;;  %v5121_v5 = vld [vmem:[#allocation18 + $0x2c] ss:$16 sps:$4 sm:$0xff]   ;;  %v5124_v4 = vld [vmem:[#allocation18 + $0x28] ss:$16 sps:$4 sm:$0xff]  }
 0x154   :  { %719 = vmatpush1.bf16.msra.mxu1 %v3889_v7  ;;  %v5114_v7 = vld [vmem:[#allocation18 + $0x4c] ss:$16 sps:$4 sm:$0xff]  }
 0x155   :  { %358 = vst [vmem:[#allocation2 + $0x28] sm:$0xff] %v350_v59  ;;  %720 = vmatprep.subr.bf16.mxu1 %v3894_v51  ;;  %v453_v3 = vpack.c.bf16 %v351_v44, %v350_v59  ;;  %v5127_v51 = vld [vmem:[#allocation18 + $0xc] ss:$16 sps:$4 sm:$0xff]  }
 0x157   :  { %698 = vmatmul.mubr.bf16.gmra.mxu1 %v453_v3 }
 0x158   :  { %721 = vmatpush1.bf16.msra.mxu1 %v3892_v1  ;;  %740 = vmatprep.mubr.bf16.mxu1 %v6138_v35 }
 0x159   :  { %722 = vmatprep.subr.bf16.mxu1 %v3897_v8  ;;  %v424_v8 = vld [vmem:[%s5876_s7] sm:$0xf] }
 0x15a   :  { %v458_v15 = vrot.slane %v424_v8, %v4820_v33  ;;  %v462_v14 = vrot.slane %v424_v8, %v4829_v37 }
 0x15c   :  { %723 = vmatpush1.bf16.msra.mxu1 %v3895_v0 }
 0x15d   :  { %1018 = vmatprep.subr.bf16.mxu1 %v5081_v42 }
 0x15f   :  { %741 = vmatmul.mubr.bf16.vlgmr.msra.gmra.mxu1 %v5059_v38  ;;  %v5104_v38 = vld [vmem:[#allocation18 + $0x88] ss:$16 sps:$4 sm:$0xff]  }
 0x160   :  { %1019 = vmatpush1.bf16.msra.mxu1 %v5083_v62  ;;  %750 = vmatprep.mubr.bf16.mxu1 %v6138_v35 }
 0x161   :  { %1020 = vmatprep.subr.bf16.mxu1 %v5086_v10 }
 0x164   :  { %1021 = vmatpush1.bf16.msra.mxu1 %v5090_v39 }
 0x165   :  { %1022 = vmatprep.subr.bf16.mxu1 %v5094_v57 }
 0x167   :  { %751 = vmatmul.mubr.bf16.gmra.mxu1 %v5067_v46  ;;  %v5117_v46 = vld [vmem:[#allocation18 + $0x48] ss:$16 sps:$4 sm:$0xff]  }
 0x168   :  { %1023 = vmatpush1.bf16.msra.mxu1 %v5097_v6  ;;  %760 = vmatprep.mubr.bf16.mxu1 %v6138_v35 }
 0x169   :  { %1024 = vmatprep.subr.bf16.mxu1 %v5100_v2 }
 0x16c   :  { %1025 = vmatpush1.bf16.msra.mxu1 %v5104_v38 }
 0x16d   :  { %1026 = vmatprep.subr.bf16.mxu1 %v5108_v9 }
 0x16f   :  { %761 = vmatmul.mubr.bf16.gmra.mxu1 %v452_v11  ;;  %v5130_v11 = vld [vmem:[#allocation18 + $0x8] ss:$16 sps:$4 sm:$0xff]  }
 0x170   :  { %1027 = vmatpush1.bf16.msra.mxu1 %v5111_v63  ;;  %770 = vmatprep.mubr.bf16.mxu1 %v6138_v35 }
 0x171   :  { %1028 = vmatprep.subr.bf16.mxu1 %v5114_v7 }
 0x174   :  { %1029 = vmatpush1.bf16.msra.mxu1 %v5117_v46 }
 0x175   :  { %1030 = vmatprep.subr.bf16.mxu1 %v5121_v5 }
 0x177   :  { %771 = vmatmul.mubr.bf16.gmra.mxu1 %v453_v3 }
 0x178   :  { %1031 = vmatpush1.bf16.msra.mxu1 %v5124_v4  ;;  %1050 = vmatprep.mubr.bf16.mxu1 %v6138_v35 }
 0x179   :  { %1032 = vmatprep.subr.bf16.mxu1 %v5127_v51 }
 0x17c   :  { %1033 = vmatpush1.bf16.msra.mxu1 %v5130_v11 }
 0x17d   :  { %1135 = vmatprep.subr.bf16.mxu1 %v5081_v42 }
 0x17f   :  { %1051 = vmatmul.mubr.bf16.vlgmr.msra.gmra.mxu1 %v6138_v35 }
 0x180   :  { %1136 = vmatpush1.bf16.msra.mxu1 %v5083_v62  ;;  %1167 = vmatprep.mubr.bf16.mxu1 %v6138_v35 }
 0x181   :  { %1137 = vmatprep.subr.bf16.mxu1 %v5086_v10 }
 0x184   :  { %1138 = vmatpush1.bf16.msra.mxu1 %v5090_v39 }
 0x185   :  { %1139 = vmatprep.subr.bf16.mxu1 %v5094_v57 }
 0x188   :  { %1140 = vmatpush1.bf16.msra.mxu1 %v5097_v6 }
 0x189   :  { %1141 = vmatprep.subr.bf16.mxu1 %v5100_v2 }
 0x18c   :  { %1142 = vmatpush1.bf16.msra.mxu1 %v5104_v38 }
 0x18d   :  { %1143 = vmatprep.subr.bf16.mxu1 %v5108_v9 }
 0x190   :  { %1144 = vmatpush1.bf16.msra.mxu1 %v5111_v63 }
 0x191   :  { %1145 = vmatprep.subr.bf16.mxu1 %v5114_v7 }
 0x194   :  { %1146 = vmatpush1.bf16.msra.mxu1 %v5117_v46 }
 0x195   :  { %1147 = vmatprep.subr.bf16.mxu1 %v5121_v5 }
 0x198   :  { %1148 = vmatpush1.bf16.msra.mxu1 %v5124_v4 }
 0x199   :  { %1149 = vmatprep.subr.bf16.mxu1 %v5127_v51 }
 0x19c   :  { %1150 = vmatpush1.bf16.msra.mxu1 %v5130_v11 }
 0x19d   :  { %1253 = vmatprep.subr.bf16.mxu1 %v5081_v42 }
 0x1a2   :  { %v1011_v44 = vpop.f32.mrf.mxu0 }
 0x1a4   :  { %v1013_v59 = vpop.f32.mrf.mxu0 }
 0x1a6   :  { %v1015_v1 = vpop.f32.mrf.mxu0 }
 0x1a8   :  { %v1016_v3 = vpop.f32.mrf.mxu0 }
 0x1ff   :  { %v669_v0 = vpop.f32.mrf.mxu1 }
 0x201   :  { %v671_v13 = vpop.f32.mrf.mxu1 }
 0x202   :  { %v672_v33 = vadd.f32 %v671_v13, %v462_v14 }
 0x203   :  { %v673_v12 = vpop.f32.mrf.mxu1 }
 0x204   :  { %v5159_v17 = vadd.f32 %v673_v12, %v458_v15 }
 0x205   :  { %v675_v19 = vpop.f32.mrf.mxu1 }
 0x206   :  { %v5161_v16 = vadd.f32 %v675_v19, %v462_v14 }
 0x207   :  { %v679_v18 = vpop.f32.mrf.mxu1 }
 0x208   :  { %v5163_v21 = vadd.f32 %v679_v18, %v458_v15 }
 0x209   :  { %v681_v1 = vpop.f32.mrf.mxu1 }
 0x20a   :  { %v5165_v3 = vadd.f32 %v681_v1, %v462_v14 }
 0x20b   :  { %v683_v23 = vpop.f32.mrf.mxu1 }
 0x20c   :  { %v5167_v20 = vadd.f32 %v683_v23, %v458_v15 }
 0x20d   :  { %v685_v22 = vpop.f32.mrf.mxu1 }
 0x20e   :  { %v5169_v25 = vadd.f32 %v685_v22, %v462_v14 }
 0x20f   :  { %v689_v27 = vpop.f32.mrf.mxu1 }
 0x210   :  { %6139 = vst [vmem:[#allocation147_spill] sm:$0xff] %v5169_v25  ;;  %v5171_v29 = vadd.f32 %v689_v27, %v458_v15 }
 0x211   :  { %v691_v12 = vpop.f32.mrf.mxu1 }
 0x212   :  { %6140 = vst [vmem:[#allocation148_spill] sm:$0xff] %v5171_v29  ;;  %v5173_v31 = vadd.f32 %v691_v12, %v462_v14 }
 0x213   :  { %v693_v19 = vpop.f32.mrf.mxu1 }
 0x214   :  { %6141 = vst [vmem:[#allocation149_spill] sm:$0xff] %v5173_v31  ;;  %v5175_v24 = vadd.f32 %v693_v19, %v458_v15  ;;  %v670_v31 = vadd.f32 %v669_v0, %v458_v15 }
 0x215   :  { %v695_v18 = vpop.f32.mrf.mxu1 }
 0x216   :  { %6142 = vst [vmem:[#allocation150_spill] sm:$0xff] %v5175_v24  ;;  %v5177_v26 = vadd.f32 %v695_v18, %v462_v14  ;;  %v466_v24 = vrot.slane %v424_v8, %v4931_v32 }
 0x217   :  { %v699_v1 = vpop.f32.mrf.mxu1 }
 0x218   :  { %6143 = vst [vmem:[#allocation151_spill] sm:$0xff] %v5177_v26  ;;  %v5179_v28 = vadd.f32 %v699_v1, %v458_v15  ;;  %v470_v26 = vrot.slane %v424_v8, %v4928_v43  ;;  %v1060_v1 = vadd.f32 %v1013_v59, %v672_v33 }
 0x219   :  { %v701_v23 = vpop.f32.mrf.mxu1 }
 0x21a   :  { %6144 = vst [vmem:[#allocation152_spill] sm:$0xff] %v5179_v28  ;;  %v5181_v30 = vadd.f32 %v701_v23, %v462_v14  ;;  %v1059_v23 = vadd.f32 %v1011_v44, %v670_v31 }
 0x21b   :  { %v703_v22 = vpop.f32.mrf.mxu1 }
 0x21c   :  { %6145 = vst [vmem:[#allocation153_spill] sm:$0xff] %v5181_v30  ;;  %v5183_v36 = vadd.f32 %v703_v22, %v458_v15 }
 0x21d   :  { %v705_v27 = vpop.f32.mrf.mxu1 }
 0x21e   :  { %6146 = vst [vmem:[#allocation154_spill] sm:$0xff] %v5183_v36  ;;  %v5185_v37 = vadd.f32 %v705_v27, %v462_v14  ;;  %v3529_v36 = vmul.f32 -1.442695, %v1060_v1 }
 0x21f   :  { %v742_v12 = vpop.f32.mrf.mxu1 }
 0x220   :  { %6147 = vst [vmem:[#allocation155_spill] sm:$0xff] %v5185_v37  ;;  %v3528_v37 = vmul.f32 -1.442695, %v1059_v23  ;;  %3950 = vpow2.f32 %v3529_v36 }
 0x221   :  { %v744_v19 = vpop.f32.mrf.mxu1 }
 0x222   :  { %3952 = vpow2.f32 %v3528_v37 }
 0x223   :  { %v746_v18 = vpop.f32.mrf.mxu1 }
 0x224   :  { %v5189_v28 = vadd.f32 %v746_v18, %v466_v24 }
 0x225   :  { %v748_v30 = vpop.f32.mrf.mxu1 }
 0x226   :  { %v5191_v29 = vadd.f32 %v748_v30, %v470_v26 }
 0x227   :  { %v752_v22 = vpop.f32.mrf.mxu1 }
 0x228   :  { %v5193_v27 = vadd.f32 %v752_v22, %v466_v24 }
 0x229   :  { %v754_v13 = vpop.f32.mrf.mxu1 }
 0x22a   :  { %v5195_v14 = vadd.f32 %v754_v13, %v470_v26 }
 0x22b   :  { %v756_v15 = vpop.f32.mrf.mxu1 }
 0x22c   :  { %v5197_v0 = vadd.f32 %v756_v15, %v466_v24 }
 0x22d   :  { %v758_v33 = vpop.f32.mrf.mxu1  ;;  %v3951_v15 = vpop.eup %3950 }
 0x22e   :  { %6148 = vst [vmem:[#allocation156_spill] sm:$0xff] %v5197_v0  ;;  %v5199_v59 = vadd.f32 %v758_v33, %v470_v26  ;;  %v743_v0 = vadd.f32 %v742_v12, %v466_v24 }
 0x22f   :  { %v762_v31 = vpop.f32.mrf.mxu1  ;;  %v3953_v32 = vpop.eup %3952 }
 0x230   :  { %6149 = vst [vmem:[#allocation157_spill] sm:$0xff] %v5199_v59  ;;  %v5201_v44 = vadd.f32 %v762_v31, %v466_v24  ;;  %v1072_v31 = vadd.f32 1.0, %v3951_v15 }
 0x231   :  { %v764_v30 = vpop.f32.mrf.mxu1 }
 0x232   :  { %6150 = vst [vmem:[#allocation158_spill] sm:$0xff] %v5201_v44  ;;  %v5203_v8 = vadd.f32 %v764_v30, %v470_v26  ;;  %v1066_v30 = vadd.f32 1.0, %v3953_v32  ;;  %3954 = vrcp.f32 %v1072_v31 }
 0x233   :  { %v766_v18 = vpop.f32.mrf.mxu1 }
 0x234   :  { %6151 = vst [vmem:[#allocation159_spill] sm:$0xff] %v5203_v8  ;;  %v5205_v1 = vadd.f32 %v766_v18, %v466_v24  ;;  %3956 = vrcp.f32 %v1066_v30 }
 0x235   :  { %v768_v23 = vpop.f32.mrf.mxu1 }
 0x236   :  { %6152 = vst [vmem:[#allocation160_spill] sm:$0xff] %v5205_v1  ;;  %v5207_v22 = vadd.f32 %v768_v23, %v470_v26  ;;  %v745_v23 = vadd.f32 %v744_v19, %v470_v26 }
 0x237   :  { %v772_v13 = vpop.f32.mrf.mxu1 }
 0x238   :  { %6153 = vst [vmem:[#allocation161_spill] sm:$0xff] %v5207_v22  ;;  %v5209_v36 = vadd.f32 %v772_v13, %v466_v24 }
 0x239   :  { %v774_v37 = vpop.f32.mrf.mxu1 }
 0x23a   :  { %6154 = vst [vmem:[#allocation162_spill] sm:$0xff] %v5209_v36  ;;  %v5211_v33 = vadd.f32 %v774_v37, %v470_v26 }
 0x23b   :  { %v776_v43 = vpop.f32.mrf.mxu1 }
 0x23c   :  { %6155 = vst [vmem:[#allocation163_spill] sm:$0xff] %v5211_v33  ;;  %v5213_v44 = vadd.f32 %v776_v43, %v466_v24 }
 0x23d   :  { %v778_v8 = vpop.f32.mrf.mxu1 }
 0x23e   :  { %6156 = vst [vmem:[#allocation164_spill] sm:$0xff] %v5213_v44  ;;  %v5215_v18 = vadd.f32 %v778_v8, %v470_v26 }
 0x23f   :  { %v1052_v1 = vpop.f32.mrf.mxu1  ;;  %v3955_v15 = vpop.eup %3954 }
 0x240   :  { %v1061_v22 = vadd.f32 %v1052_v1, %v743_v0  ;;  %v1082_v32 = vmul.f32 0.0, %v3955_v15 }
 0x241   :  { %v1054_v13 = vpop.f32.mrf.mxu1  ;;  %v3957_v43 = vpop.eup %3956 }
 0x242   :  { %3958 = vtanh.f32 %v1061_v22  ;;  %v1062_v36 = vadd.f32 %v1054_v13, %v745_v23 }
 0x243   :  { %v1056_v59 = vpop.f32.mrf.mxu1 }
 0x244   :  { %v3530_v37 = vmul.f32 -1.442695, %v1062_v36 }
 0x245   :  { %v1057_v33 = vpop.f32.mrf.mxu1 }
 0x246   :  { %3960 = vpow2.f32 %v3530_v37 }
 0x24f   :  { %v3959_v44 = vpop.eup %3958 }
 0x250   :  { %v1083_v25 = vmul.f32 %v3959_v44, %v3957_v43 }
 0x252   :  { %v5217_v24 = vadd.f32 %v1083_v25, %v1082_v32 }
 0x253   :  { %v3961_v12 = vpop.eup %3960 }
 0x254   :  { %v1079_v8 = vadd.f32 1.0, %v3961_v12  ;;  %3962 = vtanh.f32 %v5217_v24 }
 0x256   :  { %3964 = vrcp.f32 %v1079_v8 }
 0x261   :  { %v3963_v26 = vpop.eup %3962 }
 0x263   :  { %v3965_v19 = vpop.eup %3964 }
 0x264   :  { %v1086_v0 = vmul.f32 %v3965_v19, %v3963_v26 }
 0x266   :  { %v1087_v1 = vpack.c.bf16 %v1086_v0, %v1086_v0 }
 0x268   :  { %1088 = vst [vmem:[#allocation6] sm:$0xf] %v1087_v1  ;;  %1127 = vmatmul.mubr.bf16.vlgmr.msra.gmra.mxu0 %v1087_v1  ;;  %1168 = vmatmul.mubr.bf16.vlgmr.msra.gmra.mxu1 %v1087_v1 }
 0x269   :  { %1213 = vmatpush1.bf16.msra.mxu0 %v4948_v55  ;;  %1254 = vmatpush1.bf16.msra.mxu1 %v5083_v62 }
 0x26a   :  { %1214 = vmatprep.subr.bf16.mxu0 %v4950_v47  ;;  %1255 = vmatprep.subr.bf16.mxu1 %v5086_v10 }
 0x26b   :  { %1244 = vmatprep.mubr.bf16.mxu0 %v6138_v35  ;;  %1285 = vmatprep.mubr.bf16.mxu1 %v6138_v35 }
 0x26d   :  { %1215 = vmatpush1.bf16.msra.mxu0 %v4958_v34  ;;  %1256 = vmatpush1.bf16.msra.mxu1 %v5090_v39 }
 0x26e   :  { %1216 = vmatprep.subr.bf16.mxu0 %v4961_v48  ;;  %1257 = vmatprep.subr.bf16.mxu1 %v5094_v57 }
 0x271   :  { %1217 = vmatpush1.bf16.msra.mxu0 %v4974_v54  ;;  %1258 = vmatpush1.bf16.msra.mxu1 %v5097_v6 }
 0x272   :  { %1218 = vmatprep.subr.bf16.mxu0 %v4977_v56  ;;  %1259 = vmatprep.subr.bf16.mxu1 %v5100_v2 }
 0x275   :  { %1219 = vmatpush1.bf16.msra.mxu0 %v4984_v61  ;;  %1260 = vmatpush1.bf16.msra.mxu1 %v5104_v38 }
 0x276   :  { %1220 = vmatprep.subr.bf16.mxu0 %v4987_v50  ;;  %1261 = vmatprep.subr.bf16.mxu1 %v5108_v9 }
 0x279   :  { %1221 = vmatpush1.bf16.msra.mxu0 %v5000_v40  ;;  %1262 = vmatpush1.bf16.msra.mxu1 %v5111_v63 }
 0x27a   :  { %1222 = vmatprep.subr.bf16.mxu0 %v5003_v53  ;;  %1263 = vmatprep.subr.bf16.mxu1 %v5114_v7 }
 0x27d   :  { %1223 = vmatpush1.bf16.msra.mxu0 %v5010_v52  ;;  %1264 = vmatpush1.bf16.msra.mxu1 %v5117_v46 }
 0x27e   :  { %1224 = vmatprep.subr.bf16.mxu0 %v5013_v58  ;;  %1265 = vmatprep.subr.bf16.mxu1 %v5121_v5 }
 0x281   :  { %1225 = vmatpush1.bf16.msra.mxu0 %v5019_v60  ;;  %1266 = vmatpush1.bf16.msra.mxu1 %v5124_v4 }
 0x282   :  { %1226 = vmatprep.subr.bf16.mxu0 %v5023_v49  ;;  %1267 = vmatprep.subr.bf16.mxu1 %v5127_v51 }
 0x285   :  { %1227 = vmatpush1.bf16.msra.mxu0 %v5026_v45  ;;  %1268 = vmatpush1.bf16.msra.mxu1 %v5130_v11 }
 0x286   :  { %1330 = vmatprep.subr.bf16.mxu0 %v4946_v41  ;;  %1371 = vmatprep.subr.bf16.mxu1 %v5081_v42 }
 0x328   :  { %v1128_v25 = vpop.f32.mrf.mxu0  ;;  %v1169_v47 = vpop.f32.mrf.mxu1 }
 0x329   :  { %v1176_v55 = vadd.f32 %v1128_v25, %v5159_v17  ;;  %v1178_v13 = vadd.f32 %v1169_v47, %v5189_v28 }
 0x32a   :  { %v1130_v34 = vpop.f32.mrf.mxu0  ;;  %v1171_v59 = vpop.f32.mrf.mxu1 }
 0x32b   :  { %v3531_v44 = vmul.f32 -1.442695, %v1176_v55  ;;  %v1177_v22 = vadd.f32 %v1130_v34, %v5161_v16  ;;  %v1179_v41 = vadd.f32 %v1171_v59, %v5191_v29  ;;  %v5262_v34 = vld [vmem:[#allocation18 + $0xe0] ss:$16 sps:$4 sm:$0xff]   ;;  %v5266_v59 = vld [vmem:[#allocation18 + $0xc4] ss:$16 sps:$4 sm:$0xff]  }
 0x32c   :  { %v1132_v36 = vpop.f32.mrf.mxu0  ;;  %v1173_v33 = vpop.f32.mrf.mxu1 }
 0x32d   :  { %3966 = vpow2.f32 %v3531_v44  ;;  %v3532_v31 = vmul.f32 -1.442695, %v1177_v22  ;;  %v3533_v37 = vmul.f32 -1.442695, %v1179_v41 }
 0x32e   :  { %v1133_v30 = vpop.f32.mrf.mxu0  ;;  %v1174_v23 = vpop.f32.mrf.mxu1 }
 0x32f   :  { %3968 = vpow2.f32 %v3532_v31 }
 0x330   :  { %3970 = vtanh.f32 %v1178_v13 }
 0x331   :  { %3972 = vpow2.f32 %v3533_v37 }
 0x33a   :  { %v3967_v15 = vpop.eup %3966 }
 0x33b   :  { %v1183_v43 = vadd.f32 1.0, %v3967_v15 }
 0x33c   :  { %v3969_v17 = vpop.eup %3968 }
 0x33d   :  { %3974 = vrcp.f32 %v1183_v43  ;;  %v1189_v32 = vadd.f32 1.0, %v3969_v17  ;;  %v3971_v16 = vpop.eup %3970 }
 0x33e   :  { %v3973_v12 = vpop.eup %3972 }
 0x33f   :  { %3976 = vrcp.f32 %v1189_v32  ;;  %v1196_v0 = vadd.f32 1.0, %v3973_v12 }
 0x341   :  { %3978 = vrcp.f32 %v1196_v0  ;;  %v5328_v0 = vld [vmem:[#allocation18 + $0x84] ss:$16 sps:$4 sm:$0xff]  }
 0x34a   :  { %v3975_v8 = vpop.eup %3974 }
 0x34b   :  { %v1200_v26 = vmul.f32 %v3975_v8, %v3971_v16 }
 0x34c   :  { %v3977_v19 = vpop.eup %3976 }
 0x34d   :  { %v1199_v1 = vmul.f32 %v3977_v19, %v5217_v24  ;;  %v5272_v24 = vld [vmem:[#allocation18 + $0xc0] ss:$16 sps:$4 sm:$0xff]  }
 0x34e   :  { %v3979_v28 = vpop.eup %3978  ;;  %v5324_v19 = vld [vmem:[#allocation18 + $0xa0] ss:$16 sps:$4 sm:$0xff]  }
 0x34f   :  { %v5259_v29 = vadd.f32 %v1200_v26, %v1199_v1  ;;  %v5320_v26 = vld [vmem:[#allocation18 + $0xa4] ss:$16 sps:$4 sm:$0xff]   ;;  %v5332_v1 = vld [vmem:[#allocation18 + $0x80] ss:$16 sps:$4 sm:$0xff]  }
 0x351   :  { %3980 = vtanh.f32 %v5259_v29 }
 0x35e   :  { %v3981_v25 = vpop.eup %3980 }
 0x35f   :  { %v1203_v47 = vmul.f32 %v3981_v25, %v3979_v28  ;;  %v5340_v28 = vld [vmem:[#allocation18 + $0x60] ss:$16 sps:$4 sm:$0xff]   ;;  %v5344_v25 = vld [vmem:[#allocation18 + $0x44] ss:$16 sps:$4 sm:$0xff]  }
 0x361   :  { %v1204_v55 = vpack.c.bf16 %v1203_v47, %v1203_v47  ;;  %v5348_v47 = vld [vmem:[#allocation18 + $0x40] ss:$16 sps:$4 sm:$0xff]  }
 0x363   :  { %1206 = vst [vmem:[#allocation6 + $0x4] sm:$0xf] %v1204_v55  ;;  %1245 = vmatmul.mubr.bf16.vlgmr.msra.gmra.mxu0 %v1204_v55  ;;  %1286 = vmatmul.mubr.bf16.vlgmr.msra.gmra.mxu1 %v1204_v55  ;;  %v5352_v55 = vld [vmem:[#allocation18 + $0x24] ss:$16 sps:$4 sm:$0xff]  }
 0x364   :  { %1331 = vmatpush1.bf16.msra.mxu0 %v5262_v34  ;;  %1372 = vmatpush1.bf16.msra.mxu1 %v5083_v62 }
 0x365   :  { %1332 = vmatprep.subr.bf16.mxu0 %v5266_v59  ;;  %1373 = vmatprep.subr.bf16.mxu1 %v5086_v10 }
 0x366   :  { %1362 = vmatprep.mubr.bf16.mxu0 %v6138_v35  ;;  %1403 = vmatprep.mubr.bf16.mxu1 %v6138_v35 }
 0x368   :  { %1333 = vmatpush1.bf16.msra.mxu0 %v5272_v24  ;;  %1374 = vmatpush1.bf16.msra.mxu1 %v5090_v39 }
 0x369   :  { %1334 = vmatprep.subr.bf16.mxu0 %v4961_v48  ;;  %1375 = vmatprep.subr.bf16.mxu1 %v5094_v57 }
 0x36c   :  { %1335 = vmatpush1.bf16.msra.mxu0 %v4974_v54  ;;  %1376 = vmatpush1.bf16.msra.mxu1 %v5097_v6  ;;  %v5300_v54 = vld [vmem:[#allocation18 + $0xe4] ss:$16 sps:$4 sm:$0xff]  }
 0x36d   :  { %1336 = vmatprep.subr.bf16.mxu0 %v4977_v56  ;;  %1377 = vmatprep.subr.bf16.mxu1 %v5100_v2 }
 0x370   :  { %1337 = vmatpush1.bf16.msra.mxu0 %v4984_v61  ;;  %1378 = vmatpush1.bf16.msra.mxu1 %v5104_v38 }
 0x371   :  { %1338 = vmatprep.subr.bf16.mxu0 %v4987_v50  ;;  %1379 = vmatprep.subr.bf16.mxu1 %v5108_v9 }
 0x374   :  { %1339 = vmatpush1.bf16.msra.mxu0 %v5000_v40  ;;  %1380 = vmatpush1.bf16.msra.mxu1 %v5111_v63 }
 0x375   :  { %1340 = vmatprep.subr.bf16.mxu0 %v5003_v53  ;;  %1381 = vmatprep.subr.bf16.mxu1 %v5114_v7 }
 0x378   :  { %1341 = vmatpush1.bf16.msra.mxu0 %v5010_v52  ;;  %1382 = vmatpush1.bf16.msra.mxu1 %v5117_v46 }
 0x379   :  { %1342 = vmatprep.subr.bf16.mxu0 %v5013_v58  ;;  %1383 = vmatprep.subr.bf16.mxu1 %v5121_v5 }
 0x37c   :  { %1343 = vmatpush1.bf16.msra.mxu0 %v5019_v60  ;;  %1384 = vmatpush1.bf16.msra.mxu1 %v5124_v4 }
 0x37d   :  { %1344 = vmatprep.subr.bf16.mxu0 %v5023_v49  ;;  %1385 = vmatprep.subr.bf16.mxu1 %v5127_v51 }
 0x380   :  { %1345 = vmatpush1.bf16.msra.mxu0 %v5026_v45  ;;  %1386 = vmatpush1.bf16.msra.mxu1 %v5130_v11 }
 0x381   :  { %1448 = vmatprep.subr.bf16.mxu0 %v5300_v54  ;;  %1489 = vmatprep.subr.bf16.mxu1 %v5081_v42 }
 0x423   :  { %v1246_v52 = vpop.f32.mrf.mxu0  ;;  %v1287_v56 = vpop.f32.mrf.mxu1 }
 0x424   :  { %v1294_v61 = vadd.f32 %v1246_v52, %v5163_v21  ;;  %v1296_v33 = vadd.f32 %v1287_v56, %v5193_v27  ;;  %v5356_v52 = vld [vmem:[#allocation18 + $0x20] ss:$16 sps:$4 sm:$0xff]   ;;  %v5360_v56 = vld [vmem:[#allocation18 + $0x4] ss:$16 sps:$4 sm:$0xff]  }
 0x425   :  { %v1248_v48 = vpop.f32.mrf.mxu0  ;;  %v1289_v53 = vpop.f32.mrf.mxu1 }
 0x426   :  { %v3534_v50 = vmul.f32 -1.442695, %v1294_v61  ;;  %v1295_v40 = vadd.f32 %v1248_v48, %v5165_v3  ;;  %v1297_v36 = vadd.f32 %v1289_v53, %v5195_v14 }
 0x427   :  { %v1250_v58 = vpop.f32.mrf.mxu0  ;;  %v1291_v60 = vpop.f32.mrf.mxu1 }
 0x428   :  { %3982 = vpow2.f32 %v3534_v50  ;;  %v3535_v49 = vmul.f32 -1.442695, %v1295_v40  ;;  %v3536_v31 = vmul.f32 -1.442695, %v1297_v36  ;;  %v6157_v60 = vld [vmem:[#allocation147_spill] sm:$0xff] }
 0x429   :  { %v1251_v44 = vpop.f32.mrf.mxu0  ;;  %v1292_v22 = vpop.f32.mrf.mxu1 }
 0x42a   :  { %3984 = vpow2.f32 %v3535_v49 }
 0x42b   :  { %3986 = vtanh.f32 %v1296_v33 }
 0x42c   :  { %3988 = vpow2.f32 %v3536_v31  ;;  %v6158_v31 = vld [vmem:[#allocation157_spill] sm:$0xff] }
 0x435   :  { %v3983_v30 = vpop.eup %3982 }
 0x436   :  { %v1301_v23 = vadd.f32 1.0, %v3983_v30 }
 0x437   :  { %v3985_v21 = vpop.eup %3984 }
 0x438   :  { %3990 = vrcp.f32 %v1301_v23  ;;  %v1307_v41 = vadd.f32 1.0, %v3985_v21  ;;  %v3987_v3 = vpop.eup %3986  ;;  %v6159_v23 = vld [vmem:[#allocation156_spill] sm:$0xff] }
 0x439   :  { %v3989_v13 = vpop.eup %3988 }
 0x43a   :  { %3992 = vrcp.f32 %v1307_v41  ;;  %v1314_v17 = vadd.f32 1.0, %v3989_v13 }
 0x43c   :  { %3994 = vrcp.f32 %v1314_v17 }
 0x445   :  { %v3991_v37 = vpop.eup %3990 }
 0x446   :  { %v1318_v15 = vmul.f32 %v3991_v37, %v3987_v3 }
 0x447   :  { %v3993_v43 = vpop.eup %3992 }
 0x448   :  { %v1317_v32 = vmul.f32 %v3993_v43, %v5259_v29  ;;  %v5336_v29 = vld [vmem:[#allocation18 + $0x64] ss:$16 sps:$4 sm:$0xff]  }
 0x449   :  { %v3995_v27 = vpop.eup %3994 }
 0x44a   :  { %v5309_v14 = vadd.f32 %v1318_v15, %v1317_v32 }
 0x44c   :  { %3996 = vtanh.f32 %v5309_v14 }
 0x459   :  { %v3997_v16 = vpop.eup %3996 }
 0x45a   :  { %v1321_v12 = vmul.f32 %v3997_v16, %v3995_v27 }
 0x45c   :  { %v1322_v8 = vpack.c.bf16 %v1321_v12, %v1321_v12 }
 0x45e   :  { %1324 = vst [vmem:[#allocation6 + $0x8] sm:$0xf] %v1322_v8  ;;  %1363 = vmatmul.mubr.bf16.vlgmr.msra.gmra.mxu0 %v1322_v8  ;;  %1404 = vmatmul.mubr.bf16.vlgmr.msra.gmra.mxu1 %v1322_v8 }
 0x45f   :  { %1449 = vmatpush1.bf16.msra.mxu0 %v5262_v34  ;;  %1490 = vmatpush1.bf16.msra.mxu1 %v5083_v62 }
 0x460   :  { %1450 = vmatprep.subr.bf16.mxu0 %v5266_v59  ;;  %1491 = vmatprep.subr.bf16.mxu1 %v5086_v10 }
 0x461   :  { %1480 = vmatprep.mubr.bf16.mxu0 %v6138_v35  ;;  %1521 = vmatprep.mubr.bf16.mxu1 %v6138_v35 }
 0x463   :  { %1451 = vmatpush1.bf16.msra.mxu0 %v5272_v24  ;;  %1492 = vmatpush1.bf16.msra.mxu1 %v5090_v39 }
 0x464   :  { %1452 = vmatprep.subr.bf16.mxu0 %v5320_v26  ;;  %1493 = vmatprep.subr.bf16.mxu1 %v5094_v57 }
 0x467   :  { %1453 = vmatpush1.bf16.msra.mxu0 %v5324_v19  ;;  %1494 = vmatpush1.bf16.msra.mxu1 %v5097_v6 }
 0x468   :  { %1454 = vmatprep.subr.bf16.mxu0 %v5328_v0  ;;  %1495 = vmatprep.subr.bf16.mxu1 %v5100_v2 }
 0x46b   :  { %1455 = vmatpush1.bf16.msra.mxu0 %v5332_v1  ;;  %1496 = vmatpush1.bf16.msra.mxu1 %v5104_v38 }
 0x46c   :  { %1456 = vmatprep.subr.bf16.mxu0 %v5336_v29  ;;  %1497 = vmatprep.subr.bf16.mxu1 %v5108_v9 }
 0x46f   :  { %1457 = vmatpush1.bf16.msra.mxu0 %v5340_v28  ;;  %1498 = vmatpush1.bf16.msra.mxu1 %v5111_v63 }
 0x470   :  { %1458 = vmatprep.subr.bf16.mxu0 %v5344_v25  ;;  %1499 = vmatprep.subr.bf16.mxu1 %v5114_v7 }
 0x473   :  { %1459 = vmatpush1.bf16.msra.mxu0 %v5348_v47  ;;  %1500 = vmatpush1.bf16.msra.mxu1 %v5117_v46 }
 0x474   :  { %1460 = vmatprep.subr.bf16.mxu0 %v5352_v55  ;;  %1501 = vmatprep.subr.bf16.mxu1 %v5121_v5 }
 0x477   :  { %1461 = vmatpush1.bf16.msra.mxu0 %v5356_v52  ;;  %1502 = vmatpush1.bf16.msra.mxu1 %v5124_v4 }
 0x478   :  { %1462 = vmatprep.subr.bf16.mxu0 %v5360_v56  ;;  %1503 = vmatprep.subr.bf16.mxu1 %v5127_v51 }
 0x47b   :  { %1463 = vmatpush1.bf16.msra.mxu0 %v5026_v45  ;;  %1504 = vmatpush1.bf16.msra.mxu1 %v5130_v11 }
 0x47c   :  { %1566 = vmatprep.subr.bf16.mxu0 %v5300_v54  ;;  %1607 = vmatprep.subr.bf16.mxu1 %v5081_v42 }
 0x51e   :  { %v1364_v61 = vpop.f32.mrf.mxu0  ;;  %v1405_v48 = vpop.f32.mrf.mxu1 }
 0x51f   :  { %v1412_v53 = vadd.f32 %v1364_v61, %v5167_v20  ;;  %v1414_v21 = vadd.f32 %v1405_v48, %v6159_v23 }
 0x520   :  { %v1366_v50 = vpop.f32.mrf.mxu0  ;;  %v1407_v40 = vpop.f32.mrf.mxu1 }
 0x521   :  { %v3537_v58 = vmul.f32 -1.442695, %v1412_v53  ;;  %v1413_v49 = vadd.f32 %v1366_v50, %v6157_v60  ;;  %v1415_v30 = vadd.f32 %v1407_v40, %v6158_v31  ;;  %v6160_v60 = vld [vmem:[#allocation148_spill] sm:$0xff] }
 0x522   :  { %v1368_v44 = vpop.f32.mrf.mxu0  ;;  %v1409_v22 = vpop.f32.mrf.mxu1 }
 0x523   :  { %3998 = vpow2.f32 %v3537_v58  ;;  %v3538_v36 = vmul.f32 -1.442695, %v1413_v49  ;;  %v3539_v41 = vmul.f32 -1.442695, %v1415_v30 }
 0x524   :  { %v1369_v45 = vpop.f32.mrf.mxu0  ;;  %v1410_v33 = vpop.f32.mrf.mxu1 }
 0x525   :  { %4000 = vpow2.f32 %v3538_v36  ;;  %v6161_v45 = vld [vmem:[#allocation149_spill] sm:$0xff] }
 0x526   :  { %4002 = vtanh.f32 %v1414_v21 }
 0x527   :  { %4004 = vpow2.f32 %v3539_v41 }
 0x530   :  { %v3999_v3 = vpop.eup %3998 }
 0x531   :  { %v1419_v13 = vadd.f32 1.0, %v3999_v3  ;;  %v6162_v3 = vld [vmem:[#allocation159_spill] sm:$0xff] }
 0x532   :  { %v4001_v20 = vpop.eup %4000 }
 0x533   :  { %4006 = vrcp.f32 %v1419_v13  ;;  %v1425_v37 = vadd.f32 1.0, %v4001_v20  ;;  %v4003_v15 = vpop.eup %4002  ;;  %v6163_v20 = vld [vmem:[#allocation158_spill] sm:$0xff] }
 0x534   :  { %v4005_v43 = vpop.eup %4004 }
 0x535   :  { %4008 = vrcp.f32 %v1425_v37  ;;  %v1432_v16 = vadd.f32 1.0, %v4005_v43 }
 0x537   :  { %4010 = vrcp.f32 %v1432_v16 }
 0x540   :  { %v4007_v17 = vpop.eup %4006 }
 0x541   :  { %v1436_v32 = vmul.f32 %v4007_v17, %v4003_v15 }
 0x542   :  { %v4009_v27 = vpop.eup %4008 }
 0x543   :  { %v1435_v12 = vmul.f32 %v4009_v27, %v5309_v14  ;;  %v5406_v14 = vld [vmem:[#allocation18] ss:$16 sps:$4 sm:$0xff]  }
 0x544   :  { %v4011_v61 = vpop.eup %4010 }
 0x545   :  { %v5373_v8 = vadd.f32 %v1436_v32, %v1435_v12 }
 0x547   :  { %4012 = vtanh.f32 %v5373_v8 }
 0x554   :  { %v4013_v48 = vpop.eup %4012 }
 0x555   :  { %v1439_v53 = vmul.f32 %v4013_v48, %v4011_v61 }
 0x557   :  { %v1440_v50 = vpack.c.bf16 %v1439_v53, %v1439_v53 }
 0x559   :  { %1442 = vst [vmem:[#allocation6 + $0xc] sm:$0xf] %v1440_v50  ;;  %1481 = vmatmul.mubr.bf16.vlgmr.msra.gmra.mxu0 %v1440_v50  ;;  %1522 = vmatmul.mubr.bf16.vlgmr.msra.gmra.mxu1 %v1440_v50 }
 0x55a   :  { %1567 = vmatpush1.bf16.msra.mxu0 %v5262_v34  ;;  %1608 = vmatpush1.bf16.msra.mxu1 %v5083_v62 }
 0x55b   :  { %1568 = vmatprep.subr.bf16.mxu0 %v5266_v59  ;;  %1609 = vmatprep.subr.bf16.mxu1 %v5086_v10 }
 0x55c   :  { %1598 = vmatprep.mubr.bf16.mxu0 %v6138_v35  ;;  %1639 = vmatprep.mubr.bf16.mxu1 %v6138_v35 }
 0x55e   :  { %1569 = vmatpush1.bf16.msra.mxu0 %v5272_v24  ;;  %1610 = vmatpush1.bf16.msra.mxu1 %v5090_v39 }
 0x55f   :  { %1570 = vmatprep.subr.bf16.mxu0 %v5320_v26  ;;  %1611 = vmatprep.subr.bf16.mxu1 %v5094_v57 }
 0x562   :  { %1571 = vmatpush1.bf16.msra.mxu0 %v5324_v19  ;;  %1612 = vmatpush1.bf16.msra.mxu1 %v5097_v6 }
 0x563   :  { %1572 = vmatprep.subr.bf16.mxu0 %v5328_v0  ;;  %1613 = vmatprep.subr.bf16.mxu1 %v5100_v2 }
 0x566   :  { %1573 = vmatpush1.bf16.msra.mxu0 %v5332_v1  ;;  %1614 = vmatpush1.bf16.msra.mxu1 %v5104_v38 }
 0x567   :  { %1574 = vmatprep.subr.bf16.mxu0 %v5336_v29  ;;  %1615 = vmatprep.subr.bf16.mxu1 %v5108_v9 }
 0x56a   :  { %1575 = vmatpush1.bf16.msra.mxu0 %v5340_v28  ;;  %1616 = vmatpush1.bf16.msra.mxu1 %v5111_v63 }
 0x56b   :  { %1576 = vmatprep.subr.bf16.mxu0 %v5344_v25  ;;  %1617 = vmatprep.subr.bf16.mxu1 %v5114_v7 }
 0x56e   :  { %1577 = vmatpush1.bf16.msra.mxu0 %v5348_v47  ;;  %1618 = vmatpush1.bf16.msra.mxu1 %v5117_v46 }
 0x56f   :  { %1578 = vmatprep.subr.bf16.mxu0 %v5352_v55  ;;  %1619 = vmatprep.subr.bf16.mxu1 %v5121_v5 }
 0x572   :  { %1579 = vmatpush1.bf16.msra.mxu0 %v5356_v52  ;;  %1620 = vmatpush1.bf16.msra.mxu1 %v5124_v4 }
 0x573   :  { %1580 = vmatprep.subr.bf16.mxu0 %v5360_v56  ;;  %1621 = vmatprep.subr.bf16.mxu1 %v5127_v51 }
 0x576   :  { %1581 = vmatpush1.bf16.msra.mxu0 %v5406_v14  ;;  %1622 = vmatpush1.bf16.msra.mxu1 %v5130_v11 }
 0x577   :  { %1684 = vmatprep.subr.bf16.mxu0 %v5300_v54  ;;  %1725 = vmatprep.subr.bf16.mxu1 %v5081_v42 }
 0x619   :  { %v1482_v40 = vpop.f32.mrf.mxu0  ;;  %v1523_v58 = vpop.f32.mrf.mxu1 }
 0x61a   :  { %v1530_v49 = vadd.f32 %v1482_v40, %v6160_v60  ;;  %v1532_v42 = vadd.f32 %v1523_v58, %v6163_v20 }
 0x61b   :  { %v1484_v44 = vpop.f32.mrf.mxu0  ;;  %v1525_v22 = vpop.f32.mrf.mxu1 }
 0x61c   :  { %v3540_v36 = vmul.f32 -1.442695, %v1530_v49  ;;  %v1531_v33 = vadd.f32 %v1484_v44, %v6161_v45  ;;  %v1533_v13 = vadd.f32 %v1525_v22, %v6162_v3  ;;  %v6167_v22 = vld [vmem:[#allocation160_spill] sm:$0xff] }
 0x61d   :  { %v1486_v31 = vpop.f32.mrf.mxu0  ;;  %v1527_v30 = vpop.f32.mrf.mxu1 }
 0x61e   :  { %4014 = vpow2.f32 %v3540_v36  ;;  %v3541_v23 = vmul.f32 -1.442695, %v1531_v33  ;;  %v3542_v37 = vmul.f32 -1.442695, %v1533_v13 }
 0x61f   :  { %v1487_v21 = vpop.f32.mrf.mxu0  ;;  %v1528_v41 = vpop.f32.mrf.mxu1 }
 0x620   :  { %4016 = vpow2.f32 %v3541_v23 }
 0x621   :  { %4018 = vtanh.f32 %v1532_v42 }
 0x622   :  { %4020 = vpow2.f32 %v3542_v37 }
 0x62b   :  { %v4015_v15 = vpop.eup %4014 }
 0x62c   :  { %v1537_v43 = vadd.f32 1.0, %v4015_v15 }
 0x62d   :  { %v4017_v17 = vpop.eup %4016 }
 0x62e   :  { %4022 = vrcp.f32 %v1537_v43  ;;  %v1543_v32 = vadd.f32 1.0, %v4017_v17  ;;  %v4019_v27 = vpop.eup %4018 }
 0x62f   :  { %v4021_v16 = vpop.eup %4020 }
 0x630   :  { %4024 = vrcp.f32 %v1543_v32  ;;  %v1550_v53 = vadd.f32 1.0, %v4021_v16  ;;  %v4095_v16 = vld [vmem:[#allocation18 + $0xe8] ss:$16 sps:$4 sm:$0xff]  }
 0x632   :  { %4026 = vrcp.f32 %v1550_v53  ;;  %v4101_v53 = vld [vmem:[#allocation18 + $0x88] ss:$16 sps:$4 sm:$0xff]  }
 0x63b   :  { %v4023_v12 = vpop.eup %4022 }
 0x63c   :  { %v1554_v61 = vmul.f32 %v4023_v12, %v4019_v27  ;;  %v4096_v12 = vld [vmem:[#allocation18 + $0xcc] ss:$16 sps:$4 sm:$0xff]  }
 0x63d   :  { %v4025_v48 = vpop.eup %4024 }
 0x63e   :  { %v1553_v50 = vmul.f32 %v4025_v48, %v5373_v8  ;;  %v4098_v48 = vld [vmem:[#allocation18 + $0xac] ss:$16 sps:$4 sm:$0xff]  }
 0x63f   :  { %v4027_v58 = vpop.eup %4026 }
 0x640   :  { %v5417_v40 = vadd.f32 %v1554_v61, %v1553_v50  ;;  %v4097_v61 = vld [vmem:[#allocation18 + $0xc8] ss:$16 sps:$4 sm:$0xff]   ;;  %v3924_v50 = vld [vmem:[#allocation24 + $0x74] ss:$8 sps:$4 sm:$0xff]  }
 0x642   :  { %4028 = vtanh.f32 %v5417_v40 }
 0x64f   :  { %v4029_v60 = vpop.eup %4028 }
 0x650   :  { %v1557_v49 = vmul.f32 %v4029_v60, %v4027_v58  ;;  %v6168_v58 = vld [vmem:[#allocation152_spill] sm:$0xff] }
 0x652   :  { %v1558_v44 = vpack.c.bf16 %v1557_v49, %v1557_v49 }
 0x654   :  { %1560 = vst [vmem:[#allocation6 + $0x10] sm:$0xf] %v1558_v44  ;;  %1599 = vmatmul.mubr.bf16.vlgmr.msra.gmra.mxu0 %v1558_v44  ;;  %1640 = vmatmul.mubr.bf16.vlgmr.msra.gmra.mxu1 %v1558_v44 }
 0x655   :  { %1685 = vmatpush1.bf16.msra.mxu0 %v5262_v34  ;;  %1726 = vmatpush1.bf16.msra.mxu1 %v5083_v62  ;;  %v4094_v62 = vld [vmem:[#allocation18 + $0xec] ss:$16 sps:$4 sm:$0xff]  }
 0x656   :  { %1686 = vmatprep.subr.bf16.mxu0 %v5266_v59  ;;  %1727 = vmatprep.subr.bf16.mxu1 %v5086_v10 }
 0x657   :  { %1716 = vmatprep.mubr.bf16.mxu0 %v6138_v35  ;;  %1757 = vmatprep.mubr.bf16.mxu1 %v6138_v35 }
 0x659   :  { %1687 = vmatpush1.bf16.msra.mxu0 %v5272_v24  ;;  %1728 = vmatpush1.bf16.msra.mxu1 %v5090_v39 }
 0x65a   :  { %1688 = vmatprep.subr.bf16.mxu0 %v5320_v26  ;;  %1729 = vmatprep.subr.bf16.mxu1 %v5094_v57  ;;  %v6164_v57 = vld [vmem:[#allocation150_spill] sm:$0xff] }
 0x65d   :  { %1689 = vmatpush1.bf16.msra.mxu0 %v5324_v19  ;;  %1730 = vmatpush1.bf16.msra.mxu1 %v5097_v6 }
 0x65e   :  { %1690 = vmatprep.subr.bf16.mxu0 %v5328_v0  ;;  %1731 = vmatprep.subr.bf16.mxu1 %v5100_v2 }
 0x661   :  { %1691 = vmatpush1.bf16.msra.mxu0 %v5332_v1  ;;  %1732 = vmatpush1.bf16.msra.mxu1 %v5104_v38 }
 0x662   :  { %1692 = vmatprep.subr.bf16.mxu0 %v5336_v29  ;;  %1733 = vmatprep.subr.bf16.mxu1 %v5108_v9 }
 0x665   :  { %1693 = vmatpush1.bf16.msra.mxu0 %v5340_v28  ;;  %1734 = vmatpush1.bf16.msra.mxu1 %v5111_v63  ;;  %v6165_v63 = vld [vmem:[#allocation151_spill] sm:$0xff] }
 0x666   :  { %1694 = vmatprep.subr.bf16.mxu0 %v5344_v25  ;;  %1735 = vmatprep.subr.bf16.mxu1 %v5114_v7 }
 0x669   :  { %1695 = vmatpush1.bf16.msra.mxu0 %v5348_v47  ;;  %1736 = vmatpush1.bf16.msra.mxu1 %v5117_v46 }
 0x66a   :  { %1696 = vmatprep.subr.bf16.mxu0 %v5352_v55  ;;  %1737 = vmatprep.subr.bf16.mxu1 %v5121_v5 }
 0x66d   :  { %1697 = vmatpush1.bf16.msra.mxu0 %v5356_v52  ;;  %1738 = vmatpush1.bf16.msra.mxu1 %v5124_v4 }
 0x66e   :  { %1698 = vmatprep.subr.bf16.mxu0 %v5360_v56  ;;  %1739 = vmatprep.subr.bf16.mxu1 %v5127_v51 }
 0x671   :  { %1699 = vmatpush1.bf16.msra.mxu0 %v5406_v14  ;;  %1740 = vmatpush1.bf16.msra.mxu1 %v5130_v11  ;;  %v6166_v11 = vld [vmem:[#allocation161_spill] sm:$0xff] }
 0x672   :  { %1802 = vmatprep.subr.bf16.mxu0 %v5300_v54  ;;  %1843 = vmatprep.subr.bf16.mxu1 %v4094_v62 }
 0x714   :  { %v1600_v10 = vpop.f32.mrf.mxu0  ;;  %v1641_v39 = vpop.f32.mrf.mxu1 }
 0x715   :  { %v1648_v6 = vadd.f32 %v1600_v10, %v6164_v57  ;;  %v1650_v36 = vadd.f32 %v1641_v39, %v6167_v22 }
 0x716   :  { %v1602_v2 = vpop.f32.mrf.mxu0  ;;  %v1643_v38 = vpop.f32.mrf.mxu1 }
 0x717   :  { %v3543_v9 = vmul.f32 -1.442695, %v1648_v6  ;;  %v1649_v7 = vadd.f32 %v1602_v2, %v6165_v63  ;;  %v1651_v54 = vadd.f32 %v1643_v38, %v6166_v11  ;;  %v6171_v38 = vld [vmem:[#allocation162_spill] sm:$0xff] }
 0x718   :  { %v1604_v46 = vpop.f32.mrf.mxu0  ;;  %v1645_v5 = vpop.f32.mrf.mxu1 }
 0x719   :  { %4030 = vpow2.f32 %v3543_v9  ;;  %v3544_v4 = vmul.f32 -1.442695, %v1649_v7  ;;  %v3545_v45 = vmul.f32 -1.442695, %v1651_v54 }
 0x71a   :  { %v1605_v51 = vpop.f32.mrf.mxu0  ;;  %v1646_v8 = vpop.f32.mrf.mxu1 }
 0x71b   :  { %4032 = vpow2.f32 %v3544_v4 }
 0x71c   :  { %4034 = vtanh.f32 %v1650_v36 }
 0x71d   :  { %4036 = vpow2.f32 %v3545_v45 }
 0x726   :  { %v4031_v33 = vpop.eup %4030 }
 0x727   :  { %v1655_v31 = vadd.f32 1.0, %v4031_v33 }
 0x728   :  { %v4033_v30 = vpop.eup %4032 }
 0x729   :  { %4038 = vrcp.f32 %v1655_v31  ;;  %v1661_v23 = vadd.f32 1.0, %v4033_v30  ;;  %v4035_v21 = vpop.eup %4034 }
 0x72a   :  { %v4037_v41 = vpop.eup %4036 }
 0x72b   :  { %4040 = vrcp.f32 %v1661_v23  ;;  %v1668_v42 = vadd.f32 1.0, %v4037_v41 }
 0x72d   :  { %4042 = vrcp.f32 %v1668_v42  ;;  %v3928_v42 = vld [vmem:[#allocation24 + $0x50] ss:$8 sps:$4 sm:$0xff]  }
 0x736   :  { %v4039_v3 = vpop.eup %4038 }
 0x737   :  { %v1672_v13 = vmul.f32 %v4039_v3, %v4035_v21  ;;  %v3922_v21 = vld [vmem:[#allocation24 + $0x70] ss:$8 sps:$4 sm:$0xff]   ;;  %v3927_v3 = vld [vmem:[#allocation24 + $0x64] ss:$8 sps:$4 sm:$0xff]  }
 0x738   :  { %v4041_v20 = vpop.eup %4040 }
 0x739   :  { %v1671_v37 = vmul.f32 %v4041_v20, %v5417_v40  ;;  %v3930_v20 = vld [vmem:[#allocation24 + $0x54] ss:$8 sps:$4 sm:$0xff]  }
 0x73a   :  { %v4043_v43 = vpop.eup %4042 }
 0x73b   :  { %v5458_v15 = vadd.f32 %v1672_v13, %v1671_v37  ;;  %v3925_v13 = vld [vmem:[#allocation24 + $0x60] ss:$8 sps:$4 sm:$0xff]   ;;  %v3933_v37 = vld [vmem:[#allocation24 + $0x44] ss:$8 sps:$4 sm:$0xff]  }
 0x73d   :  { %4044 = vtanh.f32 %v5458_v15 }
 0x74a   :  { %v4045_v17 = vpop.eup %4044 }
 0x74b   :  { %v1675_v32 = vmul.f32 %v4045_v17, %v4043_v43  ;;  %v3936_v43 = vld [vmem:[#allocation24 + $0x34] ss:$8 sps:$4 sm:$0xff]   ;;  %v3934_v17 = vld [vmem:[#allocation24 + $0x30] ss:$8 sps:$4 sm:$0xff]  }
 0x74d   :  { %v1676_v27 = vpack.c.bf16 %v1675_v32, %v1675_v32  ;;  %v3939_v32 = vld [vmem:[#allocation24 + $0x24] ss:$8 sps:$4 sm:$0xff]  }
 0x74f   :  { %1678 = vst [vmem:[#allocation6 + $0x14] sm:$0xf] %v1676_v27  ;;  %1717 = vmatmul.mubr.bf16.vlgmr.msra.gmra.mxu0 %v1676_v27  ;;  %1758 = vmatmul.mubr.bf16.vlgmr.msra.gmra.mxu1 %v1676_v27  ;;  %v3937_v27 = vld [vmem:[#allocation24 + $0x20] ss:$8 sps:$4 sm:$0xff]  }
 0x750   :  { %1803 = vmatpush1.bf16.msra.mxu0 %v5262_v34  ;;  %1844 = vmatpush1.bf16.msra.mxu1 %v4095_v16  ;;  %v4099_v34 = vld [vmem:[#allocation18 + $0xa8] ss:$16 sps:$4 sm:$0xff]   ;;  %v3942_v16 = vld [vmem:[#allocation24 + $0x14] ss:$8 sps:$4 sm:$0xff]  }
 0x751   :  { %1804 = vmatprep.subr.bf16.mxu0 %v5266_v59  ;;  %1845 = vmatprep.subr.bf16.mxu1 %v4096_v12  ;;  %v4100_v59 = vld [vmem:[#allocation18 + $0x8c] ss:$16 sps:$4 sm:$0xff]   ;;  %v3940_v12 = vld [vmem:[#allocation24 + $0x10] ss:$8 sps:$4 sm:$0xff]  }
 0x752   :  { %1834 = vmatprep.mubr.bf16.mxu0 %v6138_v35  ;;  %1875 = vmatprep.mubr.bf16.mxu1 %v6138_v35 }
 0x754   :  { %1805 = vmatpush1.bf16.msra.mxu0 %v5272_v24  ;;  %1846 = vmatpush1.bf16.msra.mxu1 %v4097_v61  ;;  %v4102_v24 = vld [vmem:[#allocation18 + $0x6c] ss:$16 sps:$4 sm:$0xff]  }
 0x755   :  { %1806 = vmatprep.subr.bf16.mxu0 %v5320_v26  ;;  %1847 = vmatprep.subr.bf16.mxu1 %v4098_v48  ;;  %v4103_v26 = vld [vmem:[#allocation18 + $0x68] ss:$16 sps:$4 sm:$0xff]   ;;  %v3945_v61 = vld [vmem:[#allocation24 + $0x4] ss:$8 sps:$4 sm:$0xff]  }
 0x756   :  { %v3943_v48 = vld [vmem:[#allocation24] ss:$8 sps:$4 sm:$0xff]  }
 0x758   :  { %1807 = vmatpush1.bf16.msra.mxu0 %v5324_v19  ;;  %1848 = vmatpush1.bf16.msra.mxu1 %v4099_v34  ;;  %v4104_v19 = vld [vmem:[#allocation18 + $0x4c] ss:$16 sps:$4 sm:$0xff]  }
 0x759   :  { %1808 = vmatprep.subr.bf16.mxu0 %v5328_v0  ;;  %1849 = vmatprep.subr.bf16.mxu1 %v4100_v59  ;;  %v4105_v0 = vld [vmem:[#allocation18 + $0x48] ss:$16 sps:$4 sm:$0xff]   ;;  %v3946_v34 = vld [vmem:[#allocation6] sm:$0xff]  }
 0x75a   :  { %v3947_v59 = vld [vmem:[#allocation6 + $0x8] sm:$0xff]  }
 0x75c   :  { %1809 = vmatpush1.bf16.msra.mxu0 %v5332_v1  ;;  %1850 = vmatpush1.bf16.msra.mxu1 %v4101_v53  ;;  %v4106_v1 = vld [vmem:[#allocation18 + $0x2c] ss:$16 sps:$4 sm:$0xff]  }
 0x75d   :  { %1810 = vmatprep.subr.bf16.mxu0 %v5336_v29  ;;  %1851 = vmatprep.subr.bf16.mxu1 %v4102_v24  ;;  %v4107_v29 = vld [vmem:[#allocation18 + $0x28] ss:$16 sps:$4 sm:$0xff]   ;;  %v3948_v53 = vld [vmem:[#allocation6 + $0x10] sm:$0xff]  }
 0x760   :  { %1811 = vmatpush1.bf16.msra.mxu0 %v5340_v28  ;;  %1852 = vmatpush1.bf16.msra.mxu1 %v4103_v26  ;;  %v4108_v28 = vld [vmem:[#allocation18 + $0xc] ss:$16 sps:$4 sm:$0xff]  }
 0x761   :  { %1812 = vmatprep.subr.bf16.mxu0 %v5344_v25  ;;  %1853 = vmatprep.subr.bf16.mxu1 %v4104_v19  ;;  %v4109_v25 = vld [vmem:[#allocation18 + $0x8] ss:$16 sps:$4 sm:$0xff]   ;;  %v6172_v19 = vld [vmem:[#allocation154_spill] sm:$0xff] }
 0x764   :  { %1813 = vmatpush1.bf16.msra.mxu0 %v5348_v47  ;;  %1854 = vmatpush1.bf16.msra.mxu1 %v4105_v0 }
 0x765   :  { %1814 = vmatprep.subr.bf16.mxu0 %v5352_v55  ;;  %1855 = vmatprep.subr.bf16.mxu1 %v4106_v1 }
 0x768   :  { %1815 = vmatpush1.bf16.msra.mxu0 %v5356_v52  ;;  %1856 = vmatpush1.bf16.msra.mxu1 %v4107_v29  ;;  %v6169_v52 = vld [vmem:[#allocation153_spill] sm:$0xff] }
 0x769   :  { %1816 = vmatprep.subr.bf16.mxu0 %v5360_v56  ;;  %1857 = vmatprep.subr.bf16.mxu1 %v4108_v28 }
 0x76c   :  { %1817 = vmatpush1.bf16.msra.mxu0 %v5406_v14  ;;  %1858 = vmatpush1.bf16.msra.mxu1 %v4109_v25  ;;  %v6170_v14 = vld [vmem:[#allocation163_spill] sm:$0xff] }
 0x76d   :  { %2038 = vmatprep.subr.bf16.mxu0 %v3924_v50  ;;  %v6173_v25 = vld [vmem:[#allocation155_spill] sm:$0xff] }
 0x80f   :  { %v1718_v47 = vpop.f32.mrf.mxu0  ;;  %v1759_v40 = vpop.f32.mrf.mxu1 }
 0x810   :  { %v1766_v55 = vadd.f32 %v1718_v47, %v6168_v58  ;;  %v1768_v9 = vadd.f32 %v1759_v40, %v6171_v38  ;;  %v6175_v38 = vld [vmem:[#allocation100_spill] sm:$0xff] }
 0x811   :  { %v1720_v60 = vpop.f32.mrf.mxu0  ;;  %v1761_v49 = vpop.f32.mrf.mxu1 }
 0x812   :  { %v3546_v44 = vmul.f32 -1.442695, %v1766_v55  ;;  %v1767_v62 = vadd.f32 %v1720_v60, %v6169_v52  ;;  %v1769_v2 = vadd.f32 %v1761_v49, %v6170_v14 }
 0x813   :  { %v1722_v10 = vpop.f32.mrf.mxu0  ;;  %v1763_v39 = vpop.f32.mrf.mxu1 }
 0x814   :  { %4046 = vpow2.f32 %v3546_v44  ;;  %v3547_v56 = vmul.f32 -1.442695, %v1767_v62  ;;  %v3548_v63 = vmul.f32 -1.442695, %v1769_v2  ;;  %v6174_v44 = vld [vmem:[#allocation164_spill] sm:$0xff] }
 0x815   :  { %v1723_v57 = vpop.f32.mrf.mxu0  ;;  %v1764_v6 = vpop.f32.mrf.mxu1 }
 0x816   :  { %4048 = vpow2.f32 %v3547_v56  ;;  %v441_v57 = vld [vmem:[%s5884_s15] sm:$0x3]  ;;  %s5509_s15 = smov 0  }
 0x817   :  { %4050 = vtanh.f32 %v1768_v9 }
 0x818   :  { %4052 = vpow2.f32 %v3548_v63 }
 0x821   :  { %v4047_v7 = vpop.eup %4046 }
 0x822   :  { %v1773_v46 = vadd.f32 1.0, %v4047_v7 }
 0x823   :  { %v4049_v5 = vpop.eup %4048 }
 0x824   :  { %4054 = vrcp.f32 %v1773_v46  ;;  %v1779_v4 = vadd.f32 1.0, %v4049_v5  ;;  %v4051_v51 = vpop.eup %4050  ;;  %v6176_v46 = vld [vmem:[#allocation104_spill] sm:$0xff] }
 0x825   :  { %v4053_v8 = vpop.eup %4052  ;;  %v1931_v5 = vrot.slane %v441_v57, %v6176_v46 }
 0x826   :  { %4056 = vrcp.f32 %v1779_v4  ;;  %v1786_v36 = vadd.f32 1.0, %v4053_v8 }
 0x828   :  { %4058 = vrcp.f32 %v1786_v36 }
 0x831   :  { %v4055_v11 = vpop.eup %4054 }
 0x832   :  { %v1790_v54 = vmul.f32 %v4055_v11, %v4051_v51 }
 0x833   :  { %v4057_v22 = vpop.eup %4056 }
 0x834   :  { %v1789_v45 = vmul.f32 %v4057_v22, %v5458_v15  ;;  %v3931_v15 = vld [vmem:[#allocation24 + $0x40] ss:$8 sps:$4 sm:$0xff]  }
 0x835   :  { %v4059_v31 = vpop.eup %4058 }
 0x836   :  { %v5483_v33 = vadd.f32 %v1790_v54, %v1789_v45 }
 0x838   :  { %4060 = vtanh.f32 %v5483_v33 }
 0x845   :  { %v4061_v30 = vpop.eup %4060 }
 0x846   :  { %v1793_v23 = vmul.f32 %v4061_v30, %v4059_v31 }
 0x848   :  { %v1794_v41 = vpack.c.bf16 %v1793_v23, %v1793_v23 }
 0x84a   :  { %1796 = vst [vmem:[#allocation6 + $0x18] sm:$0xf] %v1794_v41  ;;  %1835 = vmatmul.mubr.bf16.vlgmr.msra.gmra.mxu0 %v1794_v41  ;;  %1876 = vmatmul.mubr.bf16.vlgmr.msra.gmra.mxu1 %v1794_v41 }
 0x84b   :  { %2039 = vmatpush1.bf16.msra.mxu0 %v3922_v21  ;;  %2070 = vmatprep.mubr.bf16.mxu0 %v6138_v35 }
 0x84c   :  { %2040 = vmatprep.subr.bf16.mxu0 %v3927_v3 }
 0x84f   :  { %2041 = vmatpush1.bf16.msra.mxu0 %v3925_v13 }
 0x850   :  { %2042 = vmatprep.subr.bf16.mxu0 %v3930_v20 }
 0x853   :  { %2043 = vmatpush1.bf16.msra.mxu0 %v3928_v42 }
 0x854   :  { %2044 = vmatprep.subr.bf16.mxu0 %v3933_v37 }
 0x857   :  { %2045 = vmatpush1.bf16.msra.mxu0 %v3931_v15 }
 0x858   :  { %2046 = vmatprep.subr.bf16.mxu0 %v3936_v43 }
 0x85b   :  { %2047 = vmatpush1.bf16.msra.mxu0 %v3934_v17 }
 0x85c   :  { %2048 = vmatprep.subr.bf16.mxu0 %v3939_v32 }
 0x85f   :  { %2049 = vmatpush1.bf16.msra.mxu0 %v3937_v27 }
 0x860   :  { %2050 = vmatprep.subr.bf16.mxu0 %v3942_v16 }
 0x863   :  { %2051 = vmatpush1.bf16.msra.mxu0 %v3940_v12 }
 0x864   :  { %2052 = vmatprep.subr.bf16.mxu0 %v3945_v61 }
 0x867   :  { %2053 = vmatpush1.bf16.msra.mxu0 %v3943_v48 }
 0x86a   :  { %2071 = vmatmul.mubr.bf16.vlgmr.msra.gmra.mxu0 %v3946_v34 }
 0x86b   :  { %2080 = vmatprep.mubr.bf16.mxu0 %v6138_v35 }
 0x872   :  { %2081 = vmatmul.mubr.bf16.gmra.mxu0 %v3947_v59 }
 0x873   :  { %2090 = vmatprep.mubr.bf16.mxu0 %v6138_v35 }
 0x87a   :  { %2091 = vmatmul.mubr.bf16.gmra.mxu0 %v3948_v53 }
 0x87b   :  { %2100 = vmatprep.mubr.bf16.mxu0 %v6138_v35 }
 0x90a   :  { %v1836_v24 = vpop.f32.mrf.mxu0  ;;  %v1877_v26 = vpop.f32.mrf.mxu1 }
 0x90b   :  { %v1884_v0 = vadd.f32 %v1836_v24, %v6172_v19  ;;  %v1886_v35 = vadd.f32 %v1877_v26, %v6174_v44 }
 0x90c   :  { %v1838_v1 = vpop.f32.mrf.mxu0  ;;  %v1879_v29 = vpop.f32.mrf.mxu1 }
 0x90d   :  { %v3549_v28 = vmul.f32 -1.442695, %v1884_v0  ;;  %v1885_v50 = vadd.f32 %v1838_v1, %v6173_v25  ;;  %v1887_v49 = vadd.f32 %v1879_v29, %v5215_v18  ;;  %v1927_v18 = vrot.slane %v441_v57, %v6175_v38 }
 0x90e   :  { %v1840_v47 = vpop.f32.mrf.mxu0  ;;  %v1881_v40 = vpop.f32.mrf.mxu1 }
 0x90f   :  { %4062 = vpow2.f32 %v3549_v28  ;;  %v3550_v58 = vmul.f32 -1.442695, %v1885_v50  ;;  %v3551_v52 = vmul.f32 -1.442695, %v1887_v49 }
 0x910   :  { %v1841_v55 = vpop.f32.mrf.mxu0  ;;  %v1882_v60 = vpop.f32.mrf.mxu1 }
 0x911   :  { %4064 = vpow2.f32 %v3550_v58 }
 0x912   :  { %4066 = vtanh.f32 %v1886_v35  ;;  %v5500_v35 = vmov 0.0  }
 0x913   :  { %4068 = vpow2.f32 %v3551_v52  ;;  %v6177_v52 = vld [vmem:[#allocation139_spill] sm:$0xff] }
 0x91c   :  { %v4063_v62 = vpop.eup %4062 }
 0x91d   :  { %v1891_v10 = vadd.f32 1.0, %v4063_v62 }
 0x91e   :  { %v4065_v39 = vpop.eup %4064 }
 0x91f   :  { %4070 = vrcp.f32 %v1891_v10  ;;  %v1897_v56 = vadd.f32 1.0, %v4065_v39  ;;  %v4067_v6 = vpop.eup %4066 }
 0x920   :  { %v4069_v2 = vpop.eup %4068 }
 0x921   :  { %4072 = vrcp.f32 %v1897_v56  ;;  %v1904_v51 = vadd.f32 1.0, %v4069_v2 }
 0x923   :  { %4074 = vrcp.f32 %v1904_v51 }
 0x92a   :  { %v2072_v14 = vpop.f32.mrf.mxu0 }
 0x92b   :  { %v2073_v54 = vadd.f32 %v2072_v14, %v1927_v18 }
 0x92c   :  { %v4071_v9 = vpop.eup %4070  ;;  %v2074_v63 = vpop.f32.mrf.mxu0 }
 0x92d   :  { %v1908_v7 = vmul.f32 %v4071_v9, %v4067_v6  ;;  %v2075_v31 = vadd.f32 %v2074_v63, %v1931_v5 }
 0x92e   :  { %v4073_v4 = vpop.eup %4072  ;;  %v2076_v8 = vpop.f32.mrf.mxu0 }
 0x92f   :  { %v1907_v11 = vmul.f32 %v4073_v4, %v5483_v33  ;;  %v2077_v22 = vadd.f32 %v2076_v8, %v1927_v18 }
 0x930   :  { %v2078_v36 = vpop.f32.mrf.mxu0  ;;  %v4075_v12 = vpop.eup %4074 }
 0x931   :  { %v1909_v45 = vadd.f32 %v1908_v7, %v1907_v11   ;;  %v3663_v30 = vpack.c.bf16 %v2077_v22, %v2073_v54  ;;  %v2079_v23 = vadd.f32 %v2078_v36, %v1931_v5 }
 0x932   :  { %v2082_v21 = vpop.f32.mrf.mxu0 }
 0x933   :  { %4076 = vtanh.f32 %v1909_v45  ;;  %3664 = vst [vmem:[#allocation3] sm:$0xff] %v3663_v30   ;;  %v3683_v41 = vpack.c.bf16 %v2079_v23, %v2075_v31  ;;  %v2083_v20 = vadd.f32 %v2082_v21, %v1927_v18 }
 0x934   :  { %v2084_v3 = vpop.f32.mrf.mxu0 }
 0x935   :  { %3684 = vst [vmem:[#allocation4] sm:$0xff] %v3683_v41   ;;  %v2085_v15 = vadd.f32 %v2084_v3, %v1931_v5 }
 0x936   :  { %v2086_v13 = vpop.f32.mrf.mxu0 }
 0x937   :  { %v2087_v42 = vadd.f32 %v2086_v13, %v1927_v18 }
 0x938   :  { %v2088_v37 = vpop.f32.mrf.mxu0 }
 0x939   :  { %v3668_v33 = vpack.c.bf16 %v2087_v42, %v2083_v20  ;;  %v2089_v43 = vadd.f32 %v2088_v37, %v1931_v5 }
 0x93a   :  { %v2092_v17 = vpop.f32.mrf.mxu0 }
 0x93b   :  { %3700 = vst [vmem:[#allocation3 + $0x8] sm:$0xff] %v3668_v33   ;;  %v3688_v32 = vpack.c.bf16 %v2089_v43, %v2085_v15  ;;  %v2093_v61 = vadd.f32 %v2092_v17, %v1927_v18 }
 0x93c   :  { %v2094_v27 = vpop.f32.mrf.mxu0 }
 0x93d   :  { %3703 = vst [vmem:[#allocation4 + $0x8] sm:$0xff] %v3688_v32   ;;  %v2095_v24 = vadd.f32 %v2094_v27, %v1931_v5 }
 0x93e   :  { %v2096_v16 = vpop.f32.mrf.mxu0 }
 0x93f   :  { %v2097_v48 = vadd.f32 %v2096_v16, %v1927_v18 }
 0x940   :  { %v4077_v34 = vpop.eup %4076  ;;  %v2098_v59 = vpop.f32.mrf.mxu0 }
 0x941   :  { %v1911_v53 = vmul.f32 %v4077_v34, %v4075_v12   ;;  %v3673_v26 = vpack.c.bf16 %v2097_v48, %v2093_v61  ;;  %v2099_v19 = vadd.f32 %v2098_v59, %v1931_v5 }
 0x943   :  { %v1912_v0 = vpack.c.bf16 %v1911_v53, %v1911_v53  ;;  %3701 = vst [vmem:[#allocation3 + $0x10] sm:$0xff] %v3673_v26   ;;  %v3693_v1 = vpack.c.bf16 %v2099_v19, %v2095_v24 }
 0x945   :  { %1914 = vst [vmem:[#allocation6 + $0x1c] sm:$0xf] %v1912_v0  ;;  %3704 = vst [vmem:[#allocation4 + $0x10] sm:$0xff] %v3693_v1  }
 0x94c   :  { %v3949_v29 = vld [vmem:[#allocation6 + $0x18] sm:$0xff]  }
 0x94d   :  { %2101 = vmatmul.mubr.bf16.gmra.mxu0 %v3949_v29 }
 0xa0d   :  { %v2102_v28 = vpop.f32.mrf.mxu0 }
 0xa0e   :  { %v2103_v47 = vadd.f32 %v2102_v28, %v1927_v18 }
 0xa0f   :  { %v2104_v25 = vpop.f32.mrf.mxu0 }
 0xa10   :  { %v2105_v55 = vadd.f32 %v2104_v25, %v1931_v5 }
 0xa11   :  { %v2106_v50 = vpop.f32.mrf.mxu0 }
 0xa12   :  { %v2107_v40 = vadd.f32 %v2106_v50, %v1927_v18 }
 0xa13   :  { %v2108_v58 = vpop.f32.mrf.mxu0 }
 0xa14   :  { %v3678_v60 = vpack.c.bf16 %v2107_v40, %v2103_v47  ;;  %v2109_v49 = vadd.f32 %v2108_v58, %v1931_v5 }
 0xa16   :  { %3702 = vst [vmem:[#allocation3 + $0x18] sm:$0xff] %v3678_v60   ;;  %v3698_v44 = vpack.c.bf16 %v2109_v49, %v2105_v55 }
 0xa18   :  { %3705 = vst [vmem:[#allocation4 + $0x18] sm:$0xff] %v3698_v44  }
 0xa19 LB: > { %v6178_v62 = vld [vmem:[#allocation66_spill] sm:$0xff]  ;;  %v6179_v10 = vld [vmem:[#allocation64_spill] sm:$0xff]  ;;  %v6182_v2 = vld [vmem:[#allocation67_spill] sm:$0xff]  ;;  %v2297_v12 = vpack.c.bf16 %v4508_v53, %v4508_v53  ;;  %vm4533_vm0 = vmmov 0   ;;  %vm2936_vm1 = vcmask 1041409   ;;  %vm2938_vm2 = vcmask 1042434   ;;  %s4512_s15 = sphi %s5509_s15, %s2291_s15   ;;  %v4508_v53 = vphi %v1911_v53, %v5697_v53   ;;  %v4504_v45 = vphi %v1909_v45, %v5694_v45   ;;  %v4500_v52 = vphi %v6177_v52, %v3408_v52   ;;  %v4496_v35 = vphi %v5500_v35, %v6297_v35  }
 0xa1a   : > { %v3604_v39 = vcombine.high %v6179_v10, %v6178_v62  ;;  %v3603_v56 = vcombine.low %v6179_v10, %v6178_v62  ;;  %v6180_v57 = vld [vmem:[#allocation62_spill] sm:$0xff]  ;;  %v6181_v6 = vld [vmem:[#allocation60_spill] sm:$0xff]  ;;  %v6183_v38 = vld [vmem:[#allocation65_spill] sm:$0xff]  ;;  %vm2940_vm3 = vcmask 1043459   ;;  %vm2942_vm4 = vcmask 1044484   ;;  %s3658_s25 = sshll.u32 %s4512_s15, 3 }
 0xa1b   : > { %v3600_v14 = vcombine.high %v6181_v6, %v6180_v57  ;;  %v3606_v18 = vcombine.high %v6183_v38, %v6182_v2  ;;  %v3605_v9 = vcombine.low %v6183_v38, %v6182_v2  ;;  %v6184_v63 = vld [vmem:[#allocation63_spill] sm:$0xff]  ;;  %v6185_v7 = vld [vmem:[#allocation61_spill] sm:$0xff]  ;;  %v3599_v5 = vcombine.low %v6181_v6, %v6180_v57  ;;  %v6186_v4 = vld [vmem:[#allocation58_spill] sm:$0xff]  ;;  %2650 = vmatprep.mubr.bf16.mxu0 %v2297_v12  ;;  %s3270_s5 = scalar_lea.vmem [#allocation12], %s3658_s25  ;;  %s3327_s24 = scalar_lea.vmem [#allocation26], %s4512_s15 }
 0xa1c   : > { %2618 = vmatprep.subr.bf16.mxu0 %v3604_v39  ;;  %v3602_v46 = vcombine.high %v6185_v7, %v6184_v63  ;;  %v6187_v51 = vld [vmem:[#allocation56_spill] sm:$0xff]  ;;  %v3601_v11 = vcombine.low %v6185_v7, %v6184_v63  ;;  %v6188_v54 = vld [vmem:[#allocation59_spill] sm:$0xff]  ;;  %v6189_v22 = vld [vmem:[#allocation57_spill] sm:$0xff]  ;;  %2691 = vmatprep.mubr.bf16.mxu1 %v2297_v12  ;;  %vm2944_vm5 = vcmask 1045509   ;;  %vm2946_vm6 = vcmask 1046534   ;;  %s3324_s27 = scalar_lea.vmem [#allocation25], %s4512_s15 }
 0xa1d   : > { %2619 = vmatpush1.bf16.msra.mxu0 %v3603_v56  ;;  %2659 = vmatprep.subr.bf16.mxu1 %v3606_v18  ;;  %v3596_v8 = vcombine.high %v6187_v51, %v6186_v4  ;;  %v3598_v36 = vcombine.high %v6189_v22, %v6188_v54  ;;  %v3595_v31 = vcombine.low %v6187_v51, %v6186_v4  ;;  %v6190_v30 = vld [vmem:[#allocation54_spill] sm:$0xff]  ;;  %v6191_v23 = vld [vmem:[#allocation52_spill] sm:$0xff]  ;;  %v6192_v3 = vld [vmem:[#allocation55_spill] sm:$0xff]  ;;  %vm2948_vm7 = vcmask 1047559   ;;  %s2291_s15 = sadd.s32 1, %s4512_s15  }
 0xa1e   : > { %2620 = vmatprep.subr.bf16.mxu0 %v3600_v14  ;;  %2660 = vmatpush1.bf16.msra.mxu1 %v3605_v9  ;;  %v3592_v21 = vcombine.high %v6191_v23, %v6190_v30  ;;  %v3597_v41 = vcombine.low %v6189_v22, %v6188_v54  ;;  %v6193_v13 = vld [vmem:[#allocation53_spill] sm:$0xff]  ;;  %v3591_v42 = vcombine.low %v6191_v23, %v6190_v30  ;;  %v6194_v37 = vld [vmem:[#allocation50_spill] sm:$0xff]  ;;  %v6195_v15 = vld [vmem:[#allocation48_spill] sm:$0xff]  ;;  %vm2893_vm8 = vcmp.gt.f32.partialorder %v4496_v35, 0.0  ;;  %p2288_p13 = scmp.ge.s32.totalorder %s2291_s15, 8  }
 0xa1f   : > { %2661 = vmatprep.subr.bf16.mxu1 %v3602_v46  ;;  %v3594_v20 = vcombine.high %v6193_v13, %v6192_v3  ;;  %v3588_v33 = vcombine.high %v6195_v15, %v6194_v37  ;;  %v3593_v43 = vcombine.low %v6193_v13, %v6192_v3  ;;  %v6196_v17 = vld [vmem:[#allocation51_spill] sm:$0xff]  ;;  %v6197_v32 = vld [vmem:[#allocation49_spill] sm:$0xff]  ;;  %v3587_v16 = vcombine.low %v6195_v15, %v6194_v37  ;;  %v6198_v61 = vld [vmem:[#allocation46_spill] sm:$0xff]  ;;  %s4534_s20 = smov (%p2288_p13), [#allocation25]   ;;  %s4535_s1 = smov (%p2288_p13), [#allocation26]  }
 0xa20   : > { %v3590_v27 = vcombine.high %v6197_v32, %v6196_v17  ;;  %v6199_v48 = vld [vmem:[#allocation44_spill] sm:$0xff]  ;;  %v3589_v59 = vcombine.low %v6197_v32, %v6196_v17  ;;  %v6200_v24 = vld [vmem:[#allocation47_spill] sm:$0xff]  ;;  %v6201_v26 = vld [vmem:[#allocation45_spill] sm:$0xff]  ;;  %vm2952_vm9 = vcmask 64512   ;;  %vm3325_vm13 = vcmask 57344   ;;  %s3415_s26 = sshll.u32 (%p2288_p13), %s4534_s20, 4  ;;  %s3416_s26 = int_to_ptr.vmem [resolvable:$true] %s3415_s26 }
 0xa21   : > { %2621 = vmatpush1.bf16.msra.mxu0 %v3599_v5  ;;  %v3584_v34 = vcombine.high %v6199_v48, %v6198_v61  ;;  %v3586_v19 = vcombine.high %v6201_v26, %v6200_v24  ;;  %v3583_v0 = vcombine.low %v6199_v48, %v6198_v61  ;;  %v6202_v53 = vld [vmem:[#allocation42_spill] sm:$0xff]  ;;  %v6204_v29 = vld [vmem:[#allocation40_spill] sm:$0xff]  ;;  %v3585_v25 = vcombine.low %v6201_v26, %v6200_v24  ;;  %v6205_v50 = vld [vmem:[#allocation43_spill] sm:$0xff]  ;;  %s3425_s4 = sshll.u32 (%p2288_p13), %s4535_s1, 4  ;;  %s4418_s8 = scalar_lea.vmem (%p2288_p13), %s3416_s26, 128  ;;  %s3426_s4 = int_to_ptr.vmem [resolvable:$true] %s3425_s4 }
 0xa22   : > { %2622 = vmatprep.subr.bf16.mxu0 %v3596_v8  ;;  %2662 = vmatpush1.bf16.msra.mxu1 %v3601_v11  ;;  %v6203_v1 = vmov %v6202_v53  ;;  %v3580_v28 = vcombine.high %v6204_v29, %v6202_v53  ;;  %v6206_v47 = vld [vmem:[#allocation41_spill] sm:$0xff]  ;;  %v6207_v55 = vld [vmem:[#allocation38_spill] sm:$0xff]  ;;  %v6208_v60 = vld [vmem:[#allocation36_spill] sm:$0xff]  ;;  %p4419_p0 = scmp.ne.s32.totalorder (%p2288_p13), %s3416_s26, %s4418_s8  ;;  %p4423_p1 = scmp.lt.s32.totalorder (%p2288_p13), %s3416_s26, %s3416_s26 }
 0xa23   : > { %2663 = vmatprep.subr.bf16.mxu1 %v3598_v36  ;;  %v3582_v40 = vcombine.high %v6206_v47, %v6205_v50  ;;  %v3579_v58 = vcombine.low %v6204_v29, %v6203_v1  ;;  %v3576_v49 = vcombine.high %v6208_v60, %v6207_v55  ;;  %v3581_v44 = vcombine.low %v6206_v47, %v6205_v50  ;;  %v6209_v39 = vld [vmem:[#allocation39_spill] sm:$0xff]  ;;  %v6210_v56 = vld [vmem:[#allocation37_spill] sm:$0xff]  ;;  %v6214_v36 = vld [vmem:[#allocation98_spill] sm:$0xff]  ;;  %p4424_p2 = scmp.lt.s32.totalorder (%p2288_p13), %s4418_s8, %s4418_s8 }
 0xa24   : > { %v3578_v14 = vcombine.high %v6210_v56, %v6209_v39  ;;  %v3575_v18 = vcombine.low %v6208_v60, %v6207_v55  ;;  %v6211_v9 = vld [vmem:[#allocation99_spill] sm:$0xff]  ;;  %v6212_v46 = vld [vmem:[#allocation97_spill] sm:$0xff]  ;;  %v3577_v8 = vcombine.low %v6210_v56, %v6209_v39  ;;  %v6221_v53 = vld [vmem:[#allocation92_spill] sm:$0xff] }
 0xa25   : > { %2623 = vmatpush1.bf16.msra.mxu0 %v3595_v31  ;;  %v3636_v5 = vcombine.high %v6212_v46, %v6211_v9  ;;  %v6213_v11 = vld [vmem:[#allocation101_spill] sm:$0xff]  ;;  %v6233_v1 = vld [vmem:[#allocation76_spill] sm:$0xff]  ;;  %p4425_p3 = por (%p2288_p13), %p4424_p2, %p4423_p1 }
 0xa26   : > { %2624 = vmatprep.subr.bf16.mxu0 %v3592_v21  ;;  %2664 = vmatpush1.bf16.msra.mxu1 %v3597_v41  ;;  %v3638_v31 = vcombine.high %v6214_v36, %v6213_v11  ;;  %v3635_v21 = vcombine.low %v6212_v46, %v6211_v9  ;;  %v6215_v41 = vld [vmem:[#allocation95_spill] sm:$0xff]  ;;  %v6235_v3 = vld [vmem:[#allocation77_spill] sm:$0xff]  ;;  %v6281_v32 = vld [vmem:[#allocation128_spill] sm:$0xff] }
 0xa27   : > { %2665 = vmatprep.subr.bf16.mxu1 %v3594_v20  ;;  %v6216_v20 = vld [vmem:[#allocation93_spill] sm:$0xff]  ;;  %p4426_p4 = pnand (%p2288_p13), %p4425_p3, %p4419_p0 }
 0xa28   : > { %v3631_v12 = vcombine.low %v6216_v20, %v6215_v41  ;;  %v6239_v7 = vld [vmem:[#allocation73_spill] sm:$0xff] }
 0xa29   : > { %2625 = vmatpush1.bf16.msra.mxu0 %v3591_v42  ;;  %v3632_v42 = vcombine.high %v6216_v20, %v6215_v41  ;;  %v6243_v9 = vld [vmem:[#allocation69_spill] sm:$0xff] }
 0xa2a   : > { %2626 = vmatprep.subr.bf16.mxu0 %v3588_v33  ;;  %2666 = vmatpush1.bf16.msra.mxu1 %v3593_v43  ;;  %v3637_v33 = vcombine.low %v6214_v36, %v6213_v11  ;;  %v6217_v43 = vld [vmem:[#allocation96_spill] sm:$0xff] }
 0xa2b   : > { %2667 = vmatprep.subr.bf16.mxu1 %v3590_v27  ;;  %v6218_v27 = vld [vmem:[#allocation94_spill] sm:$0xff]  ;;  %v6263_v11 = vld [vmem:[#allocation104_spill] sm:$0xff] }
 0xa2d   : > { %2627 = vmatpush1.bf16.msra.mxu0 %v3587_v16  ;;  %v3634_v16 = vcombine.high %v6218_v27, %v6217_v43 }
 0xa2e   : > { %2628 = vmatprep.subr.bf16.mxu0 %v3584_v34  ;;  %2668 = vmatpush1.bf16.msra.mxu1 %v3589_v59  ;;  %v6219_v34 = vld [vmem:[#allocation91_spill] sm:$0xff]  ;;  %v6220_v59 = vld [vmem:[#allocation89_spill] sm:$0xff] }
 0xa2f   : > { %2669 = vmatprep.subr.bf16.mxu1 %v3586_v19  ;;  %v3628_v19 = vcombine.high %v6220_v59, %v6219_v34 }
 0xa31   : > { %2629 = vmatpush1.bf16.msra.mxu0 %v3583_v0  ;;  %v3633_v0 = vcombine.low %v6218_v27, %v6217_v43 }
 0xa32   : > { %2630 = vmatprep.subr.bf16.mxu0 %v3580_v28  ;;  %2670 = vmatpush1.bf16.msra.mxu1 %v3585_v25  ;;  %v6222_v28 = vmov %v6221_v53  ;;  %v6223_v25 = vld [vmem:[#allocation90_spill] sm:$0xff] }
 0xa33   : > { %2671 = vmatprep.subr.bf16.mxu1 %v3582_v40  ;;  %v3630_v40 = vcombine.high %v6223_v25, %v6221_v53 }
 0xa35   : > { %2631 = vmatpush1.bf16.msra.mxu0 %v3579_v58  ;;  %v3627_v58 = vcombine.low %v6220_v59, %v6219_v34 }
 0xa36   : > { %2632 = vmatprep.subr.bf16.mxu0 %v3576_v49  ;;  %2672 = vmatpush1.bf16.msra.mxu1 %v3581_v44  ;;  %v6224_v49 = vld [vmem:[#allocation86_spill] sm:$0xff]  ;;  %v6225_v44 = vld [vmem:[#allocation84_spill] sm:$0xff] }
 0xa37   : > { %2673 = vmatprep.subr.bf16.mxu1 %v3578_v14  ;;  %v3624_v14 = vcombine.high %v6225_v44, %v6224_v49 }
 0xa39   : > { %2633 = vmatpush1.bf16.msra.mxu0 %v3575_v18  ;;  %v3629_v18 = vcombine.low %v6223_v25, %v6222_v28 }
 0xa3a   : > { %2634 = vmatprep.subr.bf16.mxu0 %v3636_v5  ;;  %2674 = vmatpush1.bf16.msra.mxu1 %v3577_v8  ;;  %v6226_v5 = vld [vmem:[#allocation88_spill] sm:$0xff]  ;;  %v6227_v8 = vld [vmem:[#allocation85_spill] sm:$0xff] }
 0xa3b   : > { %2675 = vmatprep.subr.bf16.mxu1 %v3638_v31  ;;  %v3626_v31 = vcombine.high %v6227_v8, %v6226_v5 }
 0xa3d   : > { %2635 = vmatpush2.bf16.msra.mxu0 %v3635_v21  ;;  %v3623_v21 = vcombine.low %v6225_v44, %v6224_v49 }
 0xa3e   : > { %2636 = vmatprep.subr.bf16.mxu0 %v3632_v42  ;;  %2676 = vmatpush2.bf16.msra.mxu1 %v3637_v33  ;;  %v6228_v42 = vld [vmem:[#allocation82_spill] sm:$0xff]  ;;  %v6229_v33 = vld [vmem:[#allocation80_spill] sm:$0xff] }
 0xa3f   : > { %2677 = vmatprep.subr.bf16.mxu1 %v3634_v16  ;;  %v3620_v16 = vcombine.high %v6229_v33, %v6228_v42 }
 0xa41   : > { %2637 = vmatpush2.bf16.msra.mxu0 %v3631_v12  ;;  %v3625_v12 = vcombine.low %v6227_v8, %v6226_v5  ;;  %v6237_v5 = vld [vmem:[#allocation72_spill] sm:$0xff] }
 0xa42   : > { %2638 = vmatprep.subr.bf16.mxu0 %v3628_v19  ;;  %2678 = vmatpush2.bf16.msra.mxu1 %v3633_v0  ;;  %v6230_v19 = vld [vmem:[#allocation83_spill] sm:$0xff]  ;;  %v6231_v0 = vld [vmem:[#allocation81_spill] sm:$0xff]  ;;  %v6241_v8 = vld [vmem:[#allocation68_spill] sm:$0xff] }
 0xa43   : > { %2679 = vmatprep.subr.bf16.mxu1 %v3630_v40  ;;  %v3622_v53 = vcombine.high %v6231_v0, %v6230_v19  ;;  %v3619_v40 = vcombine.low %v6229_v33, %v6228_v42  ;;  %v6282_v33 = vld [vmem:[#allocation127_spill] sm:$0xff] }
 0xa45   : > { %2639 = vmatpush2.bf16.msra.mxu0 %v3627_v58  ;;  %v6232_v58 = vld [vmem:[#allocation78_spill] sm:$0xff] }
 0xa46   : > { %2640 = vmatprep.subr.bf16.mxu0 %v3624_v14  ;;  %2680 = vmatpush2.bf16.msra.mxu1 %v3629_v18  ;;  %v3616_v2 = vcombine.high %v6233_v1, %v6232_v58  ;;  %v3621_v14 = vcombine.low %v6231_v0, %v6230_v19  ;;  %v6234_v18 = vld [vmem:[#allocation79_spill] sm:$0xff] }
 0xa47   : > { %2681 = vmatprep.subr.bf16.mxu1 %v3626_v31  ;;  %v3618_v4 = vcombine.high %v6235_v3, %v6234_v18  ;;  %v3615_v31 = vcombine.low %v6233_v1, %v6232_v58 }
 0xa49   : > { %2641 = vmatpush2.bf16.msra.mxu0 %v3623_v21  ;;  %v6236_v21 = vld [vmem:[#allocation74_spill] sm:$0xff] }
 0xa4a   : > { %2642 = vmatprep.subr.bf16.mxu0 %v3620_v16  ;;  %2682 = vmatpush2.bf16.msra.mxu1 %v3625_v12  ;;  %v3612_v6 = vcombine.high %v6237_v5, %v6236_v21  ;;  %v3617_v16 = vcombine.low %v6235_v3, %v6234_v18  ;;  %v6238_v12 = vld [vmem:[#allocation75_spill] sm:$0xff] }
 0xa4b   : > { %2683 = vmatprep.subr.bf16.mxu1 %v3622_v53  ;;  %v3614_v0 = vcombine.high %v6239_v7, %v6238_v12  ;;  %v3611_v53 = vcombine.low %v6237_v5, %v6236_v21 }
 0xa4d   : > { %2643 = vmatpush2.bf16.msra.mxu0 %v3619_v40  ;;  %v6240_v40 = vld [vmem:[#allocation70_spill] sm:$0xff] }
 0xa4e   : > { %2644 = vmatprep.subr.bf16.mxu0 %v3616_v2  ;;  %2684 = vmatpush2.bf16.msra.mxu1 %v3621_v14  ;;  %v3608_v1 = vcombine.high %v6241_v8, %v6240_v40  ;;  %v3613_v2 = vcombine.low %v6239_v7, %v6238_v12  ;;  %v6242_v14 = vld [vmem:[#allocation71_spill] sm:$0xff]  ;;  %v6253_v7 = vld [vmem:[#allocation109_spill] sm:$0xff] }
 0xa4f   : > { %2685 = vmatprep.subr.bf16.mxu1 %v3618_v4  ;;  %v3610_v3 = vcombine.high %v6243_v9, %v6242_v14  ;;  %v3607_v4 = vcombine.low %v6241_v8, %v6240_v40 }
 0xa51   : > { %2645 = vmatpush2.bf16.msra.mxu0 %v3615_v31  ;;  %v2296_v31 = vpack.c.bf16 %v4500_v52, %v4500_v52  ;;  %v6248_v52 = vld [vmem:[#allocation114_spill] sm:$0xff] }
 0xa52   : > { %2646 = vmatprep.subr.bf16.mxu0 %v3612_v6  ;;  %2686 = vmatpush2.bf16.msra.mxu1 %v3617_v16  ;;  %v3609_v6 = vcombine.low %v6243_v9, %v6242_v14  ;;  %v6245_v16 = vld [vmem:[#allocation117_spill] sm:$0xff] }
 0xa53   : > { %2687 = vmatprep.subr.bf16.mxu1 %v3614_v0  ;;  %v6244_v0 = vld [vmem:[#allocation118_spill] sm:$0xff] }
 0xa54   : > { %v3649_v5 = vcombine.low %v6245_v16, %v6244_v0  ;;  %v6251_v0 = vld [vmem:[#allocation111_spill] sm:$0xff] }
 0xa55   : > { %2647 = vmatpush2.bf16.msra.mxu0 %v3611_v53  ;;  %v5996_v53 = vmov 0.0  }
 0xa56   : > { %2648 = vmatprep.subr.bf16.mxu0 %v3608_v1  ;;  %2688 = vmatpush2.bf16.msra.mxu1 %v3613_v2  ;;  %v6246_v1 = vld [vmem:[#allocation116_spill] sm:$0xff] }
 0xa57   : > { %2689 = vmatprep.subr.bf16.mxu1 %v3610_v3  ;;  %v6247_v3 = vld [vmem:[#allocation115_spill] sm:$0xff] }
 0xa58   : > { %v3648_v2 = vcombine.low %v6247_v3, %v6246_v1  ;;  %v6254_v1 = vld [vmem:[#allocation108_spill] sm:$0xff]  ;;  %v6255_v3 = vld [vmem:[#allocation107_spill] sm:$0xff] }
 0xa59   : > { %2649 = vmatpush2.bf16.msra.mxu0 %v3607_v4  ;;  %v6249_v4 = vld [vmem:[#allocation113_spill] sm:$0xff] }
 0xa5a   : > { %2690 = vmatpush2.bf16.msra.mxu1 %v3609_v6  ;;  %3724 = vmatprep.subr.bf16.mxu0 %v5996_v53  ;;  %v3647_v6 = vcombine.low %v6249_v4, %v6248_v52  ;;  %v6256_v52 = vld [vmem:[#allocation106_spill] sm:$0xff]  ;;  %v6257_v4 = vld [vmem:[#allocation105_spill] sm:$0xff] }
 0xa5b   : > { %3744 = vmatprep.subr.bf16.mxu1 %v5996_v53 }
 0xa5c   : > { %2651 = vmatmul.mubr.bf16.vlgmr.msra.gmra.mxu0 %v2296_v31 }
 0xa5d   : > { %2692 = vmatmul.mubr.bf16.vlgmr.msra.gmra.mxu1 %v2296_v31  ;;  %3725 = vmatpush3.bf16.msra.mxu0 %v3649_v5  ;;  %v6250_v31 = vld [vmem:[#allocation112_spill] sm:$0xff]  ;;  %v6252_v5 = vld [vmem:[#allocation110_spill] sm:$0xff] }
 0xa5e   : > { %3726 = vmatprep.subr.bf16.mxu0 %v5996_v53  ;;  %v3646_v16 = vcombine.low %v6251_v0, %v6250_v31  ;;  %v3645_v8 = vcombine.low %v6253_v7, %v6252_v5  ;;  %3740 = vmatprep.mubr.msk.bf16.mxu0 %vm4533_vm0, %v5996_v53  ;;  %v6258_v31 = vld [vmem:[#allocation103_spill] sm:$0xff]  ;;  %v6259_v7 = vld [vmem:[#allocation102_spill] sm:$0xff]  ;;  %v6261_v5 = vld [vmem:[#allocation100_spill] sm:$0xff] }
 0xa5f   : > { %3760 = vmatprep.mubr.msk.bf16.mxu1 %vm4533_vm0, %v5996_v53  ;;  %v3642_v0 = vcombine.low %v6259_v7, %v6258_v31 }
 0xa61   : > { %3727 = vmatpush3.bf16.msra.mxu0 %v3648_v2  ;;  %v3644_v2 = vcombine.low %v6255_v3, %v6254_v1 }
 0xa62   : > { %3728 = vmatprep.subr.bf16.mxu0 %v5996_v53 }
 0xa65   : > { %3729 = vmatpush3.bf16.msra.mxu0 %v3647_v6  ;;  %v3643_v6 = vcombine.low %v6257_v4, %v6256_v52 }
 0xa66   : > { %3730 = vmatprep.subr.bf16.mxu0 %v5996_v53 }
 0xa69   : > { %3731 = vmatpush3.bf16.msra.mxu0 %v3646_v16 }
 0xa6a   : > { %3732 = vmatprep.subr.bf16.mxu0 %v5996_v53 }
 0xa6d   : > { %3733 = vmatpush3.bf16.msra.mxu0 %v3645_v8  ;;  %v6260_v8 = vld [vmem:[#allocation140_spill] sm:$0xff] }
 0xa6e   : > { %3734 = vmatprep.subr.bf16.mxu0 %v5996_v53  ;;  %v6262_v9 = vrot.slane %v6260_v8, %v6261_v5  ;;  %v6264_v52 = vrot.slane %v6260_v8, %v6263_v11 }
 0xa71   : > { %3735 = vmatpush3.bf16.msra.mxu0 %v3644_v2 }
 0xa72   : > { %3736 = vmatprep.subr.bf16.mxu0 %v5996_v53 }
 0xa75   : > { %3737 = vmatpush3.bf16.msra.mxu0 %v3643_v6 }
 0xa76   : > { %3738 = vmatprep.subr.bf16.mxu0 %v5996_v53  ;;  %v6265_v53 = vld [vmem:[#allocation141_spill] sm:$0xff] }
 0xa77   : > { %v6266_v14 = vmov %v6265_v53  ;;  %v6267_v15 = vrot.slane %v6260_v8, %v6265_v53 }
 0xa79   : > { %3739 = vmatpush3.bf16.msra.mxu0 %v3642_v0 }
 0xb1c   : > { %v2652_v16 = vpop.f32.mrf.mxu0 }
 0xb1d   : > { %v2653_v1 = vadd.f32 %v2652_v16, %v6262_v9  ;;  %v2693_v3 = vpop.f32.mrf.mxu1  ;;  %v6268_v9 = vld [vmem:[#allocation142_spill] sm:$0xff] }
 0xb1e   : > { %v2654_v10 = vpop.f32.mrf.mxu0  ;;  %v6269_v16 = vrot.slane %v6260_v8, %v6268_v9 }
 0xb1f   : > { %v3639_v2 = vmul.f32 -1.442695, %v2653_v1  ;;  %v2655_v4 = vadd.f32 %v2654_v10, %v6264_v52  ;;  %v2695_v12 = vpop.f32.mrf.mxu1 }
 0xb20   : > { %v2656_v6 = vpop.f32.mrf.mxu0  ;;  %v2696_v17 = vadd.f32 %v2695_v12, %v6267_v15  ;;  %v2694_v1 = vadd.f32 %v2693_v3, %v6269_v16  ;;  %v6270_v3 = vld [vmem:[#allocation137_spill] sm:$0xff]  ;;  %v5702_v16 = vld [vmem:[#allocation3 + $0x8] sm:$0xf] }
 0xb21   : > { %4110 = vpow2.f32 %v3639_v2  ;;  %v3640_v13 = vmul.f32 -1.442695, %v2655_v4  ;;  %v2697_v31 = vpop.f32.mrf.mxu1 }
 0xb22   : > { %v2657_v7 = vpop.f32.mrf.mxu0  ;;  %v3641_v18 = vmul.f32 -1.442695, %v2696_v17 }
 0xb23   : > { %4112 = vpow2.f32 %v3640_v13  ;;  %v2698_v0 = vpop.f32.mrf.mxu1 }
 0xb24   : > { %4114 = vtanh.f32 %v2694_v1  ;;  %v5704_v1 = vld [vmem:[#allocation3] sm:$0xf] }
 0xb25   : > { %4116 = vpow2.f32 %v3641_v18 }
 0xb2e   : > { %v4111_v19 = vpop.eup %4110 }
 0xb2f   : > { %v2703_v20 = vadd.f32 1.0, %v4111_v19 }
 0xb30   : > { %v4113_v10 = vpop.eup %4112 }
 0xb31   : > { %4118 = vrcp.f32 %v2703_v20  ;;  %v2709_v2 = vadd.f32 1.0, %v4113_v10  ;;  %v4115_v52 = vpop.eup %4114  ;;  %v5706_v10 = vld [vmem:[#allocation3 + $0xc] sm:$0xf] }
 0xb32   : > { %v4117_v13 = vpop.eup %4116 }
 0xb33   : > { %4120 = vrcp.f32 %v2709_v2  ;;  %v2716_v31 = vadd.f32 1.0, %v4117_v13 }
 0xb35   : > { %4122 = vrcp.f32 %v2716_v31 }
 0xb3e   : > { %v4119_v4 = vpop.eup %4118 }
 0xb3f   : > { %v2720_v12 = vmul.f32 %v4119_v4, %v4115_v52  ;;  %v5708_v52 = vld [vmem:[#allocation3 + $0x4] sm:$0xf]  ;;  %v5710_v4 = vld [vmem:[#allocation3 + $0x14] sm:$0xf] }
 0xb40   : > { %v4121_v6 = vpop.eup %4120 }
 0xb41   : > { %v2719_v15 = vmul.f32 %v4504_v45, %v4121_v6 }
 0xb42   : > { %v4123_v17 = vpop.eup %4122 }
 0xb43   : > { %v5694_v45 = vadd.f32 %v2720_v12, %v2719_v15   ;;  %v5715_v12 = vld [vmem:[#allocation3 + $0x10] sm:$0xf] }
 0xb45   : > { %4124 = vtanh.f32 %v5694_v45 }
 0xb52   : > { %v4125_v19 = vpop.eup %4124 }
 0xb53   : > { %v5697_v53 = vmul.f32 %v4125_v19, %v4123_v17  }
 0xb55   : > { %v2724_v20 = vpack.c.bf16 %v5697_v53, %v5697_v53 }
 0xb57   : > { %3741 = vmatmul.mubr.bf16.vlgmr.msra.gmra.mxu0 %v2724_v20 }
 0xc17   : > { %v2807_v18 = vpop.f32.mrf.mxu0 }
 0xc18   : > { %v2808_v7 = vadd.f32 %v6270_v3, %v2807_v18  ;;  %v5720_v3 = vld [vmem:[#allocation3 + $0x1c] sm:$0xf] }
 0xc19   : > { %v3742_v0 = vpop.f32.mrf.mxu0 }
 0xc1a   : > { %v2821_v2 = vpack.c.bf16 %v2808_v7, %v2808_v7  ;;  %v5722_v7 = vld [vmem:[#allocation3 + $0x18] sm:$0xf] }
 0xc1b   : > { %v2810_v13 = vpop.f32.mrf.mxu0  ;;  %v3034_v36 = vunpack.c.l.bf16 %v5722_v7 }
 0xc1c   : > { %v2824_v6 = vadd.bf16 %v2821_v2, %v5702_v16  ;;  %v2822_v31 = vadd.bf16 %v2821_v2, %v5704_v1  ;;  %v2825_v15 = vadd.bf16 %v2821_v2, %v5706_v10  ;;  %v2823_v19 = vadd.bf16 %v2821_v2, %v5708_v52 }
 0xc1d   : > { %v3743_v17 = vpop.f32.mrf.mxu0  ;;  %v2827_v20 = vadd.bf16 %v2821_v2, %v5710_v4  ;;  %v2826_v18 = vadd.bf16 %v2821_v2, %v5715_v12  ;;  %v2829_v0 = vadd.bf16 %v2821_v2, %v5720_v3  ;;  %v2828_v13 = vadd.bf16 %v2821_v2, %v5722_v7  ;;  %v3140_v7 = vld [vmem:[#allocation4] sm:$0xf] }
 0xc1e   : > { %4126 = vtanh.bf16 %v2824_v6  ;;  %v6271_v17 = vld [vmem:[#allocation135_spill] sm:$0xff] }
 0xc1f   : > { %4128 = vtanh.bf16 %v2822_v31  ;;  %v2839_v6 = vpack.i.b16 %v6271_v17, %v6271_v17 }
 0xc20   : > { %4130 = vtanh.bf16 %v2825_v15 }
 0xc21   : > { %4132 = vtanh.bf16 %v2823_v19  ;;  %v2844_v31 = vrot.slane %v2839_v6, %v6261_v5 }
 0xc22   : > { %4134 = vtanh.bf16 %v2827_v20 }
 0xc23   : > { %4136 = vtanh.bf16 %v2826_v18 }
 0xc24   : > { %4138 = vtanh.bf16 %v2829_v0 }
 0xc25   : > { %4140 = vtanh.bf16 %v2828_v13 }
 0xc2c   : > { %v4127_v8 = vpop.eup %4126 }
 0xc2d   : > { %v4129_v21 = vpop.eup %4128  ;;  %v2847_v22 = vmul.bf16 %v4127_v8, %v2844_v31 }
 0xc2e   : > { %v4131_v15 = vpop.eup %4130  ;;  %v2845_v23 = vmul.bf16 %v4129_v21, %v2844_v31 }
 0xc2f   : > { %v4133_v24 = vpop.eup %4132  ;;  %v2855_v19 = vunpack.c.l.bf16 %v2847_v22  ;;  %v2848_v20 = vmul.bf16 %v4131_v15, %v2844_v31 }
 0xc30   : > { %v4135_v25 = vpop.eup %4134  ;;  %v2853_v26 = vunpack.c.l.bf16 %v2845_v23  ;;  %v2846_v18 = vmul.bf16 %v4133_v24, %v2844_v31  ;;  %v6272_v24 = vld [vmem:[#allocation134_spill] sm:$0xff] }
 0xc31   : > { %v4137_v27 = vpop.eup %4136  ;;  %2865 = vadd.xlane.f32.xlu1 %v2855_v19  ;;  %v2856_v2 = vunpack.c.l.bf16 %v2848_v20  ;;  %v2850_v17 = vmul.bf16 %v4135_v25, %v2844_v31  ;;  %v6274_v25 = vld [vmem:[#allocation132_spill] sm:$0xff]  ;;  %v6275_v19 = vld [vmem:[#allocation131_spill] sm:$0xff]  ;;  %v6276_v20 = vmov 0.0  }
 0xc32   : > { %2861 = vadd.xlane.f32.xlu0 %v2853_v26  ;;  %v4139_v0 = vpop.eup %4138  ;;  %v2854_v13 = vunpack.c.l.bf16 %v2846_v18  ;;  %v2849_v28 = vmul.bf16 %v4137_v27, %v2844_v31  ;;  %v6273_v26 = vld [vmem:[#allocation133_spill] sm:$0xff]  ;;  %v3656_v27 = vcombine.low %v6275_v19, %v6274_v25  ;;  %v6277_v18 = vld [vmem:[#allocation130_spill] sm:$0xff] }
 0xc33   : > { %v4141_v6 = vpop.eup %4140  ;;  %v2858_v8 = vunpack.c.l.bf16 %v2850_v17  ;;  %v2852_v29 = vmul.bf16 %v4139_v0, %v2844_v31  ;;  %v3657_v15 = vcombine.low %v6273_v26, %v6272_v24 }
 0xc34   : > { %v2857_v21 = vunpack.c.l.bf16 %v2849_v28  ;;  %v2851_v30 = vmul.bf16 %v4141_v6, %v2844_v31 }
 0xc35   : > { %2867 = vadd.xlane.f32.xlu1 %v2856_v2  ;;  %v2860_v22 = vunpack.c.l.bf16 %v2852_v29  ;;  %3745 = vmatpush3.bf16.msra.mxu1 %v3657_v15  ;;  %v6278_v2 = vld [vmem:[#allocation129_spill] sm:$0xff]  ;;  %v6280_v15 = vld [vmem:[#allocation87_spill] sm:$0xff] }
 0xc36   : > { %2863 = vadd.xlane.f32.xlu0 %v2854_v13  ;;  %v2859_v23 = vunpack.c.l.bf16 %v2851_v30  ;;  %3746 = vmatprep.subr.bf16.mxu1 %v6276_v20  ;;  %v3655_v28 = vcombine.low %v6278_v2, %v6277_v18 }
 0xc39   : > { %2871 = vadd.xlane.f32.xlu1 %v2858_v8  ;;  %3747 = vmatpush3.bf16.msra.mxu1 %v3656_v27 }
 0xc3a   : > { %2869 = vadd.xlane.f32.xlu0 %v2857_v21  ;;  %3748 = vmatprep.subr.bf16.mxu1 %v6276_v20  ;;  %v6279_v21 = vlaneseq }
 0xc3d   : > { %2875 = vadd.xlane.f32.xlu1 %v2860_v22  ;;  %3749 = vmatpush3.bf16.msra.mxu1 %v3655_v28  ;;  %v2903_v22 = vand.u32 127, %v6279_v21 }
 0xc3e   : > { %2873 = vadd.xlane.f32.xlu0 %v2859_v23  ;;  %3750 = vmatprep.subr.bf16.mxu1 %v6276_v20 }
 0xc3f   : > { %v5740_v25 = vsub.s32 %v2903_v22, %v6280_v15 }
 0xcba   : > { %v2866_v30 = vpop.xlane.xlu1 %2865 }
 0xcbb   : > { %v2862_v29 = vpop.xlane.xlu0 %2861 }
 0xcbc   : > { %4142 = vtanh.f32 %v2862_v29 }
 0xcbd   : > { %4144 = vtanh.f32 %v2866_v30 }
 0xcbe   : > { %v2868_v31 = vpop.xlane.xlu1 %2867 }
 0xcbf   : > { %4146 = vtanh.f32 %v2868_v31  ;;  %v2864_v17 = vpop.xlane.xlu0 %2863 }
 0xcc0   : > { %4148 = vtanh.f32 %v2864_v17 }
 0xcc2   : > { %v2872_v0 = vpop.xlane.xlu1 %2871 }
 0xcc3   : > { %4150 = vtanh.f32 %v2872_v0  ;;  %v2870_v13 = vpop.xlane.xlu0 %2869 }
 0xcc4   : > { %4152 = vtanh.f32 %v2870_v13 }
 0xcc6   : > { %v2876_v6 = vpop.xlane.xlu1 %2875 }
 0xcc7   : > { %4154 = vtanh.f32 %v2876_v6  ;;  %v2874_v8 = vpop.xlane.xlu0 %2873 }
 0xcc8   : > { %4156 = vtanh.f32 %v2874_v8 }
 0xcc9   : > { %v4143_v23 = vpop.eup %4142 }
 0xcca   : > { %v4145_v24 = vpop.eup %4144  ;;  %v2885_v19 = vmul.f32 10.0, %v4143_v23 }
 0xccb   : > { %v2887_v18 = vmul.f32 10.0, %v4145_v24 }
 0xccc   : > { %v4147_v26 = vpop.eup %4146  ;;  %v2907_v29 = vrot.slane %v2885_v19, %v5740_v25 }
 0xccd   : > { %v4149_v27 = vpop.eup %4148  ;;  %v2888_v2 = vmul.f32 10.0, %v4147_v26  ;;  %v2915_v0 = vrot.slane %v2887_v18, %v5740_v25 }
 0xcce   : > { %v2886_v28 = vmul.f32 10.0, %v4149_v27 }
 0xccf   : > { %v2919_v6 = vrot.slane %v2888_v2, %v5740_v25 }
 0xcd0   : > { %v4151_v30 = vpop.eup %4150  ;;  %v2911_v31 = vrot.slane %v2886_v28, %v5740_v25 }
 0xcd1   : > { %v4153_v17 = vpop.eup %4152  ;;  %v2890_v13 = vmul.f32 10.0, %v4151_v30 }
 0xcd2   : > { %v2937_v8 = vsel %vm2936_vm1, %v2911_v31, %v2907_v29  ;;  %v2889_v21 = vmul.f32 10.0, %v4153_v17 }
 0xcd3   : > { %v2939_v22 = vsel %vm2938_vm2, %v2915_v0, %v2937_v8  ;;  %v2927_v27 = vrot.slane %v2890_v13, %v5740_v25 }
 0xcd4   : > { %v4155_v23 = vpop.eup %4154  ;;  %v2941_v24 = vsel %vm2940_vm3, %v2919_v6, %v2939_v22  ;;  %v2923_v26 = vrot.slane %v2889_v21, %v5740_v25 }
 0xcd5   : > { %v4157_v19 = vpop.eup %4156  ;;  %v2892_v28 = vmul.f32 10.0, %v4155_v23 }
 0xcd6   : > { %v2943_v18 = vsel %vm2942_vm4, %v2923_v26, %v2941_v24  ;;  %v2891_v30 = vmul.f32 10.0, %v4157_v19 }
 0xcd7   : > { %v2935_v2 = vrot.slane %v2892_v28, %v5740_v25  ;;  %v2945_v31 = vsel %vm2944_vm5, %v2927_v27, %v2943_v18 }
 0xcd8   : > { %v2931_v29 = vrot.slane %v2891_v30, %v5740_v25 }
 0xcda   : > { %v2947_v17 = vsel %vm2946_vm6, %v2931_v29, %v2945_v31 }
 0xcdb   : > { %v2949_v0 = vsel %vm2948_vm7, %v2935_v2, %v2947_v17 }
 0xcdc   : > { %v2951_v13 = vsel %vm2893_vm8, -100000.0, %v2949_v0 }
 0xcdd   : > { %v2953_v6 = vsel %vm2952_vm9, %v2951_v13, -inf }
 0xcde   : > { %v2954_v8 = vrot.slane %v2953_v6, 4 }
 0xce0   : > { %v2955_v21 = vmax.f32 %v2953_v6, %v2954_v8  ;;  %v3654_v6 = vcombine.low %v6282_v33, %v6281_v32  ;;  %v6283_v8 = vld [vmem:[#allocation126_spill] sm:$0xff]  ;;  %v6288_v33 = vld [vmem:[#allocation121_spill] sm:$0xff] }
 0xce1   : > { %v6287_v32 = vld [vmem:[#allocation122_spill] sm:$0xff] }
 0xce2   : > { %v2956_v22 = vrot.slane %v2955_v21, 2  ;;  %3751 = vmatpush3.bf16.msra.mxu1 %v3654_v6  ;;  %v6291_v6 = vld [vmem:[#allocation120_spill] sm:$0xff] }
 0xce3   : > { %3752 = vmatprep.subr.bf16.mxu1 %v6276_v20 }
 0xce4   : > { %v2957_v23 = vmax.f32 %v2955_v21, %v2956_v22 }
 0xce6   : > { %v2958_v24 = vrot.slane %v2957_v23, 1 }
 0xce8   : > { %v2959_v26 = vmax.f32 %v2957_v23, %v2958_v24  ;;  %v6285_v24 = vld [vmem:[#allocation124_spill] sm:$0xff] }
 0xcea   : > { %v2960_v19 = vsub.f32 %v2951_v13, %v2959_v26  ;;  %v6284_v13 = vld [vmem:[#allocation125_spill] sm:$0xff]  ;;  %v6286_v26 = vld [vmem:[#allocation123_spill] sm:$0xff] }
 0xceb   : > { %v3653_v21 = vcombine.low %v6284_v13, %v6283_v8  ;;  %v6292_v8 = vld [vmem:[#allocation119_spill] sm:$0xff] }
 0xcec   : > { %v2961_v27 = vmul.f32 1.442695, %v2960_v19  ;;  %v3652_v19 = vcombine.low %v6286_v26, %v6285_v24  ;;  %v3650_v13 = vcombine.low %v6292_v8, %v6291_v6  ;;  %v6294_v24 = vld [vmem:[#allocation145_spill] sm:$0xff] }
 0xced   : > { %3753 = vmatpush3.bf16.msra.mxu1 %v3653_v21  ;;  %v6293_v21 = vld [vmem:[#allocation143_spill] sm:$0xff] }
 0xcee   : > { %4158 = vpow2.f32 %v2961_v27  ;;  %3754 = vmatprep.subr.bf16.mxu1 %v6276_v20 }
 0xcf1   : > { %3755 = vmatpush3.bf16.msra.mxu1 %v3652_v19  ;;  %v3029_v19 = vunpack.c.l.bf16 %v5708_v52  ;;  %v3033_v52 = vunpack.c.l.bf16 %v5710_v4  ;;  %v6295_v4 = vld [vmem:[#allocation138_spill] sm:$0xff] }
 0xcf2   : > { %3756 = vmatprep.subr.bf16.mxu1 %v6276_v20 }
 0xcfb   : > { %v4159_v28 = vpop.eup %4158 }
 0xcfc   : > { %v2963_v18 = vsel %vm2952_vm9, %v4159_v28, 0.0 }
 0xcfd   : > { %v2964_v30 = vrot.slane %v2963_v18, 4 }
 0xcff   : > { %v2965_v29 = vadd.f32 %v2964_v30, %v2963_v18  ;;  %v3651_v30 = vcombine.low %v6288_v33, %v6287_v32  ;;  %v3030_v33 = vunpack.c.l.bf16 %v5702_v16 }
 0xd01   : > { %v2966_v2 = vrot.slane %v2965_v29, 2  ;;  %3757 = vmatpush3.bf16.msra.mxu1 %v3651_v30 }
 0xd02   : > { %3758 = vmatprep.subr.bf16.mxu1 %v6276_v20 }
 0xd03   : > { %v2967_v31 = vadd.f32 %v2966_v2, %v2965_v29 }
 0xd05   : > { %v2968_v17 = vrot.slane %v2967_v31, 1  ;;  %3759 = vmatpush3.bf16.msra.mxu1 %v3650_v13  ;;  %v3032_v13 = vunpack.c.l.bf16 %v5715_v12 }
 0xd07   : > { %v2969_v0 = vadd.f32 %v2968_v17, %v2967_v31  ;;  %v6290_v17 = vld [vmem:[#allocation146_spill] sm:$0xff] }
 0xd09   : > { %4160 = vrcp.f32 %v2969_v0 }
 0xd16   : > { %v4161_v22 = vpop.eup %4160 }
 0xd17   : > { %v2971_v23 = vmul.f32 %v4161_v22, %v4159_v28  ;;  %v6289_v28 = vld [vmem:[#allocation144_spill] sm:$0xff] }
 0xd19   : > { %v2982_v27 = vrot.slane %v2971_v23, %v6263_v11  ;;  %v2975_v18 = vrot.slane %v2971_v23, %v6261_v5  ;;  %v2989_v29 = vrot.slane %v2971_v23, %v6268_v9  ;;  %v3003_v2 = vrot.slane %v2971_v23, %v6289_v28 }
 0xd1a   : > { %v2996_v31 = vrot.slane %v2971_v23, %v6266_v14  ;;  %v3017_v0 = vrot.slane %v2971_v23, %v6290_v17  ;;  %v3010_v22 = vrot.slane %v2971_v23, %v6293_v21  ;;  %v3024_v26 = vrot.slane %v2971_v23, %v6294_v24 }
 0xd1b   : > { %2984 = vbcast.lane.b32.xlu1 %v2982_v27, 256  ;;  %2977 = vbcast.lane.b32.xlu0 %v2975_v18, 256  ;;  %v3028_v27 = vunpack.c.l.bf16 %v5704_v1 }
 0xd1f   : > { %2991 = vbcast.lane.b32.xlu1 %v2989_v29, 256  ;;  %3005 = vbcast.lane.b32.xlu0 %v3003_v2, 256 }
 0xd23   : > { %2998 = vbcast.lane.b32.xlu1 %v2996_v31, 256  ;;  %3019 = vbcast.lane.b32.xlu0 %v3017_v0, 256  ;;  %v3031_v0 = vunpack.c.l.bf16 %v5706_v10 }
 0xd27   : > { %3012 = vbcast.lane.b32.xlu1 %v3010_v22, 256 }
 0xd2b   : > { %3026 = vbcast.lane.b32.xlu1 %v3024_v26, 256 }
 0xd8d   : > { %v2985_v18 = vpop.permute.xlu1 %2984  ;;  %v2978_v32 = vpop.permute.xlu0 %2977 }
 0xd8e   : > { %v3037_v30 = vmul.f32 %v3029_v19, %v2985_v18  ;;  %v3036_v29 = vmul.f32 %v3028_v27, %v2978_v32  ;;  %v3035_v32 = vunpack.c.l.bf16 %v5720_v3 }
 0xd90   : > { %v3044_v8 = vadd.f32 %v3037_v30, %v3036_v29 }
 0xd91   : > { %v2992_v2 = vpop.permute.xlu1 %2991  ;;  %v3006_v6 = vpop.permute.xlu0 %3005 }
 0xd92   : > { %v3038_v31 = vmul.f32 %v3030_v33, %v2992_v2  ;;  %v3040_v1 = vmul.f32 %v3032_v13, %v3006_v6  ;;  %v3141_v13 = vld [vmem:[#allocation4 + $0x4] sm:$0xf] }
 0xd94   : > { %v3045_v22 = vadd.f32 %v3044_v8, %v3038_v31 }
 0xd95   : > { %v2999_v23 = vpop.permute.xlu1 %2998  ;;  %v3020_v16 = vpop.permute.xlu0 %3019 }
 0xd96   : > { %v3039_v26 = vmul.f32 %v3031_v0, %v2999_v23  ;;  %v3042_v10 = vmul.f32 %v3034_v36, %v3020_v16  ;;  %v3145_v23 = vld [vmem:[#allocation4 + $0x14] sm:$0xf]  ;;  %v3143_v16 = vld [vmem:[#allocation4 + $0xc] sm:$0xf] }
 0xd98   : > { %v3046_v34 = vadd.f32 %v3045_v22, %v3039_v26  ;;  %v3142_v26 = vld [vmem:[#allocation4 + $0x8] sm:$0xf] }
 0xd99   : > { %v3013_v19 = vpop.permute.xlu1 %3012 }
 0xd9a   : > { %v3041_v27 = vmul.f32 %v3033_v52, %v3013_v19  ;;  %v3047_v18 = vadd.f32 %v3046_v34, %v3040_v1  ;;  %v3147_v52 = vld [vmem:[#allocation4 + $0x1c] sm:$0xf] }
 0xd9c   : > { %v3048_v33 = vadd.f32 %v3047_v18, %v3041_v27 }
 0xd9d   : > { %v3027_v30 = vpop.permute.xlu1 %3026 }
 0xd9e   : > { %v3043_v29 = vmul.f32 %v3035_v32, %v3027_v30  ;;  %v3049_v12 = vadd.f32 %v3048_v33, %v3042_v10  ;;  %v3144_v10 = vld [vmem:[#allocation4 + $0x10] sm:$0xf]  ;;  %v3146_v30 = vld [vmem:[#allocation4 + $0x18] sm:$0xf] }
 0xda0   : > { %v3050_v2 = vadd.f32 %v3049_v12, %v3043_v29  ;;  %v6296_v29 = vld [vmem:[#allocation136_spill] sm:$0xff] }
 0xda1   : > { %v3166_v12 = vpack.i.b16 %v6296_v29, %v6296_v29 }
 0xda2   : > { %v3051_v31 = vpack.c.bf16 %v3050_v2, %v3050_v2 }
 0xda4   : > { %3761 = vmatmul.mubr.bf16.vlgmr.msra.gmra.mxu1 %v3051_v31  ;;  %v3171_v31 = vrot.slane %v3166_v12, %v6261_v5 }
 0xe64   : > { %v3134_v0 = vpop.f32.mrf.mxu1 }
 0xe65   : > { %v3135_v6 = vadd.f32 %v6295_v4, %v3134_v0 }
 0xe66   : > { %v3762_v8 = vpop.f32.mrf.mxu1 }
 0xe67   : > { %v3148_v22 = vpack.c.bf16 %v3135_v6, %v3135_v6 }
 0xe68   : > { %v3137_v34 = vpop.f32.mrf.mxu1 }
 0xe69   : > { %v3150_v3 = vadd.bf16 %v3148_v22, %v3141_v13  ;;  %v3149_v36 = vadd.bf16 %v3148_v22, %v3140_v7  ;;  %v3154_v1 = vadd.bf16 %v3148_v22, %v3145_v23  ;;  %v3151_v27 = vadd.bf16 %v3148_v22, %v3142_v26 }
 0xe6a   : > { %v3763_v19 = vpop.f32.mrf.mxu1  ;;  %v3156_v18 = vadd.bf16 %v3148_v22, %v3147_v52  ;;  %v3152_v32 = vadd.bf16 %v3148_v22, %v3143_v16  ;;  %v3153_v33 = vadd.bf16 %v3148_v22, %v3144_v10  ;;  %v3155_v2 = vadd.bf16 %v3148_v22, %v3146_v30 }
 0xe6b   : > { %4162 = vtanh.bf16 %v3150_v3 }
 0xe6c   : > { %4164 = vtanh.bf16 %v3149_v36 }
 0xe6d   : > { %4166 = vtanh.bf16 %v3154_v1 }
 0xe6e   : > { %4168 = vtanh.bf16 %v3151_v27 }
 0xe6f   : > { %4170 = vtanh.bf16 %v3156_v18 }
 0xe70   : > { %4172 = vtanh.bf16 %v3152_v32 }
 0xe71   : > { %4174 = vtanh.bf16 %v3153_v33 }
 0xe72   : > { %4176 = vtanh.bf16 %v3155_v2 }
 0xe79   : > { %v4163_v0 = vpop.eup %4162 }
 0xe7a   : > { %v4165_v4 = vpop.eup %4164  ;;  %v3173_v6 = vmul.bf16 %v4163_v0, %v3171_v31 }
 0xe7b   : > { %v4167_v8 = vpop.eup %4166  ;;  %v3172_v13 = vmul.bf16 %v4165_v4, %v3171_v31 }
 0xe7c   : > { %v4169_v7 = vpop.eup %4168  ;;  %v3181_v23 = vunpack.c.l.bf16 %v3173_v6  ;;  %v3177_v26 = vmul.bf16 %v4167_v8, %v3171_v31 }
 0xe7d   : > { %v4171_v34 = vpop.eup %4170  ;;  %v3180_v52 = vunpack.c.l.bf16 %v3172_v13  ;;  %v3174_v3 = vmul.bf16 %v4169_v7, %v3171_v31 }
 0xe7e   : > { %v4173_v36 = vpop.eup %4172  ;;  %3190 = vadd.xlane.f32.xlu1 %v3181_v23  ;;  %v3185_v1 = vunpack.c.l.bf16 %v3177_v26  ;;  %v3179_v16 = vmul.bf16 %v4171_v34, %v3171_v31 }
 0xe7f   : > { %3188 = vadd.xlane.f32.xlu0 %v3180_v52  ;;  %v3182_v22 = vunpack.c.l.bf16 %v3174_v3  ;;  %v3175_v19 = vmul.bf16 %v4173_v36, %v3171_v31  ;;  %v4175_v27 = vpop.eup %4174 }
 0xe80   : > { %v3187_v18 = vunpack.c.l.bf16 %v3179_v16  ;;  %v3176_v10 = vmul.bf16 %v4175_v27, %v3171_v31  ;;  %v4177_v33 = vpop.eup %4176 }
 0xe81   : > { %v3183_v32 = vunpack.c.l.bf16 %v3175_v19  ;;  %v3178_v29 = vmul.bf16 %v4177_v33, %v3171_v31 }
 0xe82   : > { %3198 = vadd.xlane.f32.xlu1 %v3185_v1  ;;  %v3184_v30 = vunpack.c.l.bf16 %v3176_v10 }
 0xe83   : > { %3192 = vadd.xlane.f32.xlu0 %v3182_v22  ;;  %v3186_v12 = vunpack.c.l.bf16 %v3178_v29 }
 0xe86   : > { %3202 = vadd.xlane.f32.xlu1 %v3187_v18 }
 0xe87   : > { %3194 = vadd.xlane.f32.xlu0 %v3183_v32 }
 0xe8b   : > { %3196 = vadd.xlane.f32.xlu0 %v3184_v30 }
 0xe8f   : > { %3200 = vadd.xlane.f32.xlu0 %v3186_v12 }
 0xf07   : > { %v3191_v2 = vpop.xlane.xlu1 %3190 }
 0xf08   : > { %v3189_v0 = vpop.xlane.xlu0 %3188  ;;  %4178 = vtanh.f32 %v3191_v2 }
 0xf09   : > { %4180 = vtanh.f32 %v3189_v0 }
 0xf0b   : > { %v3199_v6 = vpop.xlane.xlu1 %3198 }
 0xf0c   : > { %v3193_v4 = vpop.xlane.xlu0 %3192 }
 0xf0d   : > { %4182 = vtanh.f32 %v3193_v4 }
 0xf0f   : > { %v3203_v13 = vpop.xlane.xlu1 %3202 }
 0xf10   : > { %v3195_v8 = vpop.xlane.xlu0 %3194 }
 0xf11   : > { %4184 = vtanh.f32 %v3195_v8 }
 0xf12   : > { %4186 = vtanh.f32 %v3199_v6 }
 0xf14   : > { %v3197_v7 = vpop.xlane.xlu0 %3196 }
 0xf15   : > { %4188 = vtanh.f32 %v3197_v7  ;;  %v4179_v23 = vpop.eup %4178 }
 0xf16   : > { %4190 = vtanh.f32 %v3203_v13  ;;  %v4181_v31 = vpop.eup %4180  ;;  %v3213_v52 = vmul.f32 10.0, %v4179_v23 }
 0xf17   : > { %v3212_v3 = vmul.f32 10.0, %v4181_v31 }
 0xf18   : > { %v3201_v26 = vpop.xlane.xlu0 %3200  ;;  %v3235_v22 = vrot.slane %v3213_v52, %v5740_v25  ;;  %v3271_v52 = vld [vmem:[%s3270_s5] sm:$0xff] }
 0xf19   : > { %4192 = vtanh.f32 %v3201_v26  ;;  %v3231_v19 = vrot.slane %v3212_v3, %v5740_v25 }
 0xf1a   : > { %v4183_v34 = vpop.eup %4182 }
 0xf1b   : > { %v3214_v36 = vmul.f32 10.0, %v4183_v34  ;;  %v3260_v29 = vsel %vm2936_vm1, %v3235_v22, %v3231_v19 }
 0xf1d   : > { %v3239_v18 = vrot.slane %v3214_v36, %v5740_v25 }
 0xf1e   : > { %v4185_v1 = vpop.eup %4184 }
 0xf1f   : > { %v3215_v16 = vmul.f32 10.0, %v4185_v1  ;;  %v4187_v27 = vpop.eup %4186  ;;  %v3261_v2 = vsel %vm2938_vm2, %v3239_v18, %v3260_v29 }
 0xf20   : > { %v3217_v12 = vmul.f32 10.0, %v4187_v27 }
 0xf21   : > { %v3243_v10 = vrot.slane %v3215_v16, %v5740_v25 }
 0xf22   : > { %v4189_v32 = vpop.eup %4188  ;;  %v3251_v23 = vrot.slane %v3217_v12, %v5740_v25 }
 0xf23   : > { %v4191_v33 = vpop.eup %4190  ;;  %v3216_v30 = vmul.f32 10.0, %v4189_v32  ;;  %v3262_v8 = vsel %vm2940_vm3, %v3243_v10, %v3261_v2 }
 0xf24   : > { %v3219_v6 = vmul.f32 10.0, %v4191_v33 }
 0xf25   : > { %v3247_v0 = vrot.slane %v3216_v30, %v5740_v25 }
 0xf26   : > { %v4193_v4 = vpop.eup %4192  ;;  %v3259_v31 = vrot.slane %v3219_v6, %v5740_v25 }
 0xf27   : > { %v3263_v13 = vsel %vm2942_vm4, %v3247_v0, %v3262_v8  ;;  %v3218_v7 = vmul.f32 10.0, %v4193_v4 }
 0xf28   : > { %v3264_v34 = vsel %vm2944_vm5, %v3251_v23, %v3263_v13 }
 0xf29   : > { %v3255_v26 = vrot.slane %v3218_v7, %v5740_v25 }
 0xf2b   : > { %v3265_v3 = vsel %vm2946_vm6, %v3255_v26, %v3264_v34 }
 0xf2c   : > { %v3266_v36 = vsel %vm2948_vm7, %v3259_v31, %v3265_v3 }
 0xf2d   : > { %v3268_v1 = vsel %vm2893_vm8, -100000.0, %v3266_v36 }
 0xf2e   : > { %v3272_v16 = vadd.f32 %v3271_v52, %v3268_v1  ;;  %v3295_v22 = vsel %vm2952_vm9, %v3268_v1, -inf }
 0xf2f   : > { %v3296_v19 = vrot.slane %v3295_v22, 4 }
 0xf30   : > { %v3273_v27 = vsel %vm2952_vm9, %v3272_v16, -inf }
 0xf31   : > { %v3274_v18 = vrot.slane %v3273_v27, 4  ;;  %v3297_v32 = vmax.f32 %v3295_v22, %v3296_v19 }
 0xf33   : > { %v3275_v25 = vmax.f32 %v3273_v27, %v3274_v18  ;;  %v3298_v10 = vrot.slane %v3297_v32, 2 }
 0xf35   : > { %v3276_v33 = vrot.slane %v3275_v25, 2  ;;  %v3299_v30 = vmax.f32 %v3297_v32, %v3298_v10 }
 0xf37   : > { %v3277_v29 = vmax.f32 %v3275_v25, %v3276_v33  ;;  %v3300_v12 = vrot.slane %v3299_v30, 1 }
 0xf39   : > { %v3278_v2 = vrot.slane %v3277_v29, 1  ;;  %v3301_v0 = vmax.f32 %v3299_v30, %v3300_v12 }
 0xf3b   : > { %v3279_v4 = vmax.f32 %v3277_v29, %v3278_v2  ;;  %v3302_v6 = vsub.f32 %v3268_v1, %v3301_v0 }
 0xf3d   : > { %vm3280_vm10 = vcmp.eq.f32.partialorder %v3272_v16, %v3279_v4  ;;  %v3303_v8 = vmul.f32 1.442695, %v3302_v6 }
 0xf3e   : > { %v3281_v13 = vsel %vm3280_vm10, %v6280_v15, 8 }
 0xf3f   : > { %v3282_v7 = vsel %vm2952_vm9, %v3281_v13, 2147483647  ;;  %4194 = vpow2.f32 %v3303_v8 }
 0xf40   : > { %v3283_v23 = vrot.slane %v3282_v7, 4 }
 0xf42   : > { %vm3284_vm11 = vcmp.lt.s32.totalorder %v3282_v7, %v3283_v23 }
 0xf43   : > { %v3285_v26 = vsel %vm3284_vm11, %v3282_v7, %v3283_v23 }
 0xf44   : > { %v3286_v31 = vrot.slane %v3285_v26, 2 }
 0xf46   : > { %vm3287_vm12 = vcmp.lt.s32.totalorder %v3285_v26, %v3286_v31 }
 0xf47   : > { %v3288_v34 = vsel %vm3287_vm12, %v3285_v26, %v3286_v31 }
 0xf48   : > { %v3289_v52 = vrot.slane %v3288_v34, 1 }
 0xf4a   : > { %vm3290_vm14 = vcmp.lt.s32.totalorder %v3288_v34, %v3289_v52 }
 0xf4b   : > { %v3291_v3 = vsel %vm3290_vm14, %v3288_v34, %v3289_v52 }
 0xf4c   : > { %v4195_v36 = vpop.eup %4194  ;;  %vm3292_vm15 = vcmp.eq.s32.totalorder %v6280_v15, %v3291_v3  ;;  %3328 = vst.msk [vmem:[%s3327_s24] sm:$0x1] %vm3325_vm13, %v3291_v3 }
 0xf4d   : > { %v5822_v16 = vsel %vm3292_vm15, 1.0, %v6276_v20  ;;  %v3305_v22 = vsel %vm2952_vm9, %v4195_v36, 0.0 }
 0xf4e   : > { %v3306_v19 = vrot.slane %v3305_v22, 4  ;;  %v3329_v27 = vmax.f32 %v4496_v35, %v5822_v16   ;;  %v3340_v18 = vrot.slane %v5822_v16, %v6263_v11  ;;  %v3315_v32 = vmul.f32 %v5822_v16, %v3268_v1 }
 0xf4f   : > { %v3333_v25 = vrot.slane %v5822_v16, %v6261_v5  ;;  %v3347_v20 = vrot.slane %v5822_v16, %v6268_v9  ;;  %v3361_v29 = vrot.slane %v5822_v16, %v6289_v28  ;;  %v3354_v5 = vrot.slane %v5822_v16, %v6266_v14 }
 0xf50   : > { %v3307_v10 = vadd.f32 %v3306_v19, %v3305_v22  ;;  %3342 = vbcast.lane.b32.xlu1 %v3340_v18, 256  ;;  %v3316_v30 = vsel %vm2952_vm9, %v3315_v32, 0.0  ;;  %v3375_v2 = vrot.slane %v5822_v16, %v6290_v17  ;;  %v3368_v8 = vrot.slane %v5822_v16, %v6293_v21  ;;  %v3387_v22 = vld [vmem:[#allocation2] sm:$0xff]  ;;  %v3386_v18 = vld [vmem:[#allocation2 + $0x30] sm:$0xff] }
 0xf51   : > { %3335 = vbcast.lane.b32.xlu0 %v3333_v25, 256  ;;  %v3317_v1 = vrot.slane %v3316_v30, 4  ;;  %v3382_v7 = vrot.slane %v5822_v16, %v6294_v24  ;;  %v3388_v25 = vld [vmem:[#allocation2 + $0x18] sm:$0xff]  ;;  %v6297_v35 = vmov %v3329_v27 }
 0xf52   : > { %v3308_v33 = vrot.slane %v3307_v10, 2 }
 0xf53   : > { %v3318_v6 = vadd.f32 %v3317_v1, %v3316_v30  ;;  %v3390_v1 = vld [vmem:[#allocation2 + $0x8] sm:$0xff] }
 0xf54   : > { %v3309_v12 = vadd.f32 %v3308_v33, %v3307_v10  ;;  %3349 = vbcast.lane.b32.xlu1 %v3347_v20, 256 }
 0xf55   : > { %3363 = vbcast.lane.b32.xlu0 %v3361_v29, 256  ;;  %v3319_v13 = vrot.slane %v3318_v6, 2 }
 0xf56   : > { %v3310_v11 = vrot.slane %v3309_v12, 1 }
 0xf57   : > { %v3320_v23 = vadd.f32 %v3319_v13, %v3318_v6  ;;  %v3392_v13 = vld [vmem:[#allocation2 + $0x28] sm:$0xff] }
 0xf58   : > { %v3311_v4 = vadd.f32 %v3310_v11, %v3309_v12  ;;  %3356 = vbcast.lane.b32.xlu1 %v3354_v5, 256  ;;  %v3389_v12 = vld [vmem:[#allocation2 + $0x10] sm:$0xff] }
 0xf59   : > { %3377 = vbcast.lane.b32.xlu0 %v3375_v2, 256  ;;  %v3321_v26 = vrot.slane %v3320_v23, 1 }
 0xf5a   : > { %4196 = vlog2.f32 %v3311_v4  ;;  %v3391_v4 = vld [vmem:[#allocation2 + $0x20] sm:$0xff] }
 0xf5b   : > { %v3322_v3 = vadd.f32 %v3321_v26, %v3320_v23 }
 0xf5c   : > { %3370 = vbcast.lane.b32.xlu1 %v3368_v8, 256 }
 0xf60   : > { %3384 = vbcast.lane.b32.xlu1 %v3382_v7, 256 }
 0xf67   : > { %v4197_v31 = vpop.eup %4196 }
 0xf68   : > { %v3313_v34 = vmul.f32 0.6931472, %v4197_v31 }
 0xf6a   : > { %v3314_v52 = vadd.f32 %v3313_v34, %v3301_v0  ;;  %v3393_v34 = vld [vmem:[#allocation2 + $0x38] sm:$0xff] }
 0xf6c   : > { %v3323_v36 = vsub.f32 %v3322_v3, %v3314_v52 }
 0xf6e   : > { %3326 = vst.msk [vmem:[%s3324_s27] sm:$0x1] %vm3325_vm13, %v3323_v36 }
 0xfc2   : > { %v3343_v19 = vpop.permute.xlu1 %3342 }
 0xfc3   : > { %v3336_v32 = vpop.permute.xlu0 %3335  ;;  %v3395_v10 = vmul.f32 %v3387_v22, %v3343_v19 }
 0xfc4   : > { %v3394_v33 = vmul.f32 %v3386_v18, %v3336_v32 }
 0xfc6   : > { %v3350_v20 = vpop.permute.xlu1 %3349  ;;  %v3402_v11 = vadd.f32 %v3395_v10, %v3394_v33 }
 0xfc7   : > { %v3396_v30 = vmul.f32 %v3388_v25, %v3350_v20  ;;  %v3364_v29 = vpop.permute.xlu0 %3363 }
 0xfc8   : > { %v3398_v6 = vmul.f32 %v3390_v1, %v3364_v29 }
 0xfc9   : > { %v3403_v0 = vadd.f32 %v3402_v11, %v3396_v30 }
 0xfca   : > { %v3357_v5 = vpop.permute.xlu1 %3356 }
 0xfcb   : > { %v3397_v2 = vmul.f32 %v3389_v12, %v3357_v5  ;;  %v3378_v7 = vpop.permute.xlu0 %3377 }
 0xfcc   : > { %v3400_v52 = vmul.f32 %v3392_v13, %v3378_v7 }
 0xfcd   : > { %v3404_v8 = vadd.f32 %v3403_v0, %v3397_v2 }
 0xfce   : > { %v3371_v23 = vpop.permute.xlu1 %3370 }
 0xfcf   : > { %v3399_v26 = vmul.f32 %v3391_v4, %v3371_v23  ;;  %v3405_v31 = vadd.f32 %v3404_v8, %v3398_v6 }
 0xfd1   : > { %v3406_v3 = vadd.f32 %v3405_v31, %v3399_v26  ;;  %2290 = sbr.rel (!%p2288_p13) target bundleno = 2585 (0xa19), region = 168 }
 0xfd2   : > { %v3385_v36 = vpop.permute.xlu1 %3384 }
 0xfd3   : > { %v3401_v22 = vmul.f32 %v3393_v34, %v3385_v36  ;;  %v3407_v19 = vadd.f32 %v3406_v3, %v3400_v52 }
 0xfd5   : > { %v3408_v52 = vadd.f32 %v3407_v19, %v3401_v22  }
 0xfd6   :  { %4429 = shalt.err (!%p4426_p4)
}
 0xfd7   :  { %3418 = dma.vmem_to_hbm [thread:$0]  %s3416_s26, 128, %s5887_s18, [#allocation9]  }
 0xfd8   :  { %s4438_s6 = scalar_lea.vmem %s3426_s4, 128  ;;  %p4443_p6 = scmp.lt.s32.totalorder %s3426_s4, %s3426_s4 }
 0xfd9   :  { %p4439_p5 = scmp.ne.s32.totalorder %s3426_s4, %s4438_s6  ;;  %p4444_p7 = scmp.lt.s32.totalorder %s4438_s6, %s4438_s6 }
 0xfdb   :  { %p4445_p8 = por %p4444_p7, %p4443_p6 }
 0xfdd   :  { %p4446_p9 = pnand %p4445_p8, %p4439_p5 }
 0xfdf   :  { %4449 = shalt.err (!%p4446_p9)
}
 0xfe0   :  { %3428 = dma.vmem_to_hbm [thread:$0]  %s3426_s4, 128, %s5888_s19, [#allocation27]  }
 0xfe1   :  { %4490 = dma.done.wait [#allocation9], 128  }
 0xfe2   :  { %4491 = vsyncadd [#allocation9], 4294967168 }
 0xfe3   :  { %4492 = dma.done.wait [#allocation27], 128  }
 0xfe4   :  { %4493 = vsyncadd [#allocation27], 4294967168 }
 0xfe5   :  { %3435 = vsyncpa [#allocation8], 1 }
 0xfe6   :  { %3436 = vsyncpa [#allocation11], 1 }
 0xfe7   :  { %3437 = vsyncpa [#allocation14], 1 }
 0xfe8   :  { %3438 = vsyncpa [#allocation17], 1 }
 0xfe9   :  { %3439 = vsyncpa [#allocation20], 1 }
 0xfea   :  { %3440 = vsyncpa [#allocation23], 1 }
 0xfeb   :  { %3441 = vsyncpa [#allocation9], 1 }
 0xfec   :  { %3442 = vsyncpa [#allocation27], 1 }

</bundles_post_ra>
